<compile_context>
chip_gen: v6e
topology: v6e:2x2x1
jax: 0.10.0
libtpu: 0.0.40
codegen_flags: <defaults>
</compile_context>

<pallas_src>
import numpy as np
import jax
import jax.numpy as jnp
from jax.experimental import pallas as pl
from jax.experimental.pallas import tpu as pltpu

WROW = 32  # lane width of the flat spatial grid: flat index = row * 32 + col


def _fused_cnn_kernel(x_ref, w1_ref, b1_ref, w2_ref, b2_ref, s1_ref,
                      w3_ref, b3_ref, w4_ref, b4_ref, s2_ref,
                      fc1w_ref, fc1b_ref, fc2w_ref, fc2b_ref, o_ref):
    f32 = jnp.float32

    def fit_cols(a, n):
        # pad (with zeros) or trim the lane dimension to exactly n columns
        c = a.shape[1]
        if c >= n:
            return a[:, :n]
        return jnp.concatenate([a, jnp.zeros((a.shape[0], n - c), f32)], axis=1)

    def conv3x3_relu(f, wcat, b, out_len):
        # f: (Cin, L) on the flat grid, wcat: (Cout, 9*Cin) packed (kh, kw, cin), b: (Cout, 1)
        f = fit_cols(f, out_len + 2 * WROW + 2)
        patches = jnp.concatenate(
            [f[:, kh * WROW + kw: kh * WROW + kw + out_len]
             for kh in range(3) for kw in range(3)], axis=0)          # (9*Cin, out_len)
        g = jnp.dot(wcat, patches, preferred_element_type=f32)        # (Cout, out_len)
        return jnp.maximum(g + b, 0.0)

    def pool2x2_windows(g):
        # elementwise max over the 2x2 window anchored at every flat position
        out_len = g.shape[1]
        ge = fit_cols(g, out_len + WROW + 1)
        return jnp.maximum(
            jnp.maximum(ge[:, 0:out_len], ge[:, 1:1 + out_len]),
            jnp.maximum(ge[:, WROW:WROW + out_len], ge[:, WROW + 1:WROW + 1 + out_len]))

    x = x_ref[0]                                                      # (1, 30*32) padded image
    g1 = conv3x3_relu(x, w1_ref[...], b1_ref[...], 28 * WROW)         # conv1 (pad=1) -> (3, 896)
    g2 = conv3x3_relu(g1, w2_ref[...], b2_ref[...], 26 * WROW)        # conv2 (valid) -> (6, 832)
    # TODO(synk): Dropout(0.25) is identity here (eval-mode semantics).
    p1 = pool2x2_windows(g2)                                          # (6, 832)
    # downsample 26x26 -> 13x13 and re-pack into a zero-padded 15x32 grid for conv3
    f3 = jnp.dot(p1, s1_ref[...], preferred_element_type=f32)         # (6, 480)
    g3 = conv3x3_relu(f3, w3_ref[...], b3_ref[...], 13 * WROW)        # conv3 (pad=1) -> (16, 416)
    # rebuild a zero-padded 15x32 grid for conv4: mask junk columns, shift by one row+col
    col = jax.lax.broadcasted_iota(jnp.int32, g3.shape, 1) & (WROW - 1)
    g3m = jnp.where(col < 13, g3, 0.0)
    f4 = jnp.concatenate([jnp.zeros((16, WROW + 1), f32), g3m], axis=1)   # (16, 449)
    g4 = conv3x3_relu(f4, w4_ref[...], b4_ref[...], 13 * WROW)        # conv4 (pad=1) -> (16, 416)
    p2 = pool2x2_windows(g4)                                          # (16, 416)
    # TODO(synk): Dropout() is identity here (eval-mode semantics).
    p2t = jnp.dot(p2, s2_ref[...], preferred_element_type=f32)        # (16, 36): [c, h*6+w]
    # flatten in PyTorch NCHW order (index = c*36 + h*6 + w) via a lane concat of channel rows
    xflat = jnp.concatenate([p2t[c:c + 1, :] for c in range(16)], axis=1)  # (1, 576)
    h = jnp.dot(xflat, fc1w_ref[...], preferred_element_type=f32) + fc1b_ref[...]
    h = jnp.maximum(h, 0.0)
    # TODO(synk): Dropout(0.5) is identity here (eval-mode semantics).
    logits = jnp.dot(h, fc2w_ref[...], preferred_element_type=f32) + fc2b_ref[...]
    m = jnp.max(logits, axis=-1, keepdims=True)
    e = jnp.exp(logits - m)
    o_ref[0] = e / jnp.sum(e, axis=-1, keepdims=True)                 # softmax over classes


def _pool_selectors():
    # pool1: select 2x2-window maxima of the 26x26 map and place them (with +1,+1 shift)
    # into a zero-padded 15x32 flat grid (ready-padded input for conv3).
    s1 = np.zeros((26 * WROW, 15 * WROW), np.float32)
    for h in range(13):
        for w in range(13):
            s1[(2 * h) * WROW + 2 * w, (h + 1) * WROW + (w + 1)] = 1.0
    # pool2: select 2x2-window maxima of the 13x13 map (floor -> 6x6) into columns h*6+w.
    s2 = np.zeros((13 * WROW, 36), np.float32)
    for h in range(6):
        for w in range(6):
            s2[(2 * h) * WROW + 2 * w, h * 6 + w] = 1.0
    return s1, s2


def cnn_forward(x, params):
    # x: (N, 28, 28, 1) float32, NHWC (the PyTorch model permutes to NCHW itself).
    n = x.shape[0]
    # pad H,W by 1 (conv2d1 padding=1), pad W to 32 lanes, flatten each image to one row.
    xf = jnp.pad(x[..., 0], ((0, 0), (1, 1), (1, 3))).reshape(n, 1, 30 * WROW)

    def pack_conv(w):          # HWIO (3, 3, cin, cout) -> (cout, 9*cin) ordered (kh, kw, cin)
        cin, cout = w.shape[2], w.shape[3]
        return w.reshape(9 * cin, cout).T

    w1 = pack_conv(params["w1"]); b1 = params["b1"].reshape(-1, 1)
    w2 = pack_conv(params["w2"]); b2 = params["b2"].reshape(-1, 1)
    w3 = pack_conv(params["w3"]); b3 = params["b3"].reshape(-1, 1)
    w4 = pack_conv(params["w4"]); b4 = params["b4"].reshape(-1, 1)
    fc1w = params["fc1_w"]; fc1b = params["fc1_b"].reshape(1, -1)
    fc2w = params["fc2_w"]; fc2b = params["fc2_b"].reshape(1, -1)
    s1, s2 = _pool_selectors()

    def full(a):
        nd = a.ndim
        return pl.BlockSpec(tuple(a.shape), lambda i, _nd=nd: (0,) * _nd)

    out = pl.pallas_call(
        _fused_cnn_kernel,
        out_shape=jax.ShapeDtypeStruct((n, 1, 10), jnp.float32),
        grid=(n,),
        in_specs=[
            pl.BlockSpec((1, 1, 30 * WROW), lambda i: (i, 0, 0)),
            full(w1), full(b1), full(w2), full(b2), full(s1),
            full(w3), full(b3), full(w4), full(b4), full(s2),
            full(fc1w), full(fc1b), full(fc2w), full(fc2b),
        ],
        out_specs=pl.BlockSpec((1, 1, 10), lambda i: (i, 0, 0)),
        compiler_params=pltpu.CompilerParams(dimension_semantics=("parallel",)),
    )(xf, w1, b1, w2, b2, s1, w3, b3, w4, b4, s2, fc1w, fc1b, fc2w, fc2b)
    return out[:, 0, :]


def init_params(key):
    ks = jax.random.split(key, 12)

    def u(k, shape, fan_in):
        bound = 1.0 / float(fan_in) ** 0.5
        return jax.random.uniform(k, shape, jnp.float32, -bound, bound)

    p = {}
    p["w1"] = u(ks[0], (3, 3, 1, 3), 1 * 9)      # Conv2d(1, 3, 3x3), HWIO
    p["b1"] = u(ks[1], (3,), 1 * 9)
    p["w2"] = u(ks[2], (3, 3, 3, 6), 3 * 9)      # Conv2d(3, 6, 3x3)
    p["b2"] = u(ks[3], (6,), 3 * 9)
    p["w3"] = u(ks[4], (3, 3, 6, 16), 6 * 9)     # Conv2d(6, 16, 3x3)
    p["b3"] = u(ks[5], (16,), 6 * 9)
    p["w4"] = u(ks[6], (3, 3, 16, 16), 16 * 9)   # Conv2d(16, 16, 3x3)
    p["b4"] = u(ks[7], (16,), 16 * 9)
    # fc weights stored as (in, out); the 576 input axis is ordered (C, H, W) to match
    # PyTorch's flatten of the NCHW feature map.
    p["fc1_w"] = u(ks[8], (576, 512), 576)       # Linear(576, 512)
    p["fc1_b"] = u(ks[9], (512,), 576)
    p["fc2_w"] = u(ks[10], (512, 10), 512)       # Linear(512, 10)
    p["fc2_b"] = u(ks[11], (10,), 512)
    return p


if __name__ == "__main__":
    key = jax.random.PRNGKey(0)
    pkey, xkey = jax.random.split(key)
    params = init_params(pkey)
    x = jax.random.normal(xkey, (2, 28, 28, 1), jnp.float32)  # 28x28 forced by fc1(576)

    out = jax.jit(cnn_forward)(x, params)
    out = jax.block_until_ready(out)

    assert out.shape == (2, 10)
    assert bool(jnp.all(jnp.isfinite(out)))
    assert bool(jnp.all(jnp.abs(jnp.sum(out, axis=-1) - 1.0) < 1e-4))
    print("KERNEL_OK")
</pallas_src>

<mosaic_0001>
module attributes {stable_mosaic.version = 11 : i64} {
  func.func @_fused_cnn_kernel(%arg0: i32, %arg1: memref<1x1x960xf32, #tpu.memory_space<vmem>>, %arg2: memref<3x9xf32, #tpu.memory_space<vmem>>, %arg3: memref<3x1xf32, #tpu.memory_space<vmem>>, %arg4: memref<6x27xf32, #tpu.memory_space<vmem>>, %arg5: memref<6x1xf32, #tpu.memory_space<vmem>>, %arg6: memref<832x480xf32, #tpu.memory_space<vmem>>, %arg7: memref<16x54xf32, #tpu.memory_space<vmem>>, %arg8: memref<16x1xf32, #tpu.memory_space<vmem>>, %arg9: memref<16x144xf32, #tpu.memory_space<vmem>>, %arg10: memref<16x1xf32, #tpu.memory_space<vmem>>, %arg11: memref<416x36xf32, #tpu.memory_space<vmem>>, %arg12: memref<576x512xf32, #tpu.memory_space<vmem>>, %arg13: memref<1x512xf32, #tpu.memory_space<vmem>>, %arg14: memref<512x10xf32, #tpu.memory_space<vmem>>, %arg15: memref<1x10xf32, #tpu.memory_space<vmem>>, %arg16: memref<1x1x10xf32, #tpu.memory_space<vmem>>) attributes {dimension_semantics = [#tpu.dimension_semantics<parallel>], iteration_bounds = array<i64: 2>, scalar_prefetch = 0 : i64, scratch_operands = 0 : i64, tpu.core_type = #tpu.core_type<tc>, window_params = [{transform_indices = @transform_0, window_bounds = array<i64: 1, 1, 960>}, {pipeline_mode = #tpu.pipeline_mode<synchronous>, transform_indices = @transform_1, window_bounds = array<i64: 3, 9>}, {pipeline_mode = #tpu.pipeline_mode<synchronous>, transform_indices = @transform_2, window_bounds = array<i64: 3, 1>}, {pipeline_mode = #tpu.pipeline_mode<synchronous>, transform_indices = @transform_3, window_bounds = array<i64: 6, 27>}, {pipeline_mode = #tpu.pipeline_mode<synchronous>, transform_indices = @transform_4, window_bounds = array<i64: 6, 1>}, {pipeline_mode = #tpu.pipeline_mode<synchronous>, transform_indices = @transform_5, window_bounds = array<i64: 832, 480>}, {pipeline_mode = #tpu.pipeline_mode<synchronous>, transform_indices = @transform_6, window_bounds = array<i64: 16, 54>}, {pipeline_mode = #tpu.pipeline_mode<synchronous>, transform_indices = @transform_7, window_bounds = array<i64: 16, 1>}, {pipeline_mode = #tpu.pipeline_mode<synchronous>, transform_indices = @transform_8, window_bounds = array<i64: 16, 144>}, {pipeline_mode = #tpu.pipeline_mode<synchronous>, transform_indices = @transform_9, window_bounds = array<i64: 16, 1>}, {pipeline_mode = #tpu.pipeline_mode<synchronous>, transform_indices = @transform_10, window_bounds = array<i64: 416, 36>}, {pipeline_mode = #tpu.pipeline_mode<synchronous>, transform_indices = @transform_11, window_bounds = array<i64: 576, 512>}, {pipeline_mode = #tpu.pipeline_mode<synchronous>, transform_indices = @transform_12, window_bounds = array<i64: 1, 512>}, {pipeline_mode = #tpu.pipeline_mode<synchronous>, transform_indices = @transform_13, window_bounds = array<i64: 512, 10>}, {pipeline_mode = #tpu.pipeline_mode<synchronous>, transform_indices = @transform_14, window_bounds = array<i64: 1, 10>}, {transform_indices = @transform_15, window_bounds = array<i64: 1, 1, 10>}]} {
    %c0 = arith.constant 0 : index
    %c0_0 = arith.constant 0 : index
    %c0_1 = arith.constant 0 : index
    %0 = vector.load %arg1[%c0, %c0_0, %c0_1] : memref<1x1x960xf32, #tpu.memory_space<vmem>>, vector<1x1x960xf32>
    %1 = vector.shape_cast %0 : vector<1x1x960xf32> to vector<1x960xf32>
    %c0_2 = arith.constant 0 : index
    %c0_3 = arith.constant 0 : index
    %2 = vector.load %arg2[%c0_2, %c0_3] : memref<3x9xf32, #tpu.memory_space<vmem>>, vector<3x9xf32>
    %c0_4 = arith.constant 0 : index
    %c0_5 = arith.constant 0 : index
    %3 = vector.load %arg3[%c0_4, %c0_5] : memref<3x1xf32, #tpu.memory_space<vmem>>, vector<3x1xf32>
    %cst = arith.constant 0.000000e+00 : f32
    %4 = vector.broadcast %cst : f32 to vector<1x2xf32>
    %5 = tpu.concatenate %1, %4 in 1 : vector<1x960xf32>, vector<1x2xf32> -> vector<1x962xf32>
    %6 = vector.extract_strided_slice %5 {offsets = [0, 0], sizes = [1, 896], strides = [1, 1]} : vector<1x962xf32> to vector<1x896xf32>
    %7 = vector.extract_strided_slice %5 {offsets = [0, 1], sizes = [1, 896], strides = [1, 1]} : vector<1x962xf32> to vector<1x896xf32>
    %8 = vector.extract_strided_slice %5 {offsets = [0, 2], sizes = [1, 896], strides = [1, 1]} : vector<1x962xf32> to vector<1x896xf32>
    %9 = vector.extract_strided_slice %5 {offsets = [0, 32], sizes = [1, 896], strides = [1, 1]} : vector<1x962xf32> to vector<1x896xf32>
    %10 = vector.extract_strided_slice %5 {offsets = [0, 33], sizes = [1, 896], strides = [1, 1]} : vector<1x962xf32> to vector<1x896xf32>
    %11 = vector.extract_strided_slice %5 {offsets = [0, 34], sizes = [1, 896], strides = [1, 1]} : vector<1x962xf32> to vector<1x896xf32>
    %12 = vector.extract_strided_slice %5 {offsets = [0, 64], sizes = [1, 896], strides = [1, 1]} : vector<1x962xf32> to vector<1x896xf32>
    %13 = vector.extract_strided_slice %5 {offsets = [0, 65], sizes = [1, 896], strides = [1, 1]} : vector<1x962xf32> to vector<1x896xf32>
    %14 = vector.extract_strided_slice %5 {offsets = [0, 66], sizes = [1, 896], strides = [1, 1]} : vector<1x962xf32> to vector<1x896xf32>
    %15 = tpu.concatenate %6, %7, %8, %9, %10, %11, %12, %13, %14 in 0 : vector<1x896xf32>, vector<1x896xf32>, vector<1x896xf32>, vector<1x896xf32>, vector<1x896xf32>, vector<1x896xf32>, vector<1x896xf32>, vector<1x896xf32>, vector<1x896xf32> -> vector<9x896xf32>
    %cst_6 = arith.constant dense<0.000000e+00> : vector<3x896xf32>
    %16 = tpu.matmul %2, %15, %cst_6 {dimension_numbers = #tpu.dot_dimension_numbers<[1], [0], [0], [1], [0, 0, 1, 1], [], []>} : vector<3x9xf32>, vector<9x896xf32>, vector<3x896xf32> -> vector<3x896xf32>
    %17 = vector.broadcast %3 : vector<3x1xf32> to vector<3x896xf32>
    %18 = arith.addf %16, %17 : vector<3x896xf32>
    %cst_7 = arith.constant 0.000000e+00 : f32
    %19 = vector.broadcast %cst_7 : f32 to vector<3x896xf32>
    %20 = arith.maximumf %18, %19 : vector<3x896xf32>
    %c0_8 = arith.constant 0 : index
    %c0_9 = arith.constant 0 : index
    %21 = vector.load %arg4[%c0_8, %c0_9] : memref<6x27xf32, #tpu.memory_space<vmem>>, vector<6x27xf32>
    %c0_10 = arith.constant 0 : index
    %c0_11 = arith.constant 0 : index
    %22 = vector.load %arg5[%c0_10, %c0_11] : memref<6x1xf32, #tpu.memory_space<vmem>>, vector<6x1xf32>
    %cst_12 = arith.constant 0.000000e+00 : f32
    %23 = vector.broadcast %cst_12 : f32 to vector<3x2xf32>
    %24 = tpu.concatenate %20, %23 in 1 : vector<3x896xf32>, vector<3x2xf32> -> vector<3x898xf32>
    %25 = vector.extract_strided_slice %24 {offsets = [0, 0], sizes = [3, 832], strides = [1, 1]} : vector<3x898xf32> to vector<3x832xf32>
    %26 = vector.extract_strided_slice %24 {offsets = [0, 1], sizes = [3, 832], strides = [1, 1]} : vector<3x898xf32> to vector<3x832xf32>
    %27 = vector.extract_strided_slice %24 {offsets = [0, 2], sizes = [3, 832], strides = [1, 1]} : vector<3x898xf32> to vector<3x832xf32>
    %28 = vector.extract_strided_slice %24 {offsets = [0, 32], sizes = [3, 832], strides = [1, 1]} : vector<3x898xf32> to vector<3x832xf32>
    %29 = vector.extract_strided_slice %24 {offsets = [0, 33], sizes = [3, 832], strides = [1, 1]} : vector<3x898xf32> to vector<3x832xf32>
    %30 = vector.extract_strided_slice %24 {offsets = [0, 34], sizes = [3, 832], strides = [1, 1]} : vector<3x898xf32> to vector<3x832xf32>
    %31 = vector.extract_strided_slice %24 {offsets = [0, 64], sizes = [3, 832], strides = [1, 1]} : vector<3x898xf32> to vector<3x832xf32>
    %32 = vector.extract_strided_slice %24 {offsets = [0, 65], sizes = [3, 832], strides = [1, 1]} : vector<3x898xf32> to vector<3x832xf32>
    %33 = vector.extract_strided_slice %24 {offsets = [0, 66], sizes = [3, 832], strides = [1, 1]} : vector<3x898xf32> to vector<3x832xf32>
    %34 = tpu.concatenate %25, %26, %27, %28, %29, %30, %31, %32, %33 in 0 : vector<3x832xf32>, vector<3x832xf32>, vector<3x832xf32>, vector<3x832xf32>, vector<3x832xf32>, vector<3x832xf32>, vector<3x832xf32>, vector<3x832xf32>, vector<3x832xf32> -> vector<27x832xf32>
    %cst_13 = arith.constant dense<0.000000e+00> : vector<6x832xf32>
    %35 = tpu.matmul %21, %34, %cst_13 {dimension_numbers = #tpu.dot_dimension_numbers<[1], [0], [0], [1], [0, 0, 1, 1], [], []>} : vector<6x27xf32>, vector<27x832xf32>, vector<6x832xf32> -> vector<6x832xf32>
    %36 = vector.broadcast %22 : vector<6x1xf32> to vector<6x832xf32>
    %37 = arith.addf %35, %36 : vector<6x832xf32>
    %cst_14 = arith.constant 0.000000e+00 : f32
    %38 = vector.broadcast %cst_14 : f32 to vector<6x832xf32>
    %39 = arith.maximumf %37, %38 : vector<6x832xf32>
    %cst_15 = arith.constant 0.000000e+00 : f32
    %40 = vector.broadcast %cst_15 : f32 to vector<6x33xf32>
    %41 = tpu.concatenate %39, %40 in 1 : vector<6x832xf32>, vector<6x33xf32> -> vector<6x865xf32>
    %42 = vector.extract_strided_slice %41 {offsets = [0, 0], sizes = [6, 832], strides = [1, 1]} : vector<6x865xf32> to vector<6x832xf32>
    %43 = vector.extract_strided_slice %41 {offsets = [0, 1], sizes = [6, 832], strides = [1, 1]} : vector<6x865xf32> to vector<6x832xf32>
    %44 = arith.maximumf %42, %43 : vector<6x832xf32>
    %45 = vector.extract_strided_slice %41 {offsets = [0, 32], sizes = [6, 832], strides = [1, 1]} : vector<6x865xf32> to vector<6x832xf32>
    %46 = vector.extract_strided_slice %41 {offsets = [0, 33], sizes = [6, 832], strides = [1, 1]} : vector<6x865xf32> to vector<6x832xf32>
    %47 = arith.maximumf %45, %46 : vector<6x832xf32>
    %48 = arith.maximumf %44, %47 : vector<6x832xf32>
    %c0_16 = arith.constant 0 : index
    %c0_17 = arith.constant 0 : index
    %49 = vector.load %arg6[%c0_16, %c0_17] : memref<832x480xf32, #tpu.memory_space<vmem>>, vector<832x480xf32>
    %cst_18 = arith.constant dense<0.000000e+00> : vector<6x480xf32>
    %50 = tpu.matmul %48, %49, %cst_18 {dimension_numbers = #tpu.dot_dimension_numbers<[1], [0], [0], [1], [0, 0, 1, 1], [], []>} : vector<6x832xf32>, vector<832x480xf32>, vector<6x480xf32> -> vector<6x480xf32>
    %c0_19 = arith.constant 0 : index
    %c0_20 = arith.constant 0 : index
    %51 = vector.load %arg7[%c0_19, %c0_20] : memref<16x54xf32, #tpu.memory_space<vmem>>, vector<16x54xf32>
    %c0_21 = arith.constant 0 : index
    %c0_22 = arith.constant 0 : index
    %52 = vector.load %arg8[%c0_21, %c0_22] : memref<16x1xf32, #tpu.memory_space<vmem>>, vector<16x1xf32>
    %cst_23 = arith.constant 0.000000e+00 : f32
    %53 = vector.broadcast %cst_23 : f32 to vector<6x2xf32>
    %54 = tpu.concatenate %50, %53 in 1 : vector<6x480xf32>, vector<6x2xf32> -> vector<6x482xf32>
    %55 = vector.extract_strided_slice %54 {offsets = [0, 0], sizes = [6, 416], strides = [1, 1]} : vector<6x482xf32> to vector<6x416xf32>
    %56 = vector.extract_strided_slice %54 {offsets = [0, 1], sizes = [6, 416], strides = [1, 1]} : vector<6x482xf32> to vector<6x416xf32>
    %57 = vector.extract_strided_slice %54 {offsets = [0, 2], sizes = [6, 416], strides = [1, 1]} : vector<6x482xf32> to vector<6x416xf32>
    %58 = vector.extract_strided_slice %54 {offsets = [0, 32], sizes = [6, 416], strides = [1, 1]} : vector<6x482xf32> to vector<6x416xf32>
    %59 = vector.extract_strided_slice %54 {offsets = [0, 33], sizes = [6, 416], strides = [1, 1]} : vector<6x482xf32> to vector<6x416xf32>
    %60 = vector.extract_strided_slice %54 {offsets = [0, 34], sizes = [6, 416], strides = [1, 1]} : vector<6x482xf32> to vector<6x416xf32>
    %61 = vector.extract_strided_slice %54 {offsets = [0, 64], sizes = [6, 416], strides = [1, 1]} : vector<6x482xf32> to vector<6x416xf32>
    %62 = vector.extract_strided_slice %54 {offsets = [0, 65], sizes = [6, 416], strides = [1, 1]} : vector<6x482xf32> to vector<6x416xf32>
    %63 = vector.extract_strided_slice %54 {offsets = [0, 66], sizes = [6, 416], strides = [1, 1]} : vector<6x482xf32> to vector<6x416xf32>
    %64 = tpu.concatenate %55, %56, %57, %58, %59, %60, %61, %62, %63 in 0 : vector<6x416xf32>, vector<6x416xf32>, vector<6x416xf32>, vector<6x416xf32>, vector<6x416xf32>, vector<6x416xf32>, vector<6x416xf32>, vector<6x416xf32>, vector<6x416xf32> -> vector<54x416xf32>
    %cst_24 = arith.constant dense<0.000000e+00> : vector<16x416xf32>
    %65 = tpu.matmul %51, %64, %cst_24 {dimension_numbers = #tpu.dot_dimension_numbers<[1], [0], [0], [1], [0, 0, 1, 1], [], []>} : vector<16x54xf32>, vector<54x416xf32>, vector<16x416xf32> -> vector<16x416xf32>
    %66 = vector.broadcast %52 : vector<16x1xf32> to vector<16x416xf32>
    %67 = arith.addf %65, %66 : vector<16x416xf32>
    %cst_25 = arith.constant 0.000000e+00 : f32
    %68 = vector.broadcast %cst_25 : f32 to vector<16x416xf32>
    %69 = arith.maximumf %67, %68 : vector<16x416xf32>
    %70 = tpu.iota {dimensions = array<i32: 1>} : vector<16x416xi32>
    %c31_i32 = arith.constant 31 : i32
    %71 = vector.broadcast %c31_i32 : i32 to vector<16x416xi32>
    %72 = arith.andi %70, %71 : vector<16x416xi32>
    %c13_i32 = arith.constant 13 : i32
    %73 = vector.broadcast %c13_i32 : i32 to vector<16x416xi32>
    %74 = arith.cmpi slt, %72, %73 : vector<16x416xi32>
    %cst_26 = arith.constant 0.000000e+00 : f32
    %75 = vector.broadcast %cst_26 : f32 to vector<16x416xf32>
    %76 = arith.select %74, %69, %75 : vector<16x416xi1>, vector<16x416xf32>
    %cst_27 = arith.constant 0.000000e+00 : f32
    %77 = vector.broadcast %cst_27 : f32 to vector<16x33xf32>
    %78 = tpu.concatenate %77, %76 in 1 : vector<16x33xf32>, vector<16x416xf32> -> vector<16x449xf32>
    %c0_28 = arith.constant 0 : index
    %c0_29 = arith.constant 0 : index
    %79 = vector.load %arg9[%c0_28, %c0_29] : memref<16x144xf32, #tpu.memory_space<vmem>>, vector<16x144xf32>
    %c0_30 = arith.constant 0 : index
    %c0_31 = arith.constant 0 : index
    %80 = vector.load %arg10[%c0_30, %c0_31] : memref<16x1xf32, #tpu.memory_space<vmem>>, vector<16x1xf32>
    %cst_32 = arith.constant 0.000000e+00 : f32
    %81 = vector.broadcast %cst_32 : f32 to vector<16x33xf32>
    %82 = tpu.concatenate %78, %81 in 1 : vector<16x449xf32>, vector<16x33xf32> -> vector<16x482xf32>
    %83 = vector.extract_strided_slice %82 {offsets = [0, 0], sizes = [16, 416], strides = [1, 1]} : vector<16x482xf32> to vector<16x416xf32>
    %84 = vector.extract_strided_slice %82 {offsets = [0, 1], sizes = [16, 416], strides = [1, 1]} : vector<16x482xf32> to vector<16x416xf32>
    %85 = vector.extract_strided_slice %82 {offsets = [0, 2], sizes = [16, 416], strides = [1, 1]} : vector<16x482xf32> to vector<16x416xf32>
    %86 = vector.extract_strided_slice %82 {offsets = [0, 32], sizes = [16, 416], strides = [1, 1]} : vector<16x482xf32> to vector<16x416xf32>
    %87 = vector.extract_strided_slice %82 {offsets = [0, 33], sizes = [16, 416], strides = [1, 1]} : vector<16x482xf32> to vector<16x416xf32>
    %88 = vector.extract_strided_slice %82 {offsets = [0, 34], sizes = [16, 416], strides = [1, 1]} : vector<16x482xf32> to vector<16x416xf32>
    %89 = vector.extract_strided_slice %82 {offsets = [0, 64], sizes = [16, 416], strides = [1, 1]} : vector<16x482xf32> to vector<16x416xf32>
    %90 = vector.extract_strided_slice %82 {offsets = [0, 65], sizes = [16, 416], strides = [1, 1]} : vector<16x482xf32> to vector<16x416xf32>
    %91 = vector.extract_strided_slice %82 {offsets = [0, 66], sizes = [16, 416], strides = [1, 1]} : vector<16x482xf32> to vector<16x416xf32>
    %92 = tpu.concatenate %83, %84, %85, %86, %87, %88, %89, %90, %91 in 0 : vector<16x416xf32>, vector<16x416xf32>, vector<16x416xf32>, vector<16x416xf32>, vector<16x416xf32>, vector<16x416xf32>, vector<16x416xf32>, vector<16x416xf32>, vector<16x416xf32> -> vector<144x416xf32>
    %cst_33 = arith.constant dense<0.000000e+00> : vector<16x416xf32>
    %93 = tpu.matmul %79, %92, %cst_33 {dimension_numbers = #tpu.dot_dimension_numbers<[1], [0], [0], [1], [0, 0, 1, 1], [], []>} : vector<16x144xf32>, vector<144x416xf32>, vector<16x416xf32> -> vector<16x416xf32>
    %94 = vector.broadcast %80 : vector<16x1xf32> to vector<16x416xf32>
    %95 = arith.addf %93, %94 : vector<16x416xf32>
    %cst_34 = arith.constant 0.000000e+00 : f32
    %96 = vector.broadcast %cst_34 : f32 to vector<16x416xf32>
    %97 = arith.maximumf %95, %96 : vector<16x416xf32>
    %cst_35 = arith.constant 0.000000e+00 : f32
    %98 = vector.broadcast %cst_35 : f32 to vector<16x33xf32>
    %99 = tpu.concatenate %97, %98 in 1 : vector<16x416xf32>, vector<16x33xf32> -> vector<16x449xf32>
    %100 = vector.extract_strided_slice %99 {offsets = [0, 0], sizes = [16, 416], strides = [1, 1]} : vector<16x449xf32> to vector<16x416xf32>
    %101 = vector.extract_strided_slice %99 {offsets = [0, 1], sizes = [16, 416], strides = [1, 1]} : vector<16x449xf32> to vector<16x416xf32>
    %102 = arith.maximumf %100, %101 : vector<16x416xf32>
    %103 = vector.extract_strided_slice %99 {offsets = [0, 32], sizes = [16, 416], strides = [1, 1]} : vector<16x449xf32> to vector<16x416xf32>
    %104 = vector.extract_strided_slice %99 {offsets = [0, 33], sizes = [16, 416], strides = [1, 1]} : vector<16x449xf32> to vector<16x416xf32>
    %105 = arith.maximumf %103, %104 : vector<16x416xf32>
    %106 = arith.maximumf %102, %105 : vector<16x416xf32>
    %c0_36 = arith.constant 0 : index
    %c0_37 = arith.constant 0 : index
    %107 = vector.load %arg11[%c0_36, %c0_37] : memref<416x36xf32, #tpu.memory_space<vmem>>, vector<416x36xf32>
    %cst_38 = arith.constant dense<0.000000e+00> : vector<16x36xf32>
    %108 = tpu.matmul %106, %107, %cst_38 {dimension_numbers = #tpu.dot_dimension_numbers<[1], [0], [0], [1], [0, 0, 1, 1], [], []>} : vector<16x416xf32>, vector<416x36xf32>, vector<16x36xf32> -> vector<16x36xf32>
    %109 = vector.extract_strided_slice %108 {offsets = [0, 0], sizes = [1, 36], strides = [1, 1]} : vector<16x36xf32> to vector<1x36xf32>
    %110 = vector.extract_strided_slice %108 {offsets = [1, 0], sizes = [1, 36], strides = [1, 1]} : vector<16x36xf32> to vector<1x36xf32>
    %111 = vector.extract_strided_slice %108 {offsets = [2, 0], sizes = [1, 36], strides = [1, 1]} : vector<16x36xf32> to vector<1x36xf32>
    %112 = vector.extract_strided_slice %108 {offsets = [3, 0], sizes = [1, 36], strides = [1, 1]} : vector<16x36xf32> to vector<1x36xf32>
    %113 = vector.extract_strided_slice %108 {offsets = [4, 0], sizes = [1, 36], strides = [1, 1]} : vector<16x36xf32> to vector<1x36xf32>
    %114 = vector.extract_strided_slice %108 {offsets = [5, 0], sizes = [1, 36], strides = [1, 1]} : vector<16x36xf32> to vector<1x36xf32>
    %115 = vector.extract_strided_slice %108 {offsets = [6, 0], sizes = [1, 36], strides = [1, 1]} : vector<16x36xf32> to vector<1x36xf32>
    %116 = vector.extract_strided_slice %108 {offsets = [7, 0], sizes = [1, 36], strides = [1, 1]} : vector<16x36xf32> to vector<1x36xf32>
    %117 = vector.extract_strided_slice %108 {offsets = [8, 0], sizes = [1, 36], strides = [1, 1]} : vector<16x36xf32> to vector<1x36xf32>
    %118 = vector.extract_strided_slice %108 {offsets = [9, 0], sizes = [1, 36], strides = [1, 1]} : vector<16x36xf32> to vector<1x36xf32>
    %119 = vector.extract_strided_slice %108 {offsets = [10, 0], sizes = [1, 36], strides = [1, 1]} : vector<16x36xf32> to vector<1x36xf32>
    %120 = vector.extract_strided_slice %108 {offsets = [11, 0], sizes = [1, 36], strides = [1, 1]} : vector<16x36xf32> to vector<1x36xf32>
    %121 = vector.extract_strided_slice %108 {offsets = [12, 0], sizes = [1, 36], strides = [1, 1]} : vector<16x36xf32> to vector<1x36xf32>
    %122 = vector.extract_strided_slice %108 {offsets = [13, 0], sizes = [1, 36], strides = [1, 1]} : vector<16x36xf32> to vector<1x36xf32>
    %123 = vector.extract_strided_slice %108 {offsets = [14, 0], sizes = [1, 36], strides = [1, 1]} : vector<16x36xf32> to vector<1x36xf32>
    %124 = vector.extract_strided_slice %108 {offsets = [15, 0], sizes = [1, 36], strides = [1, 1]} : vector<16x36xf32> to vector<1x36xf32>
    %125 = tpu.concatenate %109, %110, %111, %112, %113, %114, %115, %116, %117, %118, %119, %120, %121, %122, %123, %124 in 1 : vector<1x36xf32>, vector<1x36xf32>, vector<1x36xf32>, vector<1x36xf32>, vector<1x36xf32>, vector<1x36xf32>, vector<1x36xf32>, vector<1x36xf32>, vector<1x36xf32>, vector<1x36xf32>, vector<1x36xf32>, vector<1x36xf32>, vector<1x36xf32>, vector<1x36xf32>, vector<1x36xf32>, vector<1x36xf32> -> vector<1x576xf32>
    %c0_39 = arith.constant 0 : index
    %c0_40 = arith.constant 0 : index
    %126 = vector.load %arg12[%c0_39, %c0_40] : memref<576x512xf32, #tpu.memory_space<vmem>>, vector<576x512xf32>
    %cst_41 = arith.constant dense<0.000000e+00> : vector<1x512xf32>
    %127 = tpu.matmul %125, %126, %cst_41 {dimension_numbers = #tpu.dot_dimension_numbers<[1], [0], [0], [1], [0, 0, 1, 1], [], []>} : vector<1x576xf32>, vector<576x512xf32>, vector<1x512xf32> -> vector<1x512xf32>
    %c0_42 = arith.constant 0 : index
    %c0_43 = arith.constant 0 : index
    %128 = vector.load %arg13[%c0_42, %c0_43] : memref<1x512xf32, #tpu.memory_space<vmem>>, vector<1x512xf32>
    %129 = arith.addf %127, %128 : vector<1x512xf32>
    %cst_44 = arith.constant 0.000000e+00 : f32
    %130 = vector.broadcast %cst_44 : f32 to vector<1x512xf32>
    %131 = arith.maximumf %129, %130 : vector<1x512xf32>
    %c0_45 = arith.constant 0 : index
    %c0_46 = arith.constant 0 : index
    %132 = vector.load %arg14[%c0_45, %c0_46] : memref<512x10xf32, #tpu.memory_space<vmem>>, vector<512x10xf32>
    %cst_47 = arith.constant dense<0.000000e+00> : vector<1x10xf32>
    %133 = tpu.matmul %131, %132, %cst_47 {dimension_numbers = #tpu.dot_dimension_numbers<[1], [0], [0], [1], [0, 0, 1, 1], [], []>} : vector<1x512xf32>, vector<512x10xf32>, vector<1x10xf32> -> vector<1x10xf32>
    %c0_48 = arith.constant 0 : index
    %c0_49 = arith.constant 0 : index
    %134 = vector.load %arg15[%c0_48, %c0_49] : memref<1x10xf32, #tpu.memory_space<vmem>>, vector<1x10xf32>
    %135 = arith.addf %133, %134 : vector<1x10xf32>
    %cst_50 = arith.constant dense<0xFF800000> : vector<1xf32>
    %136 = vector.multi_reduction <maximumf>, %135, %cst_50 [1] : vector<1x10xf32> to vector<1xf32>
    %137 = vector.shape_cast %136 : vector<1xf32> to vector<1x1xf32>
    %138 = vector.broadcast %137 : vector<1x1xf32> to vector<1x10xf32>
    %139 = arith.subf %135, %138 : vector<1x10xf32>
    %140 = math.exp %139 : vector<1x10xf32>
    %cst_51 = arith.constant dense<0.000000e+00> : vector<1xf32>
    %141 = vector.multi_reduction <add>, %140, %cst_51 [1] : vector<1x10xf32> to vector<1xf32>
    %142 = vector.shape_cast %141 : vector<1xf32> to vector<1x1xf32>
    %143 = vector.broadcast %142 : vector<1x1xf32> to vector<1x10xf32>
    %144 = arith.divf %140, %143 : vector<1x10xf32>
    %c0_52 = arith.constant 0 : index
    %c0_53 = arith.constant 0 : index
    %c0_54 = arith.constant 0 : index
    %145 = vector.load %arg16[%c0_52, %c0_53, %c0_54] : memref<1x1x10xf32, #tpu.memory_space<vmem>>, vector<1x1x10xf32>
    %146 = vector.shape_cast %145 : vector<1x1x10xf32> to vector<1x10xf32>
    %147 = vector.shape_cast %144 : vector<1x10xf32> to vector<1x1x10xf32>
    tpu.vector_store %arg16[%c0_52, %c0_53, %c0_54], %147 {strides = array<i32>} : memref<1x1x10xf32, #tpu.memory_space<vmem>>, vector<1x1x10xf32>,
    return
  }
  func.func @transform_0(%arg0: i32) -> (i32, i32, i32) {
    %c0_i32 = arith.constant 0 : i32
    %c0_i32_0 = arith.constant 0 : i32
    %c0_i32_1 = arith.constant 0 : i32
    return %arg0, %c0_i32, %c0_i32_0 : i32, i32, i32
  }
  func.func @transform_1(%arg0: i32) -> (i32, i32) {
    %c0_i32 = arith.constant 0 : i32
    %c0_i32_0 = arith.constant 0 : i32
    %c0_i32_1 = arith.constant 0 : i32
    return %c0_i32, %c0_i32_0 : i32, i32
  }
  func.func @transform_2(%arg0: i32) -> (i32, i32) {
    %c0_i32 = arith.constant 0 : i32
    %c0_i32_0 = arith.constant 0 : i32
    %c0_i32_1 = arith.constant 0 : i32
    return %c0_i32, %c0_i32_0 : i32, i32
  }
  func.func @transform_3(%arg0: i32) -> (i32, i32) {
    %c0_i32 = arith.constant 0 : i32
    %c0_i32_0 = arith.constant 0 : i32
    %c0_i32_1 = arith.constant 0 : i32
    return %c0_i32, %c0_i32_0 : i32, i32
  }
  func.func @transform_4(%arg0: i32) -> (i32, i32) {
    %c0_i32 = arith.constant 0 : i32
    %c0_i32_0 = arith.constant 0 : i32
    %c0_i32_1 = arith.constant 0 : i32
    return %c0_i32, %c0_i32_0 : i32, i32
  }
  func.func @transform_5(%arg0: i32) -> (i32, i32) {
    %c0_i32 = arith.constant 0 : i32
    %c0_i32_0 = arith.constant 0 : i32
    %c0_i32_1 = arith.constant 0 : i32
    return %c0_i32, %c0_i32_0 : i32, i32
  }
  func.func @transform_6(%arg0: i32) -> (i32, i32) {
    %c0_i32 = arith.constant 0 : i32
    %c0_i32_0 = arith.constant 0 : i32
    %c0_i32_1 = arith.constant 0 : i32
    return %c0_i32, %c0_i32_0 : i32, i32
  }
  func.func @transform_7(%arg0: i32) -> (i32, i32) {
    %c0_i32 = arith.constant 0 : i32
    %c0_i32_0 = arith.constant 0 : i32
    %c0_i32_1 = arith.constant 0 : i32
    return %c0_i32, %c0_i32_0 : i32, i32
  }
  func.func @transform_8(%arg0: i32) -> (i32, i32) {
    %c0_i32 = arith.constant 0 : i32
    %c0_i32_0 = arith.constant 0 : i32
    %c0_i32_1 = arith.constant 0 : i32
    return %c0_i32, %c0_i32_0 : i32, i32
  }
  func.func @transform_9(%arg0: i32) -> (i32, i32) {
    %c0_i32 = arith.constant 0 : i32
    %c0_i32_0 = arith.constant 0 : i32
    %c0_i32_1 = arith.constant 0 : i32
    return %c0_i32, %c0_i32_0 : i32, i32
  }
  func.func @transform_10(%arg0: i32) -> (i32, i32) {
    %c0_i32 = arith.constant 0 : i32
    %c0_i32_0 = arith.constant 0 : i32
    %c0_i32_1 = arith.constant 0 : i32
    return %c0_i32, %c0_i32_0 : i32, i32
  }
  func.func @transform_11(%arg0: i32) -> (i32, i32) {
    %c0_i32 = arith.constant 0 : i32
    %c0_i32_0 = arith.constant 0 : i32
    %c0_i32_1 = arith.constant 0 : i32
    return %c0_i32, %c0_i32_0 : i32, i32
  }
  func.func @transform_12(%arg0: i32) -> (i32, i32) {
    %c0_i32 = arith.constant 0 : i32
    %c0_i32_0 = arith.constant 0 : i32
    %c0_i32_1 = arith.constant 0 : i32
    return %c0_i32, %c0_i32_0 : i32, i32
  }
  func.func @transform_13(%arg0: i32) -> (i32, i32) {
    %c0_i32 = arith.constant 0 : i32
    %c0_i32_0 = arith.constant 0 : i32
    %c0_i32_1 = arith.constant 0 : i32
    return %c0_i32, %c0_i32_0 : i32, i32
  }
  func.func @transform_14(%arg0: i32) -> (i32, i32) {
    %c0_i32 = arith.constant 0 : i32
    %c0_i32_0 = arith.constant 0 : i32
    %c0_i32_1 = arith.constant 0 : i32
    return %c0_i32, %c0_i32_0 : i32, i32
  }
  func.func @transform_15(%arg0: i32) -> (i32, i32, i32) {
    %c0_i32 = arith.constant 0 : i32
    %c0_i32_0 = arith.constant 0 : i32
    %c0_i32_1 = arith.constant 0 : i32
    return %arg0, %c0_i32, %c0_i32_0 : i32, i32, i32
  }
}

</mosaic_0001>

<bundles_post_ra>
// kernel: cnn_forward.1
= control target key start
LH: loop header
LB: loop body
LE: loop exit
PB: predicated region body
PF: predicated region fallthrough
CT: control target
= control target key end

     0   :  { %s7910_s0 = inlined_call_operand.vmem [shape: f32[2,1,960], index: 0, kind: input, shape index: {}]   ;;  %s7911_s1 = inlined_call_operand.vmem [shape: f32[3,9], index: 1, kind: input, shape index: {}]   ;;  %s7912_s2 = inlined_call_operand.vmem [shape: f32[3,1], index: 2, kind: input, shape index: {}]   ;;  %s7913_s3 = inlined_call_operand.vmem [shape: f32[6,27], index: 3, kind: input, shape index: {}]   ;;  %s7914_s4 = inlined_call_operand.vmem [shape: f32[6,1], index: 4, kind: input, shape index: {}]   ;;  %s7915_s5 = inlined_call_operand.hbm [shape: f32[832,480], index: 5, kind: input, shape index: {}]   ;;  %s7916_s6 = inlined_call_operand.vmem [shape: f32[16,54], index: 6, kind: input, shape index: {}]   ;;  %s7917_s7 = inlined_call_operand.vmem [shape: f32[16,1], index: 7, kind: input, shape index: {}]   ;;  %s7918_s8 = inlined_call_operand.vmem [shape: f32[16,144], index: 8, kind: input, shape index: {}]   ;;  %s7919_s9 = inlined_call_operand.vmem [shape: f32[16,1], index: 9, kind: input, shape index: {}]   ;;  %s7920_s10 = inlined_call_operand.hbm [shape: f32[416,36], index: 10, kind: input, shape index: {}]   ;;  %s7921_s11 = inlined_call_operand.hbm [shape: f32[576,512], index: 11, kind: input, shape index: {}]   ;;  %s7922_s12 = inlined_call_operand.hbm [shape: f32[1,512], index: 12, kind: input, shape index: {}]   ;;  %s7923_s13 = inlined_call_operand.vmem [shape: f32[512,10], index: 13, kind: input, shape index: {}]   ;;  %s7924_s14 = inlined_call_operand.hbm [shape: f32[1,10], index: 14, kind: input, shape index: {}]   ;;  %s7925_s15 = inlined_call_operand.hbm [shape: f32[2,1,10], index: 15, kind: output, shape index: {}]  }
   0x1   :  { %7941 = sst [smem:[#allocation22_spill]] %s7920_s10 }
   0x2   :  { %7942 = sst [smem:[#allocation23_spill]] %s7925_s15 }
   0x3   :  { %20 = vsyncpa [#allocation3], 0 }
   0x4   :  { %21 = vsyncpa [#allocation6], 0 }
   0x5   :  { %22 = vsyncpa [#allocation9], 0 }
   0x6   :  { %23 = vsyncpa [#allocation4], 0 }
   0x7   :  { %25 = vsyncpa [#allocation4 + $0x1], 0  ;;  %s5991_s18 = smov 0   ;;  %s5993_s19 = smov 0  }
   0x8   :  { %s5995_s20 = smov 0   ;;  %s5997_s21 = smov 0  }
   0x9 LB: > { %7943 = sst [smem:[#allocation16_spill]] %s5860_s18  ;;  %s6012_s22 = sadd.s32 4294967295, %s5872_s21   ;;  %s5872_s21 = sphi %s5997_s21, %s7988_s21   ;;  %s5868_s20 = sphi %s5995_s20, %s7990_s20   ;;  %s5864_s19 = sphi %s5993_s19, %s7992_s19   ;;  %s5860_s18 = sphi %s5991_s18, %s7991_s18  }
   0xa   : > { %7944 = sst [smem:[#allocation17_spill]] %s5868_s20  ;;  %s5290_s23 = sadd.s32 4294967294, %s5872_s21  }
   0xb   : > { %7945 = sst [smem:[#allocation18_spill]] %s5872_s21  ;;  %s6016_s24 = sadd.s32 1, %s5872_s21  }
   0xc   : > { %7946 = sst [smem:[#allocation19_spill]] %s6016_s24  ;;  %s358_s25 = sadd.s32 1, %s5868_s20 }
   0xd   : > { %s355_s26 = ssub.s32 %s5872_s21, %s6016_s24  ;;  %p368_p0 = scmp.ne.s32.totalorder %s5868_s20, %s5864_s19 }
   0xe   : > { %p356_p1 = scmp.eq.s32.totalorder %s355_s26, 0  ;;  %p369_p2 = scmp.eq.s32.totalorder %s6012_s22, 1 }
   0xf   : > { %p374_p3 = scmp.ne.s32.totalorder %s5864_s19, %s5860_s18  ;;  %p375_p4 = scmp.eq.s32.totalorder %s5290_s23, 1 }
  0x10   : > { %s6027_s27 = scalar_select %p356_p1, %s5868_s20, %s358_s25  }
  0x11   : > { %p6029_p5 = por %p369_p2, %p368_p0  ;;  %p6033_p6 = por %p375_p4, %p374_p3 }
  0x12   : > { %7947 = sst [smem:[#allocation20_spill]] %s6027_s27  ;;  %p5291_p7 = scmp.ge.s32.totalorder %s5872_s21, 1 }
  0x13   : > { %s7948_s28 = scalar_select %p6029_p5, 1, 0 }
  0x14   : > { %s7949_s29 = scalar_select %p6033_p6, 1, 0 }
  0x15   : > { %p382_p8 = scmp.lt.s32.totalorder %s5872_s21, 3  ;;  %p7932_p9 = scmp.eq.s32.totalorder %s6012_s22, 0 }
  0x16   : > { %7950 = sst [smem:[#allocation21_spill]] %s7949_s29  ;;  %s5874_s16 = smov [#allocation5]  }
  0x17   : > { %p6040_p10 = pnand %p5291_p7, %p382_p8  ;;  %s431_s17 = sshll.u32 %s5874_s16, 4  ;;  %s432_s17 = int_to_ptr.vmem [resolvable:$true] %s431_s17 }
  0x18   : > { %s5875_s25 = smov [#allocation8]   ;;  %s5876_s27 = smov [#allocation2]  }
  0x19   : > { %s7951_s30 = scalar_select %p6040_p10, 1, 0 }
  0x1a   : > { %p5510_p11 = pneg %p6040_p10  ;;  %s458_s26 = sshll.u32 %s5875_s25, 4  ;;  %s459_s26 = int_to_ptr.vmem [resolvable:$true] %s458_s26 }
  0x1b   : > { %s406_s20 = sshll.u32 %s5876_s27, 4  ;;  %s5681_s16 = scalar_lea.vmem %s432_s17, 6656  ;;  %s407_s20 = int_to_ptr.vmem [resolvable:$true] %s406_s20 }
  0x1c   : > { %p6048_p12 = pnand %p7932_p9, %p5510_p11  ;;  %p5682_p0 = scmp.ne.s32.totalorder %s432_s17, %s5681_s16 }
  0x1d   : > { %p5689_p3 = scmp.lt.s32.totalorder %s432_s17, %s432_s17  ;;  %p5690_p4 = scmp.lt.s32.totalorder %s5681_s16, %s5681_s16 }
  0x1e   : > { %p6054_p13 = pneg %p6048_p12 }
  0x1f   : > { %p5691_p7 = por %p5690_p4, %p5689_p3 }
  0x20   : > { %p5684_p1 = pnand %p5682_p0, %p6054_p13 }
  0x22   : > { %p5685_p2 = pneg %p5684_p1 }
  0x24   : > { %p5692_p8 = pnand %p5691_p7, %p5685_p2 }
  0x26   : > { %5695 = shalt.err (!%p5692_p8)
}
  0x27   : > { %s5877_s25 = smov 128   ;;  %s5878_s27 = smov 8  }
  0x28   : > { %s7954_s10 = sld [smem:[#allocation22_spill]]  ;;  %s5707_s21 = scalar_lea.vmem %s459_s26, 64 }
  0x29   : > { %p5708_p11 = scmp.ne.s32.totalorder %s459_s26, %s5707_s21  ;;  %p5715_p1 = scmp.lt.s32.totalorder %s459_s26, %s459_s26 }
  0x2a   : > { %p5716_p6 = scmp.lt.s32.totalorder %s5707_s21, %s5707_s21 }
  0x2b   : > { %p5710_p9 = pnand %p5708_p11, %p6054_p13 }
  0x2c   : > { %p5717_p5 = por %p5716_p6, %p5715_p1 }
  0x2d   : > { %p5711_p0 = pneg %p5710_p9 }
  0x2e   : > { %5516 = dma.hbm_to_vmem [thread:$0]  (!%p6048_p12), %s7954_s10, 6656, %s432_s17, [#allocation6], %s5877_s25, %s5877_s25, %s5878_s27  }
  0x2f   : > { %p5718_p3 = pnand %p5717_p5, %p5711_p0 }
  0x31   : > { %5721 = shalt.err (!%p5718_p3)
}
  0x32   : > { %5522 = dma.hbm_to_vmem [thread:$0]  (!%p6048_p12), %s7922_s12, 64, %s459_s26, [#allocation9]  }
  0x33   : > { %s5733_s18 = scalar_lea.vmem %s407_s20, 53248  ;;  %p5741_p8 = scmp.lt.s32.totalorder %s407_s20, %s407_s20 }
  0x34   : > { %p5734_p2 = scmp.ne.s32.totalorder %s407_s20, %s5733_s18  ;;  %p5742_p9 = scmp.lt.s32.totalorder %s5733_s18, %s5733_s18 }
  0x36   : > { %p5736_p4 = pnand %p5734_p2, %p6054_p13  ;;  %p5743_p11 = por %p5742_p9, %p5741_p8 }
  0x38   : > { %p5737_p7 = pneg %p5736_p4 }
  0x3a   : > { %p5744_p10 = pnand %p5743_p11, %p5737_p7 }
  0x3c   : > { %5747 = shalt.err (!%p5744_p10)
}
  0x3d   : > { %s5879_s21 = smov 512   ;;  %s5880_s29 = smov 32  }
  0x3e   : > { %5513 = dma.hbm_to_vmem [thread:$0]  (!%p6048_p12), %s7915_s5, 53248, %s407_s20, [#allocation3], %s5879_s21, %s5879_s21, %s5880_s29  }
  0x3f   : > { %s5881_s26 = smov [#allocation7]   ;;  %s5882_s27 = smov [#allocation10]  }
  0x40   : > { %s444_s25 = sshll.u32 %s5881_s26, 4  ;;  %s472_s16 = sshll.u32 %s5882_s27, 4  ;;  %s445_s25 = int_to_ptr.vmem [resolvable:$true] %s444_s25  ;;  %s473_s16 = int_to_ptr.vmem [resolvable:$true] %s472_s16 }
  0x41   : > { %s5759_s10 = scalar_lea.vmem %s445_s25, 36864  ;;  %p5767_p10 = scmp.lt.s32.totalorder %s445_s25, %s445_s25 }
  0x42   : > { %p5760_p5 = scmp.ne.s32.totalorder %s445_s25, %s5759_s10  ;;  %p5768_p1 = scmp.lt.s32.totalorder %s5759_s10, %s5759_s10 }
  0x44   : > { %p5762_p6 = pnand %p5760_p5, %p6054_p13  ;;  %p5769_p3 = por %p5768_p1, %p5767_p10 }
  0x46   : > { %p5763_p0 = pneg %p5762_p6 }
  0x48   : > { %p5770_p2 = pnand %p5769_p3, %p5763_p0 }
  0x4a   : > { %5773 = shalt.err (!%p5770_p2)
}
  0x4b   : > { %5519 = dma.hbm_to_vmem [thread:$0]  (!%p6048_p12), %s7921_s11, 36864, %s445_s25, [#allocation6], %s5879_s21, %s5879_s21, %s5880_s29  }
  0x4c   : > { %s5785_s20 = scalar_lea.vmem %s473_s16, 16  ;;  %s5792_s15 = scalar_lea.vmem %s473_s16, 32 }
  0x4d   : > { %p5786_p4 = scmp.ne.s32.totalorder %s473_s16, %s5785_s20  ;;  %p5793_p9 = scmp.lt.s32.totalorder %s473_s16, %s473_s16 }
  0x4e   : > { %p5794_p11 = scmp.lt.s32.totalorder %s5792_s15, %s5785_s20 }
  0x4f   : > { %p5788_p7 = pnand %p5786_p4, %p6054_p13 }
  0x50   : > { %p5795_p5 = por %p5794_p11, %p5793_p9 }
  0x51   : > { %p5789_p8 = pneg %p5788_p7 }
  0x53   : > { %p5796_p6 = pnand %p5795_p5, %p5789_p8 }
  0x55   : > { %5799 = shalt.err (!%p5796_p6)
}
  0x56   : > { %5525 = dma.hbm_to_vmem [thread:$0]  (!%p6048_p12), %s7924_s14, 16, %s473_s16, [#allocation9]  }
  0x57   : > { %p7955_p0 = scmp.ne.s32.totalorder %s7951_s30, 0 }
  0x58   : > { %p7956_p10 = scmp.eq.s32.totalorder (!%p7955_p0), %s6012_s22, 0 }
  0x59   : > { %492 = sbr.rel (%p7955_p0) target bundleno = 3877 (0xf25), region = 80 }
  0x5e   : > { %5843 = dma.done.wait (%p7956_p10), [#allocation3], 53248   ;;  %p7957_p13 = pmov %p7956_p10 }
  0x5f   : > { %p7958_p1 = pmov %p7956_p10 }
  0x60   : > { %5845 = vsyncadd (%p7957_p13), [#allocation3], 4294914048 }
  0x61   : > { %5847 = dma.done.wait (%p7958_p1), [#allocation6], 43520   ;;  %p7959_p3 = pmov %p7958_p1 }
  0x62   : > { %p7960_p2 = pmov %p7958_p1 }
  0x63   : > { %5849 = vsyncadd (%p7959_p3), [#allocation6], 4294923776 }
  0x64   : > { %5851 = dma.done.wait (%p7960_p2), [#allocation9], 80   ;;  %p7961_p12 = pmov %p7958_p1 }
  0x65   : > { %p554_p4 = scmp.lt.s32.totalorder %s6012_s22, 1  ;;  %v562_v0 = vlaneseq  ;;  %s5883_s25 = smov 127   ;;  %v5890_v45 = vmov 0.0   ;;  %vm602_vm0 = vcmask 523264   ;;  %vm7936_vm1 = vmmov 0  }
  0x66   : > { %5853 = vsyncadd (%p7961_p12), [#allocation9], 4294967216  ;;  %s5884_s27 = smov 126   ;;  %s5885_s16 = smov 96   ;;  %1044 = vmatprep.mubr.f32.mxu0 %v5890_v45  ;;  %5470 = vmatprep.subr.mxu1 %v5890_v45  ;;  %vm893_vm2 = vcmask 506880   ;;  %vm901_vm3 = vcmask 1040384  }
  0x67   : > { %s555_s24 = scalar_select %p554_p4, %s6012_s22, 1  ;;  %v6110_v1 = vshrl.u32 %v562_v0, 7  ;;  %5474 = vmatprep.mubr.msk.f32.mxu1 %vm7936_vm1, %v5890_v45  ;;  %vm7939_vm4 = vcmask 1031168   ;;  %vm629_vm5 = vcmask 1039360   ;;  %vm707_vm6 = vcmask 785408  }
  0x68   : > { %s5886_s18 = smov 95   ;;  %s5887_s17 = smov 94   ;;  %vm746_vm7 = vcmask 777216   ;;  %vm909_vm8 = vcmask 1041408   ;;  %vm785_vm9 = vcmask 769024   ;;  %vm917_vm10 = vcmask 1042432  }
  0x69   : > { %s5304_s30 = sshll.u32 %s555_s24, 3  ;;  %v7940_v2 = vsub.s32 1, %v6110_v1  ;;  %v564_v3 = vsub.s32 0, %v6110_v1  ;;  %v7938_v4 = vsub.s32 2, %v6110_v1  ;;  %v584_v5 = vsub.s32 5, %v6110_v1  ;;  %s5888_s20 = smov 64  }
  0x6a   : > { %s557_s29 = scalar_lea.vmem %s7910_s0, %s5304_s30  ;;  %v588_v6 = vsub.s32 6, %v6110_v1  ;;  %v592_v7 = vsub.s32 7, %v6110_v1  ;;  %v7937_v23 = vsub.s32 3, %v6110_v1  ;;  %v580_v27 = vsub.s32 4, %v6110_v1  ;;  %s5889_s15 = smov 62  }
  0x6b   : > { %v558_v8 = vld [vmem:[%s557_s29] sm:$0xff]  ;;  %s5891_s10 = smov 63   ;;  %vm925_vm11 = vcmask 1043456   ;;  %vm862_vm12 = vcmask 515072   ;;  %vm933_vm13 = vcmask 1044480   ;;  %vm941_vm14 = vcmask 1045504  }
  0x6c   : > { %v6123_v9 = vrot.slane %v558_v8, %v7940_v2  ;;  %v6127_v10 = vrot.slane %v558_v8, %v564_v3  ;;  %v6131_v11 = vrot.slane %v558_v8, %v7938_v4  ;;  %v6133_v12 = vrot.slane %v558_v8, %v584_v5  ;;  %s5894_s21 = smov 33   ;;  %s5902_s29 = smov 104  }
  0x6d   : > { %v6135_v13 = vrot.slane %v558_v8, %v588_v6  ;;  %v6137_v14 = vrot.slane %v558_v8, %v592_v7  ;;  %v6160_v26 = vrot.slane %v558_v8, %v7937_v23  ;;  %v6167_v30 = vrot.slane %v558_v8, %v580_v27  ;;  %s5904_s26 = smov 48   ;;  %s5905_s24 = smov 12  }
  0x6e   : > { %v606_v15 = vrot.slane %v6123_v9, 7  ;;  %v605_v16 = vrot.slane %v6127_v10, 7  ;;  %v607_v17 = vrot.slane %v6131_v11, 7  ;;  %v645_v18 = vrot.slane %v6123_v9, 6  ;;  %s5906_s30 = smov 84   ;;  %s5907_s23 = smov 68  }
  0x6f   : > { %v646_v19 = vrot.slane %v6131_v11, 6  ;;  %v644_v20 = vrot.slane %v6127_v10, 6  ;;  %v684_v21 = vrot.slane %v6123_v9, 5  ;;  %v685_v22 = vrot.slane %v6131_v11, 5  ;;  %p7983_p8 = scmp.ne.s32.totalorder %s7948_s28, 0 }
  0x70   : > { %615 = vrot.lane.b32.xlu0 %v606_v15, %s5883_s25  ;;  %613 = vrot.lane.b32.xlu1 %v605_v16, %s5883_s25  ;;  %v683_v24 = vrot.slane %v6127_v10, 5  ;;  %v723_v25 = vrot.slane %v6123_v9, 4  ;;  %v724_v28 = vrot.slane %v6131_v11, 4  ;;  %v608_v29 = vrot.slane %v6160_v26, 7 }
  0x71   : > { %v609_v31 = vrot.slane %v6167_v30, 7  ;;  %v722_v32 = vrot.slane %v6127_v10, 4  ;;  %v762_v33 = vrot.slane %v6123_v9, 3  ;;  %v763_v34 = vrot.slane %v6131_v11, 3 }
  0x72   : > { %v647_v35 = vrot.slane %v6160_v26, 6  ;;  %v648_v36 = vrot.slane %v6167_v30, 6  ;;  %v761_v37 = vrot.slane %v6127_v10, 3  ;;  %v801_v38 = vrot.slane %v6123_v9, 2 }
  0x73   : > { %v802_v39 = vrot.slane %v6131_v11, 2  ;;  %v686_v40 = vrot.slane %v6160_v26, 5  ;;  %v687_v41 = vrot.slane %v6167_v30, 5  ;;  %v800_v42 = vrot.slane %v6127_v10, 2 }
  0x74   : > { %617 = vrot.lane.b32.xlu0 %v607_v17, %s5883_s25  ;;  %654 = vrot.lane.b32.xlu1 %v645_v18, %s5884_s27  ;;  %v839_v43 = vrot.slane %v6123_v9, 1  ;;  %v840_v44 = vrot.slane %v6131_v11, 1  ;;  %v725_v46 = vrot.slane %v6160_v26, 4  ;;  %v726_v47 = vrot.slane %v6167_v30, 4 }
  0x75   : > { %v838_v48 = vrot.slane %v6127_v10, 1  ;;  %v764_v49 = vrot.slane %v6160_v26, 3  ;;  %v765_v50 = vrot.slane %v6167_v30, 3  ;;  %v803_v51 = vrot.slane %v6160_v26, 2 }
  0x76   : > { %v804_v52 = vrot.slane %v6167_v30, 2  ;;  %v610_v53 = vrot.slane %v6133_v12, 7  ;;  %v611_v54 = vrot.slane %v6135_v13, 7  ;;  %v841_v55 = vrot.slane %v6160_v26, 1 }
  0x77   : > { %v842_v56 = vrot.slane %v6167_v30, 1  ;;  %v649_v57 = vrot.slane %v6133_v12, 6  ;;  %v650_v58 = vrot.slane %v6135_v13, 6  ;;  %v688_v59 = vrot.slane %v6133_v12, 5 }
  0x78   : > { %656 = vrot.lane.b32.xlu0 %v646_v19, %s5884_s27  ;;  %652 = vrot.lane.b32.xlu1 %v644_v20, %s5884_s27  ;;  %v689_v60 = vrot.slane %v6135_v13, 5  ;;  %v603_v61 = vsel %vm602_vm0, %v6137_v14, 0.0  ;;  %v727_v63 = vrot.slane %v6133_v12, 4  ;;  %v728_v5 = vrot.slane %v6135_v13, 4 }
  0x79   : > { %v612_v62 = vrot.slane %v603_v61, 7  ;;  %v651_v6 = vrot.slane %v603_v61, 6  ;;  %v766_v7 = vrot.slane %v6133_v12, 3  ;;  %v767_v8 = vrot.slane %v6135_v13, 3 }
  0x7a   : > { %v690_v14 = vrot.slane %v603_v61, 5  ;;  %v805_v15 = vrot.slane %v6133_v12, 2  ;;  %v806_v16 = vrot.slane %v6135_v13, 2  ;;  %v729_v17 = vrot.slane %v603_v61, 4 }
  0x7b   : > { %v843_v18 = vrot.slane %v6133_v12, 1  ;;  %v844_v19 = vrot.slane %v6135_v13, 1  ;;  %vm949_vm15 = vcmask 1046528   ;;  %vm962_vm1 = vcmask 72704  }
  0x7c   : > { %693 = vrot.lane.b32.xlu0 %v684_v21, %s5885_s16  ;;  %695 = vrot.lane.b32.xlu1 %v685_v22, %s5885_s16  ;;  %v768_v22 = vrot.slane %v603_v61, 3 }
  0x80   : > { %691 = vrot.lane.b32.xlu0 %v683_v24, %s5885_s16  ;;  %732 = vrot.lane.b32.xlu1 %v723_v25, %s5886_s18  ;;  %v807_v24 = vrot.slane %v603_v61, 2  ;;  %v5893_v25 = vmov 0  }
  0x81   : > { %5609 = vset.pattern.permute.xlu0 %v5893_v25  ;;  %5635 = vset.pattern.permute.xlu1 %v5893_v25 }
  0x84   : > { %734 = vrot.lane.b32.xlu0 %v724_v28, %s5886_s18  ;;  %619 = vrot.lane.b32.xlu1 %v608_v29, %s5883_s25  ;;  %v845_v29 = vrot.slane %v603_v61, 1 }
  0x88   : > { %621 = vrot.lane.b32.xlu0 %v609_v31, %s5883_s25  ;;  %730 = vrot.lane.b32.xlu1 %v722_v32, %s5886_s18 }
  0x8c   : > { %771 = vrot.lane.b32.xlu0 %v762_v33, %s5887_s17  ;;  %773 = vrot.lane.b32.xlu1 %v763_v34, %s5887_s17  ;;  %v560_v33 = vld [vmem:[%s7912_s2] sm:$0x7] }
  0x90   : > { %658 = vrot.lane.b32.xlu0 %v647_v35, %s5884_s27  ;;  %660 = vrot.lane.b32.xlu1 %v648_v36, %s5884_s27 }
  0x94   : > { %769 = vrot.lane.b32.xlu0 %v761_v37, %s5887_s17  ;;  %810 = vrot.lane.b32.xlu1 %v801_v38, %s5888_s20 }
  0x98   : > { %812 = vrot.lane.b32.xlu0 %v802_v39, %s5888_s20  ;;  %879 = vrot.lane.b32.xlu1 %v6123_v9, %s5889_s15 }
  0x9c   : > { %881 = vrot.lane.b32.xlu0 %v6131_v11, %s5889_s15  ;;  %697 = vrot.lane.b32.xlu1 %v686_v40, %s5885_s16 }
  0xa0   : > { %699 = vrot.lane.b32.xlu0 %v687_v41, %s5885_s16  ;;  %808 = vrot.lane.b32.xlu1 %v800_v42, %s5888_s20 }
  0xa4   : > { %848 = vrot.lane.b32.xlu0 %v839_v43, %s5891_s10  ;;  %850 = vrot.lane.b32.xlu1 %v840_v44, %s5891_s10 }
  0xa8   : > { %877 = vrot.lane.b32.xlu0 %v6127_v10, %s5889_s15  ;;  %736 = vrot.lane.b32.xlu1 %v725_v46, %s5886_s18 }
  0xac   : > { %738 = vrot.lane.b32.xlu0 %v726_v47, %s5886_s18  ;;  %846 = vrot.lane.b32.xlu1 %v838_v48, %s5891_s10 }
  0xb0   : > { %775 = vrot.lane.b32.xlu0 %v764_v49, %s5887_s17  ;;  %777 = vrot.lane.b32.xlu1 %v765_v50, %s5887_s17 }
  0xb4   : > { %814 = vrot.lane.b32.xlu0 %v803_v51, %s5888_s20  ;;  %816 = vrot.lane.b32.xlu1 %v804_v52, %s5888_s20 }
  0xb8   : > { %883 = vrot.lane.b32.xlu0 %v6160_v26, %s5889_s15  ;;  %885 = vrot.lane.b32.xlu1 %v6167_v30, %s5889_s15 }
  0xbc   : > { %623 = vrot.lane.b32.xlu0 %v610_v53, %s5883_s25  ;;  %625 = vrot.lane.b32.xlu1 %v611_v54, %s5883_s25 }
  0xc0   : > { %852 = vrot.lane.b32.xlu0 %v841_v55, %s5891_s10  ;;  %854 = vrot.lane.b32.xlu1 %v842_v56, %s5891_s10 }
  0xc4   : > { %662 = vrot.lane.b32.xlu0 %v649_v57, %s5884_s27  ;;  %664 = vrot.lane.b32.xlu1 %v650_v58, %s5884_s27 }
  0xc8   : > { %701 = vrot.lane.b32.xlu0 %v688_v59, %s5885_s16  ;;  %703 = vrot.lane.b32.xlu1 %v689_v60, %s5885_s16 }
  0xcc   : > { %627 = vrot.lane.b32.xlu0 %v612_v62, %s5883_s25  ;;  %740 = vrot.lane.b32.xlu1 %v727_v63, %s5886_s18 }
  0xd0   : > { %742 = vrot.lane.b32.xlu0 %v728_v5, %s5886_s18  ;;  %666 = vrot.lane.b32.xlu1 %v651_v6, %s5884_s27 }
  0xd4   : > { %779 = vrot.lane.b32.xlu0 %v766_v7, %s5887_s17  ;;  %781 = vrot.lane.b32.xlu1 %v767_v8, %s5887_s17 }
  0xd8   : > { %705 = vrot.lane.b32.xlu0 %v690_v14, %s5885_s16  ;;  %818 = vrot.lane.b32.xlu1 %v805_v15, %s5888_s20 }
  0xdc   : > { %820 = vrot.lane.b32.xlu0 %v806_v16, %s5888_s20  ;;  %887 = vrot.lane.b32.xlu1 %v6133_v12, %s5889_s15 }
  0xe0   : > { %889 = vrot.lane.b32.xlu0 %v6135_v13, %s5889_s15  ;;  %744 = vrot.lane.b32.xlu1 %v729_v17, %s5886_s18 }
  0xe2   : > { %v6265_v20 = vpop.permute.xlu0 %615  ;;  %v614_v21 = vpop.permute.xlu1 %613 }
  0xe3   : > { %v630_v63 = vsel %vm629_vm5, %v614_v21, %v6265_v20 }
  0xe4   : > { %856 = vrot.lane.b32.xlu0 %v843_v18, %s5891_s10  ;;  %858 = vrot.lane.b32.xlu1 %v844_v19, %s5891_s10  ;;  %v902_v17 = vsel %vm901_vm3, %v6127_v10, %v630_v63 }
  0xe6   : > { %v6271_v27 = vpop.permute.xlu0 %617  ;;  %v655_v28 = vpop.permute.xlu1 %654 }
  0xe7   : > { %v631_v56 = vsel %vm629_vm5, %v6265_v20, %v6271_v27 }
  0xe8   : > { %783 = vrot.lane.b32.xlu0 %v768_v22, %s5887_s17  ;;  %822 = vrot.lane.b32.xlu1 %v807_v24, %s5888_s20  ;;  %v903_v59 = vsel %vm901_vm3, %v6123_v9, %v631_v56 }
  0xea   : > { %v6275_v31 = vpop.permute.xlu0 %656  ;;  %v653_v32 = vpop.permute.xlu1 %652 }
  0xeb   : > { %v670_v57 = vsel %vm7939_vm4, %v655_v28, %v6275_v31  ;;  %v669_v7 = vsel %vm7939_vm4, %v653_v32, %v655_v28 }
  0xec   : > { %891 = vrot.lane.b32.xlu0 %v603_v61, %s5889_s15  ;;  %860 = vrot.lane.b32.xlu1 %v845_v29, %s5891_s10  ;;  %v911_v5 = vsel %vm909_vm8, %v903_v59, %v670_v57  ;;  %v910_v22 = vsel %vm909_vm8, %v902_v17, %v669_v7 }
  0xee   : > { %v694_v34 = vpop.permute.xlu0 %693  ;;  %v6282_v35 = vpop.permute.xlu1 %695 }
  0xef   : > { %v709_v58 = vsel %vm707_vm6, %v694_v34, %v6282_v35 }
  0xf0   : > { %959 = vperm.xlu0 %5609, %v560_v33   ;;  %v919_v9 = vsel %vm917_vm10, %v911_v5, %v709_v58 }
  0xf2   : > { %v692_v36 = vpop.permute.xlu0 %691  ;;  %v733_v37 = vpop.permute.xlu1 %732 }
  0xf3   : > { %v708_v14 = vsel %vm707_vm6, %v692_v36, %v694_v34 }
  0xf4   : > { %v918_v29 = vsel %vm917_vm10, %v910_v22, %v708_v14 }
  0xf6   : > { %v6284_v38 = vpop.permute.xlu0 %734  ;;  %v6286_v39 = vpop.permute.xlu1 %619 }
  0xf7   : > { %v748_v60 = vsel %vm746_vm7, %v733_v37, %v6284_v38  ;;  %v632_v59 = vsel %vm629_vm5, %v6271_v27, %v6286_v39 }
  0xf8   : > { %v927_v15 = vsel %vm925_vm11, %v919_v9, %v748_v60 }
  0xfa   : > { %v6288_v40 = vpop.permute.xlu0 %621  ;;  %v731_v41 = vpop.permute.xlu1 %730 }
  0xfb   : > { %v747_v18 = vsel %vm746_vm7, %v731_v41, %v733_v37  ;;  %v633_v60 = vsel %vm629_vm5, %v6286_v39, %v6288_v40 }
  0xfc   : > { %v926_v33 = vsel %vm925_vm11, %v918_v29, %v747_v18 }
  0xfe   : > { %v772_v42 = vpop.permute.xlu0 %771  ;;  %v6290_v43 = vpop.permute.xlu1 %773 }
  0xff   : > { %v787_v6 = vsel %vm785_vm9, %v772_v42, %v6290_v43 }
 0x100   : > { %v935_v19 = vsel %vm933_vm13, %v927_v15, %v787_v6 }
 0x102   : > { %v6292_v44 = vpop.permute.xlu0 %658  ;;  %v6294_v46 = vpop.permute.xlu1 %660 }
 0x103   : > { %v671_v5 = vsel %vm7939_vm4, %v6275_v31, %v6292_v44  ;;  %v672_v6 = vsel %vm7939_vm4, %v6292_v44, %v6294_v46  ;;  %v905_v31 = vsel %vm901_vm3, %v6160_v26, %v633_v60 }
 0x106   : > { %v770_v47 = vpop.permute.xlu0 %769  ;;  %v811_v48 = vpop.permute.xlu1 %810 }
 0x107   : > { %v786_v24 = vsel %vm785_vm9, %v770_v47, %v772_v42  ;;  %v6354_v47 = vld [vmem:[%s7911_s1] sm:$0x7] }
 0x108   : > { %v934_v34 = vsel %vm933_vm13, %v926_v33, %v786_v24 }
 0x10a   : > { %v6296_v49 = vpop.permute.xlu0 %812  ;;  %v880_v50 = vpop.permute.xlu1 %879 }
 0x10b   : > { %v825_v8 = vsel %vm602_vm0, %v811_v48, %v6296_v49 }
 0x10c   : > { %v943_v28 = vsel %vm941_vm14, %v935_v19, %v825_v8 }
 0x10e   : > { %v6298_v51 = vpop.permute.xlu0 %881  ;;  %v6300_v52 = vpop.permute.xlu1 %697 }
 0x10f   : > { %v895_v53 = vsel %vm893_vm2, %v880_v50, %v6298_v51  ;;  %v710_v27 = vsel %vm707_vm6, %v6282_v35, %v6300_v52 }
 0x110   : > { %5305 = vmatprep.subr.msk.mxu0 %vm901_vm3, %v895_v53 }
 0x112   : > { %v6305_v54 = vpop.permute.xlu0 %699  ;;  %v809_v55 = vpop.permute.xlu1 %808 }
 0x113   : > { %v824_v32 = vsel %vm602_vm0, %v809_v55, %v811_v48  ;;  %v711_v39 = vsel %vm707_vm6, %v6300_v52, %v6305_v54  ;;  %v913_v52 = vsel %vm909_vm8, %v905_v31, %v672_v6 }
 0x114   : > { %v942_v42 = vsel %vm941_vm14, %v934_v34, %v824_v32 }
 0x116   : > { %v849_v61 = vpop.permute.xlu0 %848  ;;  %v6318_v62 = vpop.permute.xlu1 %850 }
 0x117   : > { %v864_v16 = vsel %vm862_vm12, %v849_v61, %v6318_v62 }
 0x118   : > { %v951_v10 = vsel %vm949_vm15, %v943_v28, %v864_v16 }
 0x11a   : > { %v878_v20 = vpop.permute.xlu0 %877  ;;  %v737_v21 = vpop.permute.xlu1 %736 }
 0x11b   : > { %v894_v25 = vsel %vm893_vm2, %v878_v20, %v880_v50  ;;  %v749_v44 = vsel %vm746_vm7, %v6284_v38, %v737_v21  ;;  %v921_v38 = vsel %vm917_vm10, %v913_v52, %v711_v39 }
 0x11c   : > { %5306 = vmatpush1.msk.msra.mxu0 %vm901_vm3, %v894_v25 }
 0x11d   : > { %1010 = vmatprep.subr.mxu0 %v951_v10 }
 0x11e   : > { %v6347_v36 = vpop.permute.xlu0 %738  ;;  %v847_v37 = vpop.permute.xlu1 %846 }
 0x11f   : > { %v863_v41 = vsel %vm862_vm12, %v847_v37, %v849_v61  ;;  %v750_v7 = vsel %vm746_vm7, %v737_v21, %v6347_v36 }
 0x120   : > { %v950_v48 = vsel %vm949_vm15, %v942_v42, %v863_v41  ;;  %v929_v18 = vsel %vm925_vm11, %v921_v38, %v750_v7 }
 0x121   : > { %1011 = vmatpush1.msra.mxu0 %v950_v48 }
 0x122   : > { %v776_v50 = vpop.permute.xlu0 %775  ;;  %5307 = vmatmul.mubr.msk.f32.vlgmr.msra.gmra.mxu0 %vm962_vm1, %v6354_v47  ;;  %v6359_v53 = vpop.permute.xlu1 %777 }
 0x123   : > { %1115 = vmatprep.mubr.f32.mxu0 %v5890_v45  ;;  %v788_v14 = vsel %vm785_vm9, %v6290_v43, %v776_v50 }
 0x126   : > { %v815_v55 = vpop.permute.xlu0 %814  ;;  %v6362_v56 = vpop.permute.xlu1 %816 }
 0x127   : > { %v826_v15 = vsel %vm602_vm0, %v6296_v49, %v815_v55  ;;  %v827_v16 = vsel %vm602_vm0, %v815_v55, %v6362_v56 }
 0x12a   : > { %v884_v57 = vpop.permute.xlu0 %883  ;;  %v6364_v58 = vpop.permute.xlu1 %885 }
 0x12b   : > { %v896_v61 = vsel %vm893_vm2, %v6298_v51, %v884_v57  ;;  %v897_v63 = vsel %vm893_vm2, %v884_v57, %v6364_v58  ;;  %v904_v51 = vsel %vm901_vm3, %v6131_v11, %v632_v59  ;;  %v789_v11 = vsel %vm785_vm9, %v776_v50, %v6359_v53 }
 0x12c   : > { %5308 = vmatprep.subr.msk.mxu0 %vm901_vm3, %v897_v63  ;;  %v912_v8 = vsel %vm909_vm8, %v904_v51, %v671_v5  ;;  %v937_v43 = vsel %vm933_vm13, %v929_v18, %v789_v11 }
 0x12d   : > { %5309 = vmatpush1.msk.msra.mxu0 %vm901_vm3, %v896_v61  ;;  %v920_v26 = vsel %vm917_vm10, %v912_v8, %v710_v27  ;;  %v945_v49 = vsel %vm941_vm14, %v937_v43, %v827_v16 }
 0x12e   : > { %v624_v9 = vpop.permute.xlu0 %623  ;;  %v6398_v35 = vpop.permute.xlu1 %625  ;;  %v928_v17 = vsel %vm925_vm11, %v920_v26, %v749_v44 }
 0x12f   : > { %v936_v19 = vsel %vm933_vm13, %v928_v17, %v788_v14  ;;  %v634_v59 = vsel %vm629_vm5, %v6288_v40, %v624_v9  ;;  %v635_v60 = vsel %vm629_vm5, %v624_v9, %v6398_v35 }
 0x130   : > { %v944_v25 = vsel %vm941_vm14, %v936_v19, %v826_v15  ;;  %v906_v39 = vsel %vm901_vm3, %v6167_v30, %v634_v59  ;;  %v907_v51 = vsel %vm901_vm3, %v6133_v12, %v635_v60 }
 0x132   : > { %v853_v20 = vpop.permute.xlu0 %852  ;;  %v855_v21 = vpop.permute.xlu1 %854 }
 0x133   : > { %v865_v22 = vsel %vm862_vm12, %v6318_v62, %v853_v20  ;;  %v866_v24 = vsel %vm862_vm12, %v853_v20, %v855_v21 }
 0x134   : > { %v953_v28 = vsel %vm949_vm15, %v945_v49, %v866_v24  ;;  %v952_v29 = vsel %vm949_vm15, %v944_v25, %v865_v22 }
 0x135   : > { %1081 = vmatprep.subr.mxu0 %v953_v28 }
 0x136   : > { %v663_v32 = vpop.permute.xlu0 %662  ;;  %1082 = vmatpush1.msra.mxu0 %v952_v29  ;;  %v665_v10 = vpop.permute.xlu1 %664 }
 0x137   : > { %5310 = vmatmul.mubr.msk.f32.vlgmr.msra.gmra.mxu0 %vm962_vm1, %v6354_v47  ;;  %v673_v5 = vsel %vm7939_vm4, %v6294_v46, %v663_v32  ;;  %v674_v6 = vsel %vm7939_vm4, %v663_v32, %v665_v10 }
 0x138   : > { %1186 = vmatprep.mubr.f32.mxu0 %v5890_v45  ;;  %v914_v31 = vsel %vm909_vm8, %v906_v39, %v673_v5  ;;  %v915_v44 = vsel %vm909_vm8, %v907_v51, %v674_v6 }
 0x13a   : > { %v702_v62 = vpop.permute.xlu0 %701  ;;  %v704_v33 = vpop.permute.xlu1 %703 }
 0x13b   : > { %v712_v27 = vsel %vm707_vm6, %v6305_v54, %v702_v62  ;;  %v713_v40 = vsel %vm707_vm6, %v702_v62, %v704_v33 }
 0x13c   : > { %v922_v54 = vsel %vm917_vm10, %v914_v31, %v712_v27  ;;  %v923_v14 = vsel %vm917_vm10, %v915_v44, %v713_v40 }
 0x13e   : > { %v628_v34 = vpop.permute.xlu0 %627  ;;  %v741_v37 = vpop.permute.xlu1 %740 }
 0x13f   : > { %v751_v46 = vsel %vm746_vm7, %v6347_v36, %v741_v37  ;;  %v636_v38 = vsel %vm629_vm5, %v6398_v35, %v628_v34 }
 0x140   : > { %v908_v24 = vsel %vm901_vm3, %v6135_v13, %v636_v38 }
 0x142   : > { %v743_v41 = vpop.permute.xlu0 %742  ;;  %v667_v42 = vpop.permute.xlu1 %666 }
 0x143   : > { %v752_v7 = vsel %vm746_vm7, %v741_v37, %v743_v41  ;;  %v675_v16 = vsel %vm7939_vm4, %v665_v10, %v667_v42 }
 0x144   : > { %v931_v15 = vsel %vm925_vm11, %v923_v14, %v752_v7  ;;  %v916_v29 = vsel %vm909_vm8, %v908_v24, %v675_v16 }
 0x146   : > { %v780_v48 = vpop.permute.xlu0 %779  ;;  %v782_v50 = vpop.permute.xlu1 %781 }
 0x147   : > { %v790_v30 = vsel %vm785_vm9, %v6359_v53, %v780_v48  ;;  %v791_v12 = vsel %vm785_vm9, %v780_v48, %v782_v50  ;;  %v930_v53 = vsel %vm925_vm11, %v922_v54, %v751_v46 }
 0x148   : > { %v939_v17 = vsel %vm933_vm13, %v931_v15, %v791_v12 }
 0x14a   : > { %v706_v55 = vpop.permute.xlu0 %705  ;;  %v819_v57 = vpop.permute.xlu1 %818 }
 0x14b   : > { %v828_v11 = vsel %vm602_vm0, %v6362_v56, %v819_v57  ;;  %v938_v56 = vsel %vm933_vm13, %v930_v53, %v790_v30  ;;  %v714_v18 = vsel %vm707_vm6, %v704_v33, %v706_v55 }
 0x14c   : > { %v946_v22 = vsel %vm941_vm14, %v938_v56, %v828_v11 }
 0x14e   : > { %v821_v61 = vpop.permute.xlu0 %820  ;;  %v888_v63 = vpop.permute.xlu1 %887 }
 0x14f   : > { %v829_v36 = vsel %vm602_vm0, %v819_v57, %v821_v61  ;;  %v898_v26 = vsel %vm893_vm2, %v6364_v58, %v888_v63 }
 0x150   : > { %v947_v20 = vsel %vm941_vm14, %v939_v17, %v829_v36 }
 0x152   : > { %v890_v9 = vpop.permute.xlu0 %889  ;;  %v745_v8 = vpop.permute.xlu1 %744 }
 0x153   : > { %v899_v52 = vsel %vm893_vm2, %v888_v63, %v890_v9  ;;  %v753_v49 = vsel %vm746_vm7, %v743_v41, %v745_v8 }
 0x154   : > { %5311 = vmatprep.subr.msk.mxu0 %vm901_vm3, %v899_v52 }
 0x155   : > { %5312 = vmatpush1.msk.msra.mxu0 %vm901_vm3, %v898_v26 }
 0x156   : > { %v857_v58 = vpop.permute.xlu0 %856  ;;  %v859_v19 = vpop.permute.xlu1 %858 }
 0x157   : > { %v867_v43 = vsel %vm862_vm12, %v855_v21, %v857_v58  ;;  %v868_v35 = vsel %vm862_vm12, %v857_v58, %v859_v19  ;;  %v924_v21 = vsel %vm917_vm10, %v916_v29, %v714_v18 }
 0x158   : > { %v955_v25 = vsel %vm949_vm15, %v947_v20, %v868_v35  ;;  %v954_v28 = vsel %vm949_vm15, %v946_v22, %v867_v43  ;;  %v932_v62 = vsel %vm925_vm11, %v924_v21, %v753_v49 }
 0x159   : > { %1152 = vmatprep.subr.mxu0 %v955_v25 }
 0x15a   : > { %v784_v32 = vpop.permute.xlu0 %783  ;;  %1153 = vmatpush1.msra.mxu0 %v954_v28  ;;  %v823_v10 = vpop.permute.xlu1 %822 }
 0x15b   : > { %v792_v33 = vsel %vm785_vm9, %v782_v50, %v784_v32  ;;  %5313 = vmatmul.mubr.msk.f32.vlgmr.msra.gmra.mxu0 %vm962_vm1, %v6354_v47  ;;  %v830_v34 = vsel %vm602_vm0, %v821_v61, %v823_v10 }
 0x15c   : > { %v940_v13 = vsel %vm933_vm13, %v932_v62, %v792_v33  ;;  %1681 = vmatprep.mubr.f32.mxu0 %v5890_v45 }
 0x15d   : > { %v948_v55 = vsel %vm941_vm14, %v940_v13, %v830_v34 }
 0x15e   : > { %v892_v37 = vpop.permute.xlu0 %891  ;;  %v861_v41 = vpop.permute.xlu1 %860 }
 0x15f   : > { %v869_v42 = vsel %vm862_vm12, %v859_v19, %v861_v41  ;;  %v900_v48 = vsel %vm893_vm2, %v890_v9, %v892_v37 }
 0x160   : > { %5471 = vmatpush3.msk.msra.mxu1 %vm901_vm3, %v900_v48  ;;  %v956_v50 = vsel %vm949_vm15, %v948_v55, %v869_v42  ;;  %v1271_v55 = vld [vmem:[%s7914_s4] sm:$0x3f] }
 0x161   : > { %5472 = vmatprep.subr.mxu1 %v5890_v45 }
 0x162   : > { %5473 = vmatpush3.msra.mxu1 %v956_v50 }
 0x163   : > { %5475 = vmatmul.mubr.msk.f32.vlgmr.msra.gmra.mxu1 %vm962_vm1, %v6354_v47  ;;  %vm1599_vm1 = vcmask 220160  }
 0x164   : > { %1752 = vmatprep.mubr.f32.mxu1 %v5890_v45 }
 0x16b   : > { %v6493_v57 = vpop.permute.xlu0 %959 }
 0x1e2   : > { %v1046_v59 = vpop.f32.mrf.mxu0 }
 0x1e3   : > { %v1047_v60 = vadd.f32 %v1046_v59, %v6493_v57 }
 0x1e4   : > { %v1048_v61 = vpop.f32.mrf.mxu0 }
 0x1e5   : > { %v6496_v63 = vmax.f32 %v1047_v60, 0.0  ;;  %v1049_v5 = vadd.f32 %v1048_v61, %v6493_v57 }
 0x1e7   : > { %v6499_v6 = vmax.f32 %v1049_v5, 0.0  ;;  %1522 = vrot.lane.b32.xlu0 %v6496_v63, %s5889_s15  ;;  %v1415_v47 = vrot.slane %v6496_v63, 1  ;;  %v1347_v27 = vrot.slane %v6496_v63, 7  ;;  %v1381_v39 = vrot.slane %v6496_v63, 4 }
 0x1e8   : > { %v1449_v19 = vrot.slane %v6496_v63, 6  ;;  %v1313_v20 = vrot.slane %v6496_v63, 2  ;;  %v1484_v24 = vrot.slane %v6496_v63, 3  ;;  %v1279_v25 = vrot.slane %v6496_v63, 5 }
 0x1e9   : > { %v1450_v51 = vrot.slane %v6499_v6, 6  ;;  %v1314_v40 = vrot.slane %v6499_v6, 2  ;;  %v1348_v44 = vrot.slane %v6499_v6, 7  ;;  %v1485_v9 = vrot.slane %v6499_v6, 3 }
 0x1ea   : > { %v1416_v48 = vrot.slane %v6499_v6, 1  ;;  %v1382_v50 = vrot.slane %v6499_v6, 4  ;;  %v1280_v60 = vrot.slane %v6499_v6, 5 }
 0x1eb   : > { %1524 = vrot.lane.b32.xlu0 %v6499_v6, %s5889_s15 }
 0x1ef   : > { %1422 = vrot.lane.b32.xlu0 %v1415_v47, %s5887_s17 }
 0x1f3   : > { %1354 = vrot.lane.b32.xlu0 %v1347_v27, %s5885_s16 }
 0x1f7   : > { %1388 = vrot.lane.b32.xlu0 %v1381_v39, %s5886_s18  ;;  %v1117_v31 = vpop.f32.mrf.mxu0 }
 0x1f8   : > { %v1118_v46 = vadd.f32 %v1117_v31, %v6493_v57 }
 0x1f9   : > { %v1119_v54 = vpop.f32.mrf.mxu0 }
 0x1fa   : > { %v6518_v7 = vmax.f32 %v1118_v46, 0.0  ;;  %v1120_v30 = vadd.f32 %v1119_v54, %v6493_v57 }
 0x1fb   : > { %1458 = vrot.lane.b32.xlu0 %v1450_v51, %s5888_s20 }
 0x1fc   : > { %v1383_v8 = vrot.slane %v6518_v7, 4  ;;  %v1281_v12 = vrot.slane %v6518_v7, 5  ;;  %v6526_v52 = vmax.f32 %v1120_v30, 0.0  ;;  %v1417_v5 = vrot.slane %v6518_v7, 1 }
 0x1fd   : > { %v1451_v47 = vrot.slane %v6518_v7, 6  ;;  %v1315_v39 = vrot.slane %v6518_v7, 2 }
 0x1fe   : > { %v1418_v14 = vrot.slane %v6526_v52, 1  ;;  %v1452_v11 = vrot.slane %v6526_v52, 6  ;;  %v1316_v36 = vrot.slane %v6526_v52, 2  ;;  %v1350_v26 = vrot.slane %v6526_v52, 7 }
 0x1ff   : > { %1322 = vrot.lane.b32.xlu0 %v1314_v40, %s5884_s27  ;;  %v1487_v53 = vrot.slane %v6526_v52, 3  ;;  %v1384_v18 = vrot.slane %v6526_v52, 4  ;;  %v1282_v35 = vrot.slane %v6526_v52, 5  ;;  %v1349_v40 = vrot.slane %v6518_v7, 7 }
 0x203   : > { %1356 = vrot.lane.b32.xlu0 %v1348_v44, %s5885_s16  ;;  %v1486_v44 = vrot.slane %v6518_v7, 3 }
 0x207   : > { %1494 = vrot.lane.b32.xlu0 %v1485_v9, %s5891_s10 }
 0x20b   : > { %1392 = vrot.lane.b32.xlu0 %v1383_v8, %s5886_s18 }
 0x20f   : > { %1290 = vrot.lane.b32.xlu0 %v1281_v12, %s5883_s25 }
 0x213   : > { %1528 = vrot.lane.b32.xlu0 %v6526_v52, %s5889_s15 }
 0x217   : > { %1428 = vrot.lane.b32.xlu0 %v1418_v14, %s5887_s17 }
 0x21b   : > { %1462 = vrot.lane.b32.xlu0 %v1452_v11, %s5888_s20  ;;  %v6541_v56 = vpop.f32.mrf.mxu0 }
 0x21c   : > { %v1189_v31 = vadd.f32 %v6541_v56, %v6493_v57 }
 0x21d   : > { %v1190_v58 = vpop.f32.mrf.mxu0 }
 0x21e   : > { %v1191_v43 = vadd.f32 %v1190_v58, %v6493_v57  ;;  %v6626_v9 = vmax.f32 %v1189_v31, 0.0 }
 0x21f   : > { %1326 = vrot.lane.b32.xlu0 %v1316_v36, %s5884_s27 }
 0x220   : > { %v6557_v22 = vmax.f32 %v1191_v43, 0.0  ;;  %v1419_v54 = vrot.slane %v6626_v9, 1  ;;  %v1453_v30 = vrot.slane %v6626_v9, 6  ;;  %v1317_v12 = vrot.slane %v6626_v9, 2 }
 0x221   : > { %v1351_v11 = vrot.slane %v6626_v9, 7  ;;  %v1488_v36 = vrot.slane %v6626_v9, 3 }
 0x222   : > { %v1420_v49 = vrot.slane %v6557_v22, 1  ;;  %v1454_v28 = vrot.slane %v6557_v22, 6  ;;  %v1318_v21 = vrot.slane %v6557_v22, 2  ;;  %v1352_v10 = vrot.slane %v6557_v22, 7 }
 0x223   : > { %1360 = vrot.lane.b32.xlu0 %v1350_v26, %s5885_s16  ;;  %v1259_v38 = vpop.f32.mrf.mxu1  ;;  %v1489_v33 = vrot.slane %v6557_v22, 3  ;;  %v1386_v34 = vrot.slane %v6557_v22, 4  ;;  %v1284_v41 = vrot.slane %v6557_v22, 5 }
 0x224   : > { %v1260_v15 = vadd.f32 %v1259_v38, %v6493_v57  ;;  %v1385_v38 = vrot.slane %v6626_v9, 4 }
 0x225   : > { %v5476_v16 = vpop.f32.mrf.mxu1 }
 0x226   : > { %v6543_v17 = vmax.f32 %v1260_v15, 0.0  ;;  %v1283_v15 = vrot.slane %v6626_v9, 5 }
 0x227   : > { %1498 = vrot.lane.b32.xlu0 %v1487_v53, %s5891_s10 }
 0x228   : > { %1534 = vrot.lane.b32.xlu1 %v6543_v17, %s5889_s15  ;;  %v1421_v29 = vrot.slane %v6543_v17, 1  ;;  %v1455_v32 = vrot.slane %v6543_v17, 6  ;;  %v1319_v62 = vrot.slane %v6543_v17, 2  ;;  %v1353_v13 = vrot.slane %v6543_v17, 7 }
 0x229   : > { %v1490_v37 = vrot.slane %v6543_v17, 3  ;;  %v1387_v42 = vrot.slane %v6543_v17, 4  ;;  %v1285_v16 = vrot.slane %v6543_v17, 5 }
 0x22b   : > { %1394 = vrot.lane.b32.xlu0 %v1384_v18, %s5886_s18  ;;  %v1491_v18 = vrot.slane %v5890_v45, 3 }
 0x22c   : > { %1456 = vrot.lane.b32.xlu1 %v1449_v19, %s5888_s20 }
 0x22f   : > { %1292 = vrot.lane.b32.xlu0 %v1282_v35, %s5883_s25 }
 0x230   : > { %1320 = vrot.lane.b32.xlu1 %v1313_v20, %s5884_s27 }
 0x233   : > { %1532 = vrot.lane.b32.xlu0 %v6557_v22, %s5889_s15 }
 0x234   : > { %1492 = vrot.lane.b32.xlu1 %v1484_v24, %s5891_s10 }
 0x237   : > { %1432 = vrot.lane.b32.xlu0 %v1420_v49, %s5887_s17 }
 0x238   : > { %1286 = vrot.lane.b32.xlu1 %v1279_v25, %s5883_s25 }
 0x23b   : > { %1466 = vrot.lane.b32.xlu0 %v1454_v28, %s5888_s20 }
 0x23c   : > { %1434 = vrot.lane.b32.xlu1 %v1421_v29, %s5887_s17 }
 0x23f   : > { %1330 = vrot.lane.b32.xlu0 %v1318_v21, %s5884_s27 }
 0x240   : > { %1468 = vrot.lane.b32.xlu1 %v1455_v32, %s5888_s20 }
 0x243   : > { %1364 = vrot.lane.b32.xlu0 %v1352_v10, %s5885_s16 }
 0x244   : > { %1332 = vrot.lane.b32.xlu1 %v1319_v62, %s5884_s27 }
 0x247   : > { %1502 = vrot.lane.b32.xlu0 %v1489_v33, %s5891_s10 }
 0x248   : > { %1366 = vrot.lane.b32.xlu1 %v1353_v13, %s5885_s16 }
 0x24b   : > { %1398 = vrot.lane.b32.xlu0 %v1386_v34, %s5886_s18 }
 0x24c   : > { %1504 = vrot.lane.b32.xlu1 %v1490_v37, %s5891_s10 }
 0x24f   : > { %1296 = vrot.lane.b32.xlu0 %v1284_v41, %s5883_s25 }
 0x250   : > { %1400 = vrot.lane.b32.xlu1 %v1387_v42, %s5886_s18 }
 0x253   : > { %1536 = vrot.lane.b32.xlu0 %v5890_v45, %s5889_s15 }
 0x254   : > { %1424 = vrot.lane.b32.xlu1 %v1416_v48, %s5887_s17 }
 0x257   : > { %1596 = vperm.xlu0 %5609, %v1271_v55  }
 0x258   : > { %1526 = vrot.lane.b32.xlu1 %v6518_v7, %s5889_s15 }
 0x259   : > { %v6601_v59 = vpop.permute.xlu0 %1522 }
 0x25c   : > { %1390 = vrot.lane.b32.xlu1 %v1382_v50, %s5886_s18 }
 0x25d   : > { %v6606_v61 = vpop.permute.xlu0 %1524 }
 0x25e   : > { %v1538_v50 = vsel %vm893_vm2, %v6601_v59, %v6606_v61 }
 0x260   : > { %1288 = vrot.lane.b32.xlu1 %v1280_v60, %s5883_s25 }
 0x261   : > { %v6611_v27 = vpop.permute.xlu0 %1422 }
 0x264   : > { %1426 = vrot.lane.b32.xlu1 %v1417_v5, %s5887_s17 }
 0x265   : > { %v6616_v51 = vpop.permute.xlu0 %1354 }
 0x268   : > { %1460 = vrot.lane.b32.xlu1 %v1451_v47, %s5888_s20 }
 0x269   : > { %v6623_v46 = vpop.permute.xlu0 %1388 }
 0x26c   : > { %1324 = vrot.lane.b32.xlu1 %v1315_v39, %s5884_s27 }
 0x26d   : > { %v6630_v8 = vpop.permute.xlu0 %1458 }
 0x270   : > { %1358 = vrot.lane.b32.xlu1 %v1349_v40, %s5885_s16 }
 0x271   : > { %v1323_v57 = vpop.permute.xlu0 %1322 }
 0x274   : > { %1496 = vrot.lane.b32.xlu1 %v1486_v44, %s5891_s10 }
 0x275   : > { %v1357_v14 = vpop.permute.xlu0 %1356 }
 0x278   : > { %1530 = vrot.lane.b32.xlu1 %v6626_v9, %s5889_s15 }
 0x279   : > { %v6641_v26 = vpop.permute.xlu0 %1494 }
 0x27c   : > { %1430 = vrot.lane.b32.xlu1 %v1419_v54, %s5887_s17 }
 0x27d   : > { %v6646_v53 = vpop.permute.xlu0 %1392 }
 0x280   : > { %1464 = vrot.lane.b32.xlu1 %v1453_v30, %s5888_s20 }
 0x281   : > { %v6651_v56 = vpop.permute.xlu0 %1290 }
 0x284   : > { %1328 = vrot.lane.b32.xlu1 %v1317_v12, %s5884_s27 }
 0x285   : > { %v6658_v19 = vpop.permute.xlu0 %1528 }
 0x288   : > { %1362 = vrot.lane.b32.xlu1 %v1351_v11, %s5885_s16 }
 0x289   : > { %v6660_v20 = vpop.permute.xlu0 %1428 }
 0x28c   : > { %1500 = vrot.lane.b32.xlu1 %v1488_v36, %s5891_s10 }
 0x28d   : > { %v6662_v49 = vpop.permute.xlu0 %1462 }
 0x290   : > { %1396 = vrot.lane.b32.xlu1 %v1385_v38, %s5886_s18 }
 0x291   : > { %v6666_v29 = vpop.permute.xlu0 %1326 }
 0x294   : > { %1294 = vrot.lane.b32.xlu1 %v1283_v15, %s5883_s25 }
 0x295   : > { %v6670_v32 = vpop.permute.xlu0 %1360 }
 0x298   : > { %1298 = vrot.lane.b32.xlu1 %v1285_v16, %s5883_s25  ;;  %v1368_v16 = vsel %vm707_vm6, %v6616_v51, %v1357_v14 }
 0x299   : > { %v6676_v33 = vpop.permute.xlu0 %1498 }
 0x29a   : > { %v6655_v58 = vpop.permute.xlu1 %1534 }
 0x29c   : > { %1506 = vrot.lane.b32.xlu1 %v1491_v18, %s5891_s10 }
 0x29d   : > { %v6680_v34 = vpop.permute.xlu0 %1394 }
 0x29e   : > { %v1457_v43 = vpop.permute.xlu1 %1456 }
 0x29f   : > { %v1470_v18 = vsel %vm602_vm0, %v1457_v43, %v6630_v8 }
 0x2a1   : > { %v6684_v42 = vpop.permute.xlu0 %1292 }
 0x2a2   : > { %v1321_v35 = vpop.permute.xlu1 %1320 }
 0x2a5   : > { %v1533_v60 = vpop.permute.xlu0 %1532 }
 0x2a6   : > { %v1493_v24 = vpop.permute.xlu1 %1492 }
 0x2a7   : > { %v1508_v43 = vsel %vm862_vm12, %v1493_v24, %v6641_v26 }
 0x2a9   : > { %v6693_v39 = vpop.permute.xlu0 %1432 }
 0x2aa   : > { %v1287_v25 = vpop.permute.xlu1 %1286 }
 0x2ad   : > { %v6697_v31 = vpop.permute.xlu0 %1466 }
 0x2ae   : > { %v6664_v28 = vpop.permute.xlu1 %1434 }
 0x2b1   : > { %v6703_v30 = vpop.permute.xlu0 %1330 }
 0x2b2   : > { %v6668_v21 = vpop.permute.xlu1 %1468 }
 0x2b6   : > { %v6672_v10 = vpop.permute.xlu1 %1332 }
 0x2ba   : > { %v6674_v62 = vpop.permute.xlu1 %1366 }
 0x2be   : > { %v6678_v13 = vpop.permute.xlu1 %1504 }
 0x2c2   : > { %v6682_v37 = vpop.permute.xlu1 %1400 }
 0x2c6   : > { %v1425_v41 = vpop.permute.xlu1 %1424 }
 0x2c7   : > { %v1436_v12 = vsel %vm785_vm9, %v6611_v27, %v1425_v41 }
 0x2c8   : > { %v1580_v23 = vsel %vm909_vm8, %v1436_v12, %v1470_v18 }
 0x2ca   : > { %v1527_v48 = vpop.permute.xlu1 %1526 }
 0x2cb   : > { %v1539_v55 = vsel %vm893_vm2, %v6606_v61, %v1527_v48  ;;  %v1334_v61 = vsel %vm7939_vm4, %v1321_v35, %v1323_v57  ;;  %v6725_v35 = vpop.permute.xlu0 %1364 }
 0x2cc   : > { %5316 = vmatprep.subr.msk.mxu0 %vm917_vm10, %v1539_v55 }
 0x2cd   : > { %5317 = vmatpush1.msk.msra.mxu0 %vm917_vm10, %v1538_v50 }
 0x2ce   : > { %v1391_v5 = vpop.permute.xlu1 %1390 }
 0x2cf   : > { %v1402_v27 = vsel %vm746_vm7, %v6623_v46, %v1391_v5  ;;  %v1403_v55 = vsel %vm746_vm7, %v1391_v5, %v6646_v53 }
 0x2d2   : > { %v1289_v47 = vpop.permute.xlu1 %1288 }
 0x2d3   : > { %v1300_v51 = vsel %vm629_vm5, %v1287_v25, %v1289_v47  ;;  %v1301_v5 = vsel %vm629_vm5, %v1289_v47, %v6651_v56  ;;  %v1587_v25 = vsel %vm933_vm13, %v1580_v23, %v1508_v43  ;;  %v1475_v23 = vsel %vm602_vm0, %v6697_v31, %v6668_v21 }
 0x2d4   : > { %v1546_v47 = vsel %vm917_vm10, %v6499_v6, %v1301_v5  ;;  %v6792_v5 = vsel %vm7939_vm4, %v6703_v30, %v6672_v10 }
 0x2d6   : > { %v6695_v40 = vpop.permute.xlu1 %1426 }
 0x2d7   : > { %v1437_v50 = vsel %vm785_vm9, %v1425_v41, %v6695_v40 }
 0x2da   : > { %v6699_v44 = vpop.permute.xlu1 %1460 }
 0x2db   : > { %v1471_v38 = vsel %vm602_vm0, %v6630_v8, %v6699_v44 }
 0x2dc   : > { %v1581_v46 = vsel %vm909_vm8, %v1437_v50, %v1471_v38  ;;  %v1545_v38 = vsel %vm917_vm10, %v6496_v63, %v1300_v51  ;;  %v6762_v63 = vld [vmem:[%s7913_s3] sm:$0x3f] }
 0x2de   : > { %v6701_v54 = vpop.permute.xlu1 %1324 }
 0x2df   : > { %v1335_v11 = vsel %vm7939_vm4, %v1323_v57, %v6701_v54  ;;  %v1559_v57 = vsel %vm901_vm3, %v1334_v61, %v1368_v16 }
 0x2e0   : > { %v1566_v16 = vsel %vm925_vm11, %v1559_v57, %v1402_v27  ;;  %v1540_v27 = vsel %vm893_vm2, %v1527_v48, %v6658_v19 }
 0x2e2   : > { %v6705_v59 = vpop.permute.xlu1 %1358 }
 0x2e3   : > { %v1369_v36 = vsel %vm707_vm6, %v1357_v14, %v6705_v59 }
 0x2e4   : > { %v1560_v15 = vsel %vm901_vm3, %v1335_v11, %v1369_v36 }
 0x2e5   : > { %v1567_v14 = vsel %vm925_vm11, %v1560_v15, %v1403_v55  ;;  %v1503_v15 = vpop.permute.xlu0 %1502 }
 0x2e6   : > { %v1497_v36 = vpop.permute.xlu1 %1496  ;;  %v1574_v4 = vsel %vm949_vm15, %v1567_v14, %v1437_v50  ;;  %v1513_v6 = vsel %vm862_vm12, %v1503_v15, %v6678_v13  ;;  %v1472_v14 = vsel %vm602_vm0, %v6699_v44, %v6662_v49 }
 0x2e7   : > { %v1509_v8 = vsel %vm862_vm12, %v6641_v26, %v1497_v36  ;;  %v1573_v26 = vsel %vm949_vm15, %v1566_v16, %v1436_v12  ;;  %v1552_v12 = vsel %vm941_vm14, %v1545_v38, %v1334_v61  ;;  %v1336_v38 = vsel %vm7939_vm4, %v6701_v54, %v6666_v29 }
 0x2e8   : > { %v1588_v41 = vsel %vm933_vm13, %v1581_v46, %v1509_v8 }
 0x2e9   : > { %1643 = vmatprep.subr.mxu0 %v1588_v41  ;;  %v1399_v8 = vpop.permute.xlu0 %1398  ;;  %v1370_v41 = vsel %vm707_vm6, %v6705_v59, %v6670_v32 }
 0x2ea   : > { %1644 = vmatpush1.msra.mxu0 %v1587_v25  ;;  %v1531_v18 = vpop.permute.xlu1 %1530  ;;  %v1407_v46 = vsel %vm746_vm7, %v1399_v8, %v6682_v37  ;;  %v1438_v25 = vsel %vm785_vm9, %v6695_v40, %v6660_v20 }
 0x2eb   : > { %1645 = vmatprep.subr.mxu0 %v1574_v4  ;;  %v1541_v24 = vsel %vm893_vm2, %v6658_v19, %v1531_v18  ;;  %v1553_v4 = vsel %vm941_vm14, %v1546_v47, %v1335_v11  ;;  %v1441_v19 = vsel %vm785_vm9, %v6693_v39, %v6664_v28  ;;  %v1543_v11 = vsel %vm893_vm2, %v1533_v60, %v6655_v58 }
 0x2ec   : > { %1646 = vmatpush1.msra.mxu0 %v1573_v26  ;;  %5319 = vmatprep.subr.msk.mxu1 %vm917_vm10, %v1541_v24  ;;  %v1542_v57 = vsel %vm893_vm2, %v1531_v18, %v1533_v60  ;;  %v1585_v55 = vsel %vm909_vm8, %v1441_v19, %v1475_v23  ;;  %v1373_v60 = vsel %vm707_vm6, %v6725_v35, %v6674_v62 }
 0x2ed   : > { %1647 = vmatprep.subr.mxu0 %v1553_v4  ;;  %5320 = vmatpush1.msk.msra.mxu1 %vm917_vm10, %v1540_v27  ;;  %v1592_v61 = vsel %vm933_vm13, %v1585_v55, %v1513_v6  ;;  %v1564_v16 = vsel %vm901_vm3, %v6792_v5, %v1373_v60  ;;  %v1582_v26 = vsel %vm909_vm8, %v1438_v25, %v1472_v14 }
 0x2ee   : > { %1648 = vmatpush1.msra.mxu0 %v1552_v12  ;;  %v1431_v48 = vpop.permute.xlu1 %1430  ;;  %v1571_v59 = vsel %vm925_vm11, %v1564_v16, %v1407_v46  ;;  %v1561_v24 = vsel %vm901_vm3, %v1336_v38, %v1370_v41  ;;  %v1510_v47 = vsel %vm862_vm12, %v1497_v36, %v6676_v33  ;;  %v1302_v60 = vsel %vm629_vm5, %v6651_v56, %v6684_v42 }
 0x2ef   : > { %5318 = vmatmul.mubr.msk.f32.vlgmr.msra.gmra.mxu0 %vm1599_vm1, %v6762_v63  ;;  %5322 = vmatprep.subr.msk.mxu0 %vm917_vm10, %v1543_v11  ;;  %v1439_v40 = vsel %vm785_vm9, %v6660_v20, %v1431_v48  ;;  %v1578_v12 = vsel %vm949_vm15, %v1571_v59, %v1441_v19  ;;  %v1547_v56 = vsel %vm917_vm10, %v6518_v7, %v1302_v60  ;;  %v2174_v60 = vld [vmem:[#allocation2 + $0x5c0] sm:$0xff] }
 0x2f0   : > { %5323 = vmatpush1.msk.msra.mxu0 %vm917_vm10, %v1542_v57  ;;  %1823 = vmatprep.mubr.f32.mxu0 %v5890_v45  ;;  %v1297_v57 = vpop.permute.xlu0 %1296 }
 0x2f1   : > { %1785 = vmatprep.subr.mxu0 %v1592_v61 }
 0x2f2   : > { %v1465_v50 = vpop.permute.xlu1 %1464 }
 0x2f3   : > { %v1473_v44 = vsel %vm602_vm0, %v6662_v49, %v1465_v50  ;;  %v1474_v18 = vsel %vm602_vm0, %v1465_v50, %v6697_v31  ;;  %v1440_v49 = vsel %vm785_vm9, %v1431_v48, %v6693_v39 }
 0x2f4   : > { %v1583_v27 = vsel %vm909_vm8, %v1439_v40, %v1473_v44  ;;  %v1584_v4 = vsel %vm909_vm8, %v1440_v49, %v1474_v18  ;;  %v1537_v41 = vpop.permute.xlu0 %1536  ;;  %v1554_v18 = vsel %vm941_vm14, %v1547_v56, %v1336_v38  ;;  %v2166_v56 = vld [vmem:[#allocation2 + $0x580] sm:$0xff] }
 0x2f6   : > { %v1329_v51 = vpop.permute.xlu1 %1328 }
 0x2fa   : > { %v1363_v43 = vpop.permute.xlu1 %1362 }
 0x2fb   : > { %v1371_v6 = vsel %vm707_vm6, %v6670_v32, %v1363_v43  ;;  %v1372_v36 = vsel %vm707_vm6, %v1363_v43, %v6725_v35  ;;  %v1337_v32 = vsel %vm7939_vm4, %v6666_v29, %v1329_v51  ;;  %v1338_v35 = vsel %vm7939_vm4, %v1329_v51, %v6703_v30 }
 0x2fc   : > { %v1563_v55 = vsel %vm901_vm3, %v1338_v35, %v1372_v36  ;;  %vm7962_vm4 = vmmov 0  }
 0x2fe   : > { %v1501_v31 = vpop.permute.xlu1 %1500 }
 0x2ff   : > { %v1511_v23 = vsel %vm862_vm12, %v6676_v33, %v1501_v31  ;;  %v1512_v54 = vsel %vm862_vm12, %v1501_v31, %v1503_v15  ;;  %v1404_v33 = vsel %vm746_vm7, %v6646_v53, %v6680_v34  ;;  %v1589_v15 = vsel %vm933_vm13, %v1582_v26, %v1510_v47 }
 0x300   : > { %v1590_v20 = vsel %vm933_vm13, %v1583_v27, %v1511_v23  ;;  %v1591_v39 = vsel %vm933_vm13, %v1584_v4, %v1512_v54  ;;  %v1568_v11 = vsel %vm925_vm11, %v1561_v24, %v1404_v33  ;;  %v1562_v53 = vsel %vm901_vm3, %v1337_v32, %v1371_v6 }
 0x301   : > { %1714 = vmatprep.subr.mxu1 %v1590_v20  ;;  %1786 = vmatpush1.msra.mxu0 %v1591_v39  ;;  %v1575_v14 = vsel %vm949_vm15, %v1568_v11, %v1438_v25  ;;  %v1544_v26 = vsel %vm893_vm2, %v6655_v58, %v1537_v41  ;;  %v2167_v41 = vld [vmem:[#allocation2 + $0x588] sm:$0xff] }
 0x302   : > { %1715 = vmatpush1.msra.mxu1 %v1589_v15  ;;  %1787 = vmatprep.subr.mxu0 %v1578_v12  ;;  %v1397_v48 = vpop.permute.xlu1 %1396 }
 0x303   : > { %v1405_v61 = vsel %vm746_vm7, %v6680_v34, %v1397_v48  ;;  %v1406_v19 = vsel %vm746_vm7, %v1397_v48, %v1399_v8 }
 0x304   : > { %v1569_v29 = vsel %vm925_vm11, %v1562_v53, %v1405_v61  ;;  %v1570_v50 = vsel %vm925_vm11, %v1563_v55, %v1406_v19  ;;  %v2179_v61 = vld [vmem:[#allocation2 + $0x5e8] sm:$0xff] }
 0x305   : > { %v1576_v30 = vsel %vm949_vm15, %v1569_v29, %v1439_v40  ;;  %v1577_v51 = vsel %vm949_vm15, %v1570_v50, %v1440_v49  ;;  %v1597_v40 = vpop.permute.xlu0 %1596  ;;  %v2051_v19 = vld [vmem:[#allocation2 + $0x1e8] sm:$0xff]  ;;  %v2178_v29 = vld [vmem:[#allocation2 + $0x5e0] sm:$0xff] }
 0x306   : > { %1716 = vmatprep.subr.mxu1 %v1576_v30  ;;  %1788 = vmatpush1.msra.mxu0 %v1577_v51  ;;  %v1295_v46 = vpop.permute.xlu1 %1294  ;;  %v2050_v50 = vld [vmem:[#allocation2 + $0x1e0] sm:$0xff]  ;;  %v2175_v30 = vld [vmem:[#allocation2 + $0x5c8] sm:$0xff] }
 0x307   : > { %v1303_v34 = vsel %vm629_vm5, %v6684_v42, %v1295_v46  ;;  %1717 = vmatpush1.msra.mxu1 %v1575_v14  ;;  %v1304_v8 = vsel %vm629_vm5, %v1295_v46, %v1297_v57  ;;  %v2047_v51 = vld [vmem:[#allocation2 + $0x1c8] sm:$0xff]  ;;  %v2046_v46 = vld [vmem:[#allocation2 + $0x1c0] sm:$0xff] }
 0x308   : > { %v1548_v43 = vsel %vm917_vm10, %v6526_v52, %v1303_v34  ;;  %v1549_v42 = vsel %vm917_vm10, %v6626_v9, %v1304_v8  ;;  %v1565_v9 = vsel %vm901_vm3, %v6672_v10, %v6674_v62  ;;  %v2171_v14 = vld [vmem:[#allocation2 + $0x5a8] sm:$0xff]  ;;  %v2170_v8 = vld [vmem:[#allocation2 + $0x5a0] sm:$0xff]  ;;  %vm7963_vm3 = vcmask 1031168  }
 0x309   : > { %v1555_v16 = vsel %vm941_vm14, %v1548_v43, %v1337_v32  ;;  %v1556_v38 = vsel %vm941_vm14, %v1549_v42, %v1338_v35  ;;  %v2043_v34 = vld [vmem:[#allocation2 + $0x1a8] sm:$0xff]  ;;  %v2042_v43 = vld [vmem:[#allocation2 + $0x1a0] sm:$0xff] }
 0x30a   : > { %1718 = vmatprep.subr.mxu1 %v1555_v16  ;;  %v1299_v44 = vpop.permute.xlu1 %1298  ;;  %v2039_v16 = vld [vmem:[#allocation2 + $0x188] sm:$0xff]  ;;  %v2162_v42 = vld [vmem:[#allocation2 + $0x560] sm:$0xff] }
 0x30b   : > { %v1305_v25 = vsel %vm629_vm5, %v1297_v57, %v1299_v44  ;;  %1719 = vmatpush1.msra.mxu1 %v1554_v18  ;;  %v1551_v24 = vsel %vm917_vm10, %v6543_v17, %v1299_v44  ;;  %v2038_v44 = vld [vmem:[#allocation2 + $0x180] sm:$0xff]  ;;  %v2163_v18 = vld [vmem:[#allocation2 + $0x568] sm:$0xff] }
 0x30c   : > { %5321 = vmatmul.mubr.msk.f32.vlgmr.msra.gmra.mxu1 %vm1599_vm1, %v6762_v63  ;;  %5477 = vmatprep.subr.mxu1 %v5890_v45  ;;  %v1550_v7 = vsel %vm917_vm10, %v6557_v22, %v1305_v25  ;;  %v1586_v22 = vsel %vm909_vm8, %v6664_v28, %v6668_v21  ;;  %v2035_v25 = vld [vmem:[#allocation2 + $0x168] sm:$0xff] }
 0x30d   : > { %5478 = vmatpush3.msk.msra.mxu1 %vm917_vm10, %v1544_v26  ;;  %v1557_v52 = vsel %vm941_vm14, %v1550_v7, %v6792_v5  ;;  %5485 = vmatprep.mubr.msk.f32.mxu1 %vm7962_vm4, %v5890_v45  ;;  %v1572_v5 = vsel %vm925_vm11, %v1565_v9, %v6682_v37  ;;  %v2034_v26 = vld [vmem:[#allocation2 + $0x160] sm:$0xff]  ;;  %v2159_v7 = vld [vmem:[#allocation2 + $0x548] sm:$0xff]  ;;  %vm7964_vm4 = vmmov %vm7963_vm3 }
 0x30e   : > { %1789 = vmatprep.subr.mxu0 %v1557_v52  ;;  %v1507_v58 = vpop.permute.xlu1 %1506  ;;  %5479 = vmatprep.subr.mxu1 %v5890_v45  ;;  %v1579_v21 = vsel %vm949_vm15, %v1572_v5, %v6664_v28  ;;  %v2031_v52 = vld [vmem:[#allocation2 + $0x148] sm:$0xff]  ;;  %v2158_v9 = vld [vmem:[#allocation2 + $0x540] sm:$0xff]  ;;  %vm7965_vm10 = vmmov %vm7963_vm3 }
 0x30f   : > { %v1514_v59 = vsel %vm862_vm12, %v6678_v13, %v1507_v58  ;;  %1790 = vmatpush1.msra.mxu0 %v1556_v38  ;;  %v1558_v13 = vsel %vm941_vm14, %v1551_v24, %v6672_v10  ;;  %v2030_v58 = vld [vmem:[#allocation2 + $0x140] sm:$0xff]  ;;  %v2155_v38 = vld [vmem:[#allocation2 + $0x528] sm:$0xff] }
 0x310   : > { %5324 = vmatmul.mubr.msk.f32.vlgmr.msra.gmra.mxu0 %vm1599_vm1, %v6762_v63  ;;  %v1593_v62 = vsel %vm933_vm13, %v1586_v22, %v1514_v59  ;;  %2409 = vmatprep.subr.mxu0 %v2051_v19  ;;  %v2027_v22 = vld [vmem:[#allocation2 + $0x128] sm:$0xff]  ;;  %v2154_v5 = vld [vmem:[#allocation2 + $0x520] sm:$0xff] }
 0x311   : > { %5480 = vmatpush3.msra.mxu1 %v1593_v62  ;;  %2410 = vmatpush1.msra.mxu0 %v2050_v50  ;;  %v2026_v59 = vld [vmem:[#allocation2 + $0x120] sm:$0xff]  ;;  %v2151_v62 = vld [vmem:[#allocation2 + $0x508] sm:$0xff] }
 0x312   : > { %5481 = vmatprep.subr.mxu1 %v5890_v45  ;;  %2411 = vmatprep.subr.mxu0 %v2047_v51  ;;  %v2023_v24 = vld [vmem:[#allocation2 + $0x108] sm:$0xff]  ;;  %v2006_v19 = vld [vmem:[#allocation2 + $0x80] sm:$0xff] }
 0x313   : > { %5482 = vmatpush3.msra.mxu1 %v1579_v21  ;;  %2412 = vmatpush1.msra.mxu0 %v2046_v46  ;;  %v2150_v21 = vld [vmem:[#allocation2 + $0x500] sm:$0xff]  ;;  %v2003_v50 = vld [vmem:[#allocation2 + $0x68] sm:$0xff] }
 0x314   : > { %5483 = vmatprep.subr.mxu1 %v5890_v45  ;;  %2413 = vmatprep.subr.mxu0 %v2043_v34  ;;  %v2002_v51 = vld [vmem:[#allocation2 + $0x60] sm:$0xff]  ;;  %v1999_v46 = vld [vmem:[#allocation2 + $0x48] sm:$0xff] }
 0x315   : > { %5484 = vmatpush3.msra.mxu1 %v1558_v13  ;;  %2414 = vmatpush1.msra.mxu0 %v2042_v43  ;;  %v2022_v13 = vld [vmem:[#allocation2 + $0x100] sm:$0xff]  ;;  %v1995_v43 = vld [vmem:[#allocation2 + $0x28] sm:$0xff] }
 0x316   : > { %5486 = vmatmul.mubr.msk.f32.vlgmr.msra.gmra.mxu1 %vm1599_vm1, %v6762_v63  ;;  %2480 = vmatprep.subr.mxu1 %v2179_v61  ;;  %v2134_v61 = vld [vmem:[#allocation2 + $0x480] sm:$0xff]  ;;  %vm3370_vm1 = vcmask 269312  }
 0x317   : > { %2481 = vmatpush1.msra.mxu1 %v2178_v29  ;;  %2415 = vmatprep.subr.mxu0 %v2039_v16  ;;  %v2131_v29 = vld [vmem:[#allocation2 + $0x468] sm:$0xff]  ;;  %v1998_v34 = vld [vmem:[#allocation2 + $0x40] sm:$0xff] }
 0x318   : > { %2482 = vmatprep.subr.mxu1 %v2175_v30  ;;  %2416 = vmatpush1.msra.mxu0 %v2038_v44  ;;  %v2130_v30 = vld [vmem:[#allocation2 + $0x460] sm:$0xff]  ;;  %v1991_v44 = vld [vmem:[#allocation2 + $0x8] sm:$0xff] }
 0x319   : > { %2483 = vmatpush1.msra.mxu1 %v2174_v60  ;;  %2417 = vmatprep.subr.mxu0 %v2035_v25  ;;  %v2127_v60 = vld [vmem:[#allocation2 + $0x448] sm:$0xff]  ;;  %v1994_v16 = vld [vmem:[#allocation2 + $0x20] sm:$0xff] }
 0x31a   : > { %2484 = vmatprep.subr.mxu1 %v2171_v14  ;;  %2418 = vmatpush1.msra.mxu0 %v2034_v26  ;;  %v2126_v14 = vld [vmem:[#allocation2 + $0x440] sm:$0xff]  ;;  %v2115_v26 = vld [vmem:[#allocation2 + $0x3e8] sm:$0xff] }
 0x31b   : > { %2485 = vmatpush1.msra.mxu1 %v2170_v8  ;;  %2419 = vmatprep.subr.mxu0 %v2031_v52  ;;  %v2123_v8 = vld [vmem:[#allocation2 + $0x428] sm:$0xff]  ;;  %v1990_v25 = vld [vmem:[#allocation2] sm:$0xff] }
 0x31c   : > { %2486 = vmatprep.subr.mxu1 %v2167_v41  ;;  %2420 = vmatpush1.msra.mxu0 %v2030_v58  ;;  %v2122_v41 = vld [vmem:[#allocation2 + $0x420] sm:$0xff]  ;;  %v2111_v58 = vld [vmem:[#allocation2 + $0x3c8] sm:$0xff] }
 0x31d   : > { %2487 = vmatpush1.msra.mxu1 %v2166_v56  ;;  %2421 = vmatprep.subr.mxu0 %v2027_v22  ;;  %v2119_v56 = vld [vmem:[#allocation2 + $0x408] sm:$0xff]  ;;  %v2114_v52 = vld [vmem:[#allocation2 + $0x3e0] sm:$0xff] }
 0x31e   : > { %2488 = vmatprep.subr.mxu1 %v2163_v18  ;;  %2422 = vmatpush1.msra.mxu0 %v2026_v59  ;;  %v2118_v18 = vld [vmem:[#allocation2 + $0x400] sm:$0xff]  ;;  %v2107_v59 = vld [vmem:[#allocation2 + $0x3a8] sm:$0xff] }
 0x31f   : > { %2489 = vmatpush1.msra.mxu1 %v2162_v42  ;;  %2423 = vmatprep.subr.mxu0 %v2023_v24  ;;  %v2243_v42 = vld [vmem:[#allocation2 + $0x7e8] sm:$0xff]  ;;  %v2110_v22 = vld [vmem:[#allocation2 + $0x3c0] sm:$0xff] }
 0x320   : > { %2490 = vmatprep.subr.mxu1 %v2159_v7  ;;  %2424 = vmatpush1.msra.mxu0 %v2022_v13  ;;  %v2242_v7 = vld [vmem:[#allocation2 + $0x7e0] sm:$0xff]  ;;  %v2103_v13 = vld [vmem:[#allocation2 + $0x388] sm:$0xff] }
 0x321   : > { %2491 = vmatpush1.msra.mxu1 %v2158_v9  ;;  %v2239_v9 = vld [vmem:[#allocation2 + $0x7c8] sm:$0xff]  ;;  %v2106_v24 = vld [vmem:[#allocation2 + $0x3a0] sm:$0xff] }
 0x322   : > { %2492 = vmatprep.subr.mxu1 %v2155_v38  ;;  %v2238_v38 = vld [vmem:[#allocation2 + $0x7c0] sm:$0xff] }
 0x323   : > { %2493 = vmatpush1.msra.mxu1 %v2154_v5  ;;  %v2235_v5 = vld [vmem:[#allocation2 + $0x7a8] sm:$0xff] }
 0x324   : > { %2494 = vmatprep.subr.mxu1 %v2151_v62  ;;  %v2234_v62 = vld [vmem:[#allocation2 + $0x7a0] sm:$0xff] }
 0x325   : > { %2495 = vmatpush1.msra.mxu1 %v2150_v21  ;;  %v2231_v21 = vld [vmem:[#allocation2 + $0x788] sm:$0xff] }
 0x3af   : > { %v1683_v37 = vpop.f32.mrf.mxu0 }
 0x3b0   : > { %v6909_v10 = vadd.f32 %v1683_v37, %v1597_v40  ;;  %v2147_v37 = vld [vmem:[#allocation2 + $0x4e8] sm:$0xff] }
 0x3b1   : > { %v1685_v17 = vpop.f32.mrf.mxu0  ;;  %2496 = vmatprep.subr.mxu1 %v2147_v37  ;;  %v2230_v37 = vld [vmem:[#allocation2 + $0x780] sm:$0xff] }
 0x3b2   : > { %v6903_v54 = vadd.f32 %v1685_v17, %v1597_v40  ;;  %v1900_v32 = vmax.f32 %v6909_v10, 0.0  ;;  %v2018_v17 = vld [vmem:[#allocation2 + $0xe0] sm:$0xff] }
 0x3b4   : > { %v1901_v20 = vmax.f32 %v6903_v54, 0.0 }
 0x3b6   : > { %v5620_v57 = vpack.i.bf16 %v1900_v32, %v1901_v20 }
 0x3cc   : > { %v1754_v47 = vpop.f32.mrf.mxu1 }
 0x3cd   : > { %v6905_v28 = vadd.f32 %v1754_v47, %v1597_v40  ;;  %v2019_v47 = vld [vmem:[#allocation2 + $0xe8] sm:$0xff] }
 0x3ce   : > { %v1756_v49 = vpop.f32.mrf.mxu1  ;;  %2425 = vmatprep.subr.mxu0 %v2019_v47  ;;  %v2102_v47 = vld [vmem:[#allocation2 + $0x380] sm:$0xff] }
 0x3cf   : > { %v6901_v31 = vadd.f32 %v1756_v49, %v1597_v40  ;;  %v1902_v39 = vmax.f32 %v6905_v28, 0.0  ;;  %v2143_v49 = vld [vmem:[#allocation2 + $0x4c8] sm:$0xff]  ;;  %2426 = vmatpush1.msra.mxu0 %v2018_v17 }
 0x3d0   : > { %v1825_v23 = vpop.f32.mrf.mxu0  ;;  %v2099_v17 = vld [vmem:[#allocation2 + $0x368] sm:$0xff] }
 0x3d1   : > { %v6907_v27 = vadd.f32 %v1825_v23, %v1597_v40  ;;  %v1903_v6 = vmax.f32 %v6901_v31, 0.0  ;;  %v2015_v23 = vld [vmem:[#allocation2 + $0xc8] sm:$0xff] }
 0x3d2   : > { %v1827_v4 = vpop.f32.mrf.mxu0  ;;  %2427 = vmatprep.subr.mxu0 %v2015_v23  ;;  %v2098_v23 = vld [vmem:[#allocation2 + $0x360] sm:$0xff] }
 0x3d3   : > { %v1904_v63 = vmax.f32 %v6907_v27, 0.0  ;;  %v6913_v36 = vadd.f32 %v1827_v4, %v1597_v40  ;;  %v2142_v4 = vld [vmem:[#allocation2 + $0x4c0] sm:$0xff] }
 0x3d5   : > { %v5610_v33 = vpack.i.bf16 %v1904_v63, %v1903_v6  ;;  %v1905_v15 = vmax.f32 %v6913_v36, 0.0 }
 0x3d6   : > { %v1896_v12 = vpop.f32.mrf.mxu1 }
 0x3d7   : > { %v5615_v35 = vpack.i.bf16 %v1902_v39, %v1905_v15  ;;  %v1897_v48 = vadd.f32 %v1896_v12, %v1597_v40  ;;  %5611 = vrot.lane.b32.xlu1 %v5610_v33, %s5883_s25  ;;  %v2146_v40 = vld [vmem:[#allocation2 + $0x4e0] sm:$0xff]  ;;  %v2139_v12 = vld [vmem:[#allocation2 + $0x4a8] sm:$0xff] }
 0x3d8   : > { %v5487_v11 = vpop.f32.mrf.mxu1  ;;  %2497 = vmatpush1.msra.mxu1 %v2146_v40  ;;  %v2014_v33 = vld [vmem:[#allocation2 + $0xc0] sm:$0xff]  ;;  %v2227_v40 = vld [vmem:[#allocation2 + $0x768] sm:$0xff] }
 0x3d9   : > { %v1906_v53 = vmax.f32 %v1897_v48, 0.0  ;;  %5616 = vrot.lane.b32.xlu0 %v5615_v35, %s5883_s25  ;;  %2498 = vmatprep.subr.mxu1 %v2143_v49  ;;  %v2011_v35 = vld [vmem:[#allocation2 + $0xa8] sm:$0xff]  ;;  %v2138_v48 = vld [vmem:[#allocation2 + $0x4a0] sm:$0xff] }
 0x3da   : > { %2499 = vmatpush1.msra.mxu1 %v2142_v4  ;;  %v2010_v11 = vld [vmem:[#allocation2 + $0xa0] sm:$0xff]  ;;  %2428 = vmatpush1.msra.mxu0 %v2014_v33  ;;  %v2223_v4 = vld [vmem:[#allocation2 + $0x748] sm:$0xff] }
 0x3db   : > { %v6934_v55 = vsel %vm602_vm0, %v1906_v53, 0.0  ;;  %5621 = vrot.lane.b32.xlu1 %v5620_v57, %s5883_s25  ;;  %v2135_v57 = vld [vmem:[#allocation2 + $0x488] sm:$0xff]  ;;  %2500 = vmatprep.subr.mxu1 %v2139_v12  ;;  %v2226_v49 = vld [vmem:[#allocation2 + $0x760] sm:$0xff] }
 0x3dc   : > { %v2007_v53 = vld [vmem:[#allocation2 + $0x88] sm:$0xff]  ;;  %2429 = vmatprep.subr.mxu0 %v2011_v35  ;;  %2501 = vmatpush1.msra.mxu1 %v2138_v48  ;;  %v2222_v12 = vld [vmem:[#allocation2 + $0x740] sm:$0xff] }
 0x3dd   : > { %1927 = vrot.lane.b32.xlu0 %v6934_v55, %s5883_s25  ;;  %2430 = vmatpush1.msra.mxu0 %v2010_v11  ;;  %v2095_v33 = vld [vmem:[#allocation2 + $0x348] sm:$0xff]  ;;  %v2094_v35 = vld [vmem:[#allocation2 + $0x340] sm:$0xff] }
 0x3de   : > { %2502 = vmatprep.subr.mxu1 %v2135_v57  ;;  %2431 = vmatprep.subr.mxu0 %v2007_v53  ;;  %v2219_v48 = vld [vmem:[#allocation2 + $0x728] sm:$0xff]  ;;  %v2218_v57 = vld [vmem:[#allocation2 + $0x720] sm:$0xff] }
 0x3df   : > { %2503 = vmatpush1.msra.mxu1 %v2134_v61  ;;  %2432 = vmatpush1.msra.mxu0 %v2006_v19  ;;  %v2091_v11 = vld [vmem:[#allocation2 + $0x328] sm:$0xff]  ;;  %v2090_v53 = vld [vmem:[#allocation2 + $0x320] sm:$0xff] }
 0x3e0   : > { %2504 = vmatprep.subr.mxu1 %v2131_v29  ;;  %2433 = vmatprep.subr.mxu0 %v2003_v50  ;;  %v2215_v61 = vld [vmem:[#allocation2 + $0x708] sm:$0xff]  ;;  %v2214_v29 = vld [vmem:[#allocation2 + $0x700] sm:$0xff] }
 0x3e1   : > { %2505 = vmatpush1.msra.mxu1 %v2130_v30  ;;  %2434 = vmatpush1.msra.mxu0 %v2002_v51  ;;  %v2087_v19 = vld [vmem:[#allocation2 + $0x308] sm:$0xff]  ;;  %v2086_v50 = vld [vmem:[#allocation2 + $0x300] sm:$0xff] }
 0x3e2   : > { %2506 = vmatprep.subr.mxu1 %v2127_v60  ;;  %2435 = vmatprep.subr.mxu0 %v1999_v46  ;;  %v2211_v30 = vld [vmem:[#allocation2 + $0x6e8] sm:$0xff]  ;;  %v2210_v60 = vld [vmem:[#allocation2 + $0x6e0] sm:$0xff] }
 0x3e3   : > { %2507 = vmatpush1.msra.mxu1 %v2126_v14  ;;  %2436 = vmatpush1.msra.mxu0 %v1998_v34  ;;  %v2083_v51 = vld [vmem:[#allocation2 + $0x2e8] sm:$0xff]  ;;  %v2082_v46 = vld [vmem:[#allocation2 + $0x2e0] sm:$0xff] }
 0x3e4   : > { %2508 = vmatprep.subr.mxu1 %v2123_v8  ;;  %2437 = vmatprep.subr.mxu0 %v1995_v43  ;;  %v2207_v14 = vld [vmem:[#allocation2 + $0x6c8] sm:$0xff]  ;;  %v2206_v8 = vld [vmem:[#allocation2 + $0x6c0] sm:$0xff] }
 0x3e5   : > { %2509 = vmatpush1.msra.mxu1 %v2122_v41  ;;  %2438 = vmatpush1.msra.mxu0 %v1994_v16  ;;  %v2079_v34 = vld [vmem:[#allocation2 + $0x2c8] sm:$0xff]  ;;  %v2078_v43 = vld [vmem:[#allocation2 + $0x2c0] sm:$0xff] }
 0x3e6   : > { %2510 = vmatprep.subr.mxu1 %v2119_v56  ;;  %2439 = vmatprep.subr.mxu0 %v1991_v44  ;;  %v2203_v41 = vld [vmem:[#allocation2 + $0x6a8] sm:$0xff]  ;;  %v2202_v56 = vld [vmem:[#allocation2 + $0x6a0] sm:$0xff] }
 0x3e7   : > { %2511 = vmatpush1.msra.mxu1 %v2118_v18  ;;  %2440 = vmatpush1.msra.mxu0 %v1990_v25  ;;  %v2075_v16 = vld [vmem:[#allocation2 + $0x2a8] sm:$0xff]  ;;  %v2074_v44 = vld [vmem:[#allocation2 + $0x2a0] sm:$0xff] }
 0x3e8   : > { %2512 = vmatprep.subr.mxu1 %v2243_v42  ;;  %2441 = vmatprep.subr.mxu0 %v2115_v26  ;;  %v2199_v18 = vld [vmem:[#allocation2 + $0x688] sm:$0xff]  ;;  %v2198_v42 = vld [vmem:[#allocation2 + $0x680] sm:$0xff] }
 0x3e9   : > { %2513 = vmatpush2.msra.mxu1 %v2242_v7  ;;  %2442 = vmatpush2.msra.mxu0 %v2114_v52  ;;  %v2071_v25 = vld [vmem:[#allocation2 + $0x288] sm:$0xff]  ;;  %v2070_v26 = vld [vmem:[#allocation2 + $0x280] sm:$0xff] }
 0x3ea   : > { %2514 = vmatprep.subr.mxu1 %v2239_v9  ;;  %2443 = vmatprep.subr.mxu0 %v2111_v58  ;;  %v2195_v7 = vld [vmem:[#allocation2 + $0x668] sm:$0xff]  ;;  %v2194_v9 = vld [vmem:[#allocation2 + $0x660] sm:$0xff] }
 0x3eb   : > { %2515 = vmatpush2.msra.mxu1 %v2238_v38  ;;  %2444 = vmatpush2.msra.mxu0 %v2110_v22  ;;  %v2067_v52 = vld [vmem:[#allocation2 + $0x268] sm:$0xff]  ;;  %v2066_v58 = vld [vmem:[#allocation2 + $0x260] sm:$0xff] }
 0x3ec   : > { %2516 = vmatprep.subr.mxu1 %v2235_v5  ;;  %2445 = vmatprep.subr.mxu0 %v2107_v59  ;;  %v2191_v38 = vld [vmem:[#allocation2 + $0x648] sm:$0xff]  ;;  %v2190_v5 = vld [vmem:[#allocation2 + $0x640] sm:$0xff] }
 0x3ed   : > { %2517 = vmatpush2.msra.mxu1 %v2234_v62  ;;  %2446 = vmatpush2.msra.mxu0 %v2106_v24  ;;  %v2063_v22 = vld [vmem:[#allocation2 + $0x248] sm:$0xff]  ;;  %v2062_v59 = vld [vmem:[#allocation2 + $0x240] sm:$0xff] }
 0x3ee   : > { %2518 = vmatprep.subr.mxu1 %v2231_v21  ;;  %2447 = vmatprep.subr.mxu0 %v2103_v13  ;;  %v2187_v62 = vld [vmem:[#allocation2 + $0x628] sm:$0xff]  ;;  %v2186_v13 = vld [vmem:[#allocation2 + $0x620] sm:$0xff] }
 0x3ef   : > { %2519 = vmatpush2.msra.mxu1 %v2230_v37  ;;  %2448 = vmatpush2.msra.mxu0 %v2102_v47  ;;  %v2059_v21 = vld [vmem:[#allocation2 + $0x228] sm:$0xff] }
 0x3f0   : > { %2520 = vmatprep.subr.mxu1 %v2227_v40  ;;  %2449 = vmatprep.subr.mxu0 %v2099_v17  ;;  %v2058_v40 = vld [vmem:[#allocation2 + $0x220] sm:$0xff]  ;;  %v2183_v17 = vld [vmem:[#allocation2 + $0x608] sm:$0xff] }
 0x3f1   : > { %2521 = vmatpush2.msra.mxu1 %v2226_v49  ;;  %2450 = vmatpush2.msra.mxu0 %v2098_v23  ;;  %v2055_v23 = vld [vmem:[#allocation2 + $0x208] sm:$0xff] }
 0x3f2   : > { %2522 = vmatprep.subr.mxu1 %v2223_v4  ;;  %2451 = vmatprep.subr.mxu0 %v2095_v33  ;;  %v2182_v4 = vld [vmem:[#allocation2 + $0x600] sm:$0xff] }
 0x3f3   : > { %2523 = vmatpush2.msra.mxu1 %v2222_v12  ;;  %2452 = vmatpush2.msra.mxu0 %v2094_v35 }
 0x3f4   : > { %2524 = vmatprep.subr.mxu1 %v2219_v48  ;;  %2453 = vmatprep.subr.mxu0 %v2091_v11  ;;  %v2054_v48 = vld [vmem:[#allocation2 + $0x200] sm:$0xff]  ;;  %v2403_v11 = vld [vmem:[#allocation2 + $0xce8] sm:$0xff] }
 0x3f5   : > { %2525 = vmatpush2.msra.mxu1 %v2218_v57  ;;  %2454 = vmatpush2.msra.mxu0 %v2090_v53  ;;  %v2307_v53 = vld [vmem:[#allocation2 + $0x9e8] sm:$0xff] }
 0x3f6   : > { %2526 = vmatprep.subr.mxu1 %v2215_v61  ;;  %2455 = vmatprep.subr.mxu0 %v2087_v19 }
 0x3f7   : > { %2527 = vmatpush2.msra.mxu1 %v2214_v29  ;;  %2456 = vmatpush2.msra.mxu0 %v2086_v50 }
 0x3f8   : > { %2528 = vmatprep.subr.mxu1 %v2211_v30  ;;  %2457 = vmatprep.subr.mxu0 %v2083_v51 }
 0x3f9   : > { %2529 = vmatpush2.msra.mxu1 %v2210_v60  ;;  %2458 = vmatpush2.msra.mxu0 %v2082_v46 }
 0x3fa   : > { %2530 = vmatprep.subr.mxu1 %v2207_v14  ;;  %2459 = vmatprep.subr.mxu0 %v2079_v34 }
 0x3fb   : > { %2531 = vmatpush2.msra.mxu1 %v2206_v8  ;;  %2460 = vmatpush2.msra.mxu0 %v2078_v43 }
 0x3fc   : > { %2532 = vmatprep.subr.mxu1 %v2203_v41  ;;  %2461 = vmatprep.subr.mxu0 %v2075_v16 }
 0x3fd   : > { %2533 = vmatpush2.msra.mxu1 %v2202_v56  ;;  %2462 = vmatpush2.msra.mxu0 %v2074_v44 }
 0x3fe   : > { %2534 = vmatprep.subr.mxu1 %v2199_v18  ;;  %2463 = vmatprep.subr.mxu0 %v2071_v25 }
 0x3ff   : > { %2535 = vmatpush2.msra.mxu1 %v2198_v42  ;;  %2464 = vmatpush2.msra.mxu0 %v2070_v26  ;;  %v2402_v26 = vld [vmem:[#allocation2 + $0xce0] sm:$0xff] }
 0x400   : > { %2536 = vmatprep.subr.mxu1 %v2195_v7  ;;  %2465 = vmatprep.subr.mxu0 %v2067_v52  ;;  %v2306_v7 = vld [vmem:[#allocation2 + $0x9e0] sm:$0xff]  ;;  %v2399_v52 = vld [vmem:[#allocation2 + $0xcc8] sm:$0xff] }
 0x401   : > { %2537 = vmatpush2.msra.mxu1 %v2194_v9  ;;  %2466 = vmatpush2.msra.mxu0 %v2066_v58 }
 0x402   : > { %2538 = vmatprep.subr.mxu1 %v2191_v38  ;;  %2467 = vmatprep.subr.mxu0 %v2063_v22  ;;  %v2303_v38 = vld [vmem:[#allocation2 + $0x9c8] sm:$0xff]  ;;  %v2398_v22 = vld [vmem:[#allocation2 + $0xcc0] sm:$0xff] }
 0x403   : > { %2539 = vmatpush2.msra.mxu1 %v2190_v5  ;;  %2468 = vmatpush2.msra.mxu0 %v2062_v59  ;;  %v2302_v59 = vld [vmem:[#allocation2 + $0x9c0] sm:$0xff] }
 0x404   : > { %2540 = vmatprep.subr.mxu1 %v2187_v62  ;;  %2469 = vmatprep.subr.mxu0 %v2059_v21  ;;  %v2395_v62 = vld [vmem:[#allocation2 + $0xca8] sm:$0xff] }
 0x405   : > { %2541 = vmatpush2.msra.mxu1 %v2186_v13  ;;  %2470 = vmatpush2.msra.mxu0 %v2058_v40  ;;  %v2394_v13 = vld [vmem:[#allocation2 + $0xca0] sm:$0xff]  ;;  %v2295_v40 = vld [vmem:[#allocation2 + $0x988] sm:$0xff] }
 0x406   : > { %2542 = vmatprep.subr.mxu1 %v2183_v17  ;;  %2471 = vmatprep.subr.mxu0 %v2055_v23  ;;  %v2390_v17 = vld [vmem:[#allocation2 + $0xc80] sm:$0xff]  ;;  %v2387_v23 = vld [vmem:[#allocation2 + $0xc68] sm:$0xff] }
 0x407   : > { %2543 = vmatpush2.msra.mxu1 %v2182_v4  ;;  %2472 = vmatpush2.msra.mxu0 %v2054_v48  ;;  %v2291_v4 = vld [vmem:[#allocation2 + $0x968] sm:$0xff] }
 0x408   : > { %2638 = vmatprep.subr.mxu1 %v2403_v11  ;;  %2551 = vmatprep.subr.mxu0 %v2307_v53  ;;  %v2287_v48 = vld [vmem:[#allocation2 + $0x948] sm:$0xff]  ;;  %v2382_v11 = vld [vmem:[#allocation2 + $0xc40] sm:$0xff] }
 0x409   : > { %v2379_v53 = vld [vmem:[#allocation2 + $0xc28] sm:$0xff] }
 0x449   : > { %v5612_v24 = vpop.permute.xlu1 %5611 }
 0x44a   : > { %v5614_v37 = vunpack.i.h.bf16 %v5612_v24  ;;  %v5613_v47 = vunpack.i.l.bf16 %v5612_v24  ;;  %v2299_v24 = vld [vmem:[#allocation2 + $0x9a8] sm:$0xff] }
 0x44b   : > { %v5617_v49 = vpop.permute.xlu0 %5616 }
 0x44c   : > { %v1932_v33 = vsel %vm629_vm5, %v5613_v47, %v5614_v37  ;;  %v5619_v12 = vunpack.i.h.bf16 %v5617_v49  ;;  %v5618_v35 = vunpack.i.l.bf16 %v5617_v49  ;;  %v2294_v49 = vld [vmem:[#allocation2 + $0x980] sm:$0xff] }
 0x44d   : > { %v5622_v57 = vpop.permute.xlu1 %5621  ;;  %v1945_v30 = vmax.f32 %v1903_v6, %v1932_v33  ;;  %v2386_v33 = vld [vmem:[#allocation2 + $0xc60] sm:$0xff] }
 0x44e   : > { %v1931_v61 = vsel %vm629_vm5, %v5619_v12, %v5613_v47  ;;  %v1933_v19 = vsel %vm629_vm5, %v5614_v37, %v5618_v35  ;;  %v5624_v29 = vunpack.i.h.bf16 %v5622_v57  ;;  %v5623_v50 = vunpack.i.l.bf16 %v5622_v57  ;;  %v2298_v37 = vld [vmem:[#allocation2 + $0x9a0] sm:$0xff]  ;;  %v2391_v47 = vld [vmem:[#allocation2 + $0xc88] sm:$0xff] }
 0x44f   : > { %v6946_v51 = vmax.f32 %v1904_v63, %v1933_v19  ;;  %v1944_v46 = vmax.f32 %v1902_v39, %v1931_v61  ;;  %v1928_v43 = vpop.permute.xlu0 %1927  ;;  %v2286_v57 = vld [vmem:[#allocation2 + $0x940] sm:$0xff]  ;;  %v2283_v61 = vld [vmem:[#allocation2 + $0x928] sm:$0xff] }
 0x450   : > { %v1930_v60 = vsel %vm629_vm5, %v5623_v50, %v5619_v12  ;;  %v1929_v8 = vsel %vm629_vm5, %v5624_v29, %v5623_v50  ;;  %v1934_v6 = vsel %vm629_vm5, %v5618_v35, %v1928_v43  ;;  %v6961_v28 = vmax.f32 %v6934_v55, %v1928_v43  ;;  %v2290_v12 = vld [vmem:[#allocation2 + $0x960] sm:$0xff]  ;;  %v2383_v35 = vld [vmem:[#allocation2 + $0xc48] sm:$0xff]  ;;  %v2052_v43 = vld [vmem:[#allocation2 + $0x1f0] sm:$0xff] }
 0x451   : > { %v1943_v14 = vmax.f32 %v1901_v20, %v1930_v60  ;;  %v5630_v34 = vpack.i.bf16 %v6946_v51, %v1945_v30  ;;  %v1942_v27 = vmax.f32 %v1900_v32, %v1929_v8  ;;  %v1947_v54 = vmax.f32 %v1905_v15, %v1934_v6  ;;  %v2378_v19 = vld [vmem:[#allocation2 + $0xc20] sm:$0xff]  ;;  %v2375_v50 = vld [vmem:[#allocation2 + $0xc08] sm:$0xff] }
 0x452   : > { %v2282_v29 = vld [vmem:[#allocation2 + $0x920] sm:$0xff]  ;;  %v2275_v8 = vld [vmem:[#allocation2 + $0x8e8] sm:$0xff] }
 0x453   : > { %5631 = vrot.lane.b32.xlu1 %v5630_v34, %s5885_s16  ;;  %v5625_v31 = vpack.i.bf16 %v1943_v14, %v1944_v46  ;;  %v2374_v60 = vld [vmem:[#allocation2 + $0xc00] sm:$0xff]  ;;  %v2053_v34 = vld [vmem:[#allocation2 + $0x1f8] sm:$0xff]  ;;  %v2271_v6 = vld [vmem:[#allocation2 + $0x8c8] sm:$0xff] }
 0x455   : > { %5626 = vrot.lane.b32.xlu0 %v5625_v31, %s5885_s16  ;;  %v2274_v31 = vld [vmem:[#allocation2 + $0x8e0] sm:$0xff] }
 0x457   : > { %1956 = vrot.lane.b32.xlu1 %v1942_v27, %s5885_s16 }
 0x459   : > { %1968 = vrot.lane.b32.xlu0 %v6961_v28, %s5885_s16 }
 0x45b   : > { %1966 = vrot.lane.b32.xlu1 %v1947_v54, %s5885_s16 }
 0x4c5   : > { %v6969_v63 = vpop.permute.xlu1 %5631 }
 0x4c6   : > { %v5634_v10 = vunpack.i.h.bf16 %v6969_v63  ;;  %v5633_v20 = vunpack.i.l.bf16 %v6969_v63  ;;  %v2081_v63 = vld [vmem:[#allocation2 + $0x2d8] sm:$0xff] }
 0x4c7   : > { %v5627_v39 = vpop.permute.xlu0 %5626 }
 0x4c8   : > { %v5629_v32 = vunpack.i.h.bf16 %v5627_v39  ;;  %v5628_v55 = vunpack.i.l.bf16 %v5627_v39  ;;  %v1973_v41 = vsel %vm707_vm6, %v5633_v20, %v5634_v10  ;;  %v2267_v39 = vld [vmem:[#allocation2 + $0x8a8] sm:$0xff] }
 0x4c9   : > { %v1957_v36 = vpop.permute.xlu1 %1956  ;;  %v6976_v15 = vmax.f32 %v1945_v30, %v1973_v41  ;;  %v2279_v30 = vld [vmem:[#allocation2 + $0x908] sm:$0xff]  ;;  %v2041_v41 = vld [vmem:[#allocation2 + $0x198] sm:$0xff] }
 0x4ca   : > { %v1972_v16 = vsel %vm707_vm6, %v5628_v55, %v5633_v20  ;;  %v1970_v56 = vsel %vm707_vm6, %v1957_v36, %v5629_v32  ;;  %v1971_v44 = vsel %vm707_vm6, %v5629_v32, %v5628_v55  ;;  %v2045_v20 = vld [vmem:[#allocation2 + $0x1b8] sm:$0xff]  ;;  %v2044_v32 = vld [vmem:[#allocation2 + $0x1b0] sm:$0xff]  ;;  %v2266_v55 = vld [vmem:[#allocation2 + $0x8a0] sm:$0xff] }
 0x4cb   : > { %v6981_v18 = vmax.f32 %v1942_v27, %v1970_v56  ;;  %2544 = vmatprep.mubr.f32.mxu1 %v6976_v15  ;;  %v6984_v25 = vmax.f32 %v1943_v14, %v1971_v44  ;;  %v6986_v42 = vmax.f32 %v1944_v46, %v1972_v16  ;;  %v1969_v9 = vpop.permute.xlu0 %1968  ;;  %v2278_v46 = vld [vmem:[#allocation2 + $0x900] sm:$0xff]  ;;  %v2049_v27 = vld [vmem:[#allocation2 + $0x1d8] sm:$0xff]  ;;  %v2263_v36 = vld [vmem:[#allocation2 + $0x888] sm:$0xff] }
 0x4cc   : > { %v6999_v14 = vmax.f32 %v6961_v28, %v1969_v9  ;;  %v2270_v28 = vld [vmem:[#allocation2 + $0x8c0] sm:$0xff]  ;;  %v2040_v16 = vld [vmem:[#allocation2 + $0x190] sm:$0xff]  ;;  %v2037_v44 = vld [vmem:[#allocation2 + $0x178] sm:$0xff] }
 0x4cd   : > { %2473 = vmatprep.mubr.f32.mxu0 %v6984_v25  ;;  %v6989_v58 = vpop.permute.xlu1 %1966  ;;  %2545 = vmatmul.mubr.f32.vlgmr.msra.gmra.mxu1 %v6986_v42  ;;  %v2262_v56 = vld [vmem:[#allocation2 + $0x880] sm:$0xff] }
 0x4ce   : > { %v1975_v5 = vsel %vm707_vm6, %v6989_v58, %v1969_v9  ;;  %2639 = vmatpush1.msra.mxu1 %v2402_v26  ;;  %2474 = vmatmul.mubr.f32.vlgmr.msra.gmra.mxu0 %v6981_v18  ;;  %v2036_v26 = vld [vmem:[#allocation2 + $0x170] sm:$0xff]  ;;  %v2255_v9 = vld [vmem:[#allocation2 + $0x848] sm:$0xff] }
 0x4cf   : > { %2552 = vmatpush1.msra.mxu0 %v2306_v7  ;;  %2640 = vmatprep.subr.mxu1 %v2399_v52  ;;  %v6995_v21 = vmax.f32 %v1947_v54, %v1975_v5  ;;  %v2048_v54 = vld [vmem:[#allocation2 + $0x1d0] sm:$0xff]  ;;  %v2258_v7 = vld [vmem:[#allocation2 + $0x860] sm:$0xff]  ;;  %v2033_v52 = vld [vmem:[#allocation2 + $0x158] sm:$0xff] }
 0x4d0   : > { %2553 = vmatprep.subr.mxu0 %v2303_v38  ;;  %2641 = vmatpush1.msra.mxu1 %v2398_v22  ;;  %v2032_v38 = vld [vmem:[#allocation2 + $0x150] sm:$0xff]  ;;  %v2254_v22 = vld [vmem:[#allocation2 + $0x840] sm:$0xff]  ;;  %v2029_v5 = vld [vmem:[#allocation2 + $0x138] sm:$0xff] }
 0x4d1   : > { %2554 = vmatpush1.msra.mxu0 %v2302_v59  ;;  %2642 = vmatprep.subr.mxu1 %v2395_v62  ;;  %v2251_v59 = vld [vmem:[#allocation2 + $0x828] sm:$0xff]  ;;  %v2028_v62 = vld [vmem:[#allocation2 + $0x130] sm:$0xff] }
 0x4d2   : > { %2555 = vmatprep.subr.mxu0 %v2299_v24  ;;  %2615 = vmatprep.mubr.f32.mxu0 %v6995_v21  ;;  %v2250_v24 = vld [vmem:[#allocation2 + $0x820] sm:$0xff] }
 0x4d3   : > { %2643 = vmatpush1.msra.mxu1 %v2394_v13  ;;  %2556 = vmatpush1.msra.mxu0 %v2298_v37  ;;  %v2025_v13 = vld [vmem:[#allocation2 + $0x118] sm:$0xff]  ;;  %v2247_v37 = vld [vmem:[#allocation2 + $0x808] sm:$0xff] }
 0x4d4   : > { %2644 = vmatprep.subr.mxu1 %v2391_v47  ;;  %2557 = vmatprep.subr.mxu0 %v2295_v40  ;;  %v2024_v47 = vld [vmem:[#allocation2 + $0x110] sm:$0xff]  ;;  %v2246_v40 = vld [vmem:[#allocation2 + $0x800] sm:$0xff] }
 0x4d5   : > { %2645 = vmatpush1.msra.mxu1 %v2390_v17  ;;  %2558 = vmatpush1.msra.mxu0 %v2294_v49  ;;  %v2021_v17 = vld [vmem:[#allocation2 + $0xf8] sm:$0xff]  ;;  %v2371_v49 = vld [vmem:[#allocation2 + $0xbe8] sm:$0xff] }
 0x4d6   : > { %2646 = vmatprep.subr.mxu1 %v2387_v23  ;;  %2559 = vmatprep.subr.mxu0 %v2291_v4  ;;  %v2020_v23 = vld [vmem:[#allocation2 + $0xf0] sm:$0xff]  ;;  %v2370_v4 = vld [vmem:[#allocation2 + $0xbe0] sm:$0xff] }
 0x4d7   : > { %2647 = vmatpush1.msra.mxu1 %v2386_v33  ;;  %2560 = vmatpush1.msra.mxu0 %v2290_v12  ;;  %v2017_v33 = vld [vmem:[#allocation2 + $0xd8] sm:$0xff]  ;;  %v2367_v12 = vld [vmem:[#allocation2 + $0xbc8] sm:$0xff] }
 0x4d8   : > { %2648 = vmatprep.subr.mxu1 %v2383_v35  ;;  %2561 = vmatprep.subr.mxu0 %v2287_v48  ;;  %v2016_v35 = vld [vmem:[#allocation2 + $0xd0] sm:$0xff]  ;;  %v2366_v48 = vld [vmem:[#allocation2 + $0xbc0] sm:$0xff] }
 0x4d9   : > { %2649 = vmatpush1.msra.mxu1 %v2382_v11  ;;  %2562 = vmatpush1.msra.mxu0 %v2286_v57  ;;  %v2013_v11 = vld [vmem:[#allocation2 + $0xb8] sm:$0xff]  ;;  %v2363_v57 = vld [vmem:[#allocation2 + $0xba8] sm:$0xff] }
 0x4da   : > { %2650 = vmatprep.subr.mxu1 %v2379_v53  ;;  %2563 = vmatprep.subr.mxu0 %v2283_v61  ;;  %v2012_v53 = vld [vmem:[#allocation2 + $0xb0] sm:$0xff]  ;;  %v2362_v61 = vld [vmem:[#allocation2 + $0xba0] sm:$0xff] }
 0x4db   : > { %2651 = vmatpush1.msra.mxu1 %v2378_v19  ;;  %2564 = vmatpush1.msra.mxu0 %v2282_v29  ;;  %v2009_v19 = vld [vmem:[#allocation2 + $0x98] sm:$0xff]  ;;  %v2359_v29 = vld [vmem:[#allocation2 + $0xb88] sm:$0xff] }
 0x4dc   : > { %2652 = vmatprep.subr.mxu1 %v2375_v50  ;;  %2565 = vmatprep.subr.mxu0 %v2279_v30  ;;  %v2008_v50 = vld [vmem:[#allocation2 + $0x90] sm:$0xff]  ;;  %v2358_v30 = vld [vmem:[#allocation2 + $0xb80] sm:$0xff] }
 0x4dd   : > { %2653 = vmatpush1.msra.mxu1 %v2374_v60  ;;  %2686 = vmatprep.mubr.f32.mxu1 %v5890_v45  ;;  %v2005_v60 = vld [vmem:[#allocation2 + $0x78] sm:$0xff] }
 0x4de   : > { %2566 = vmatpush1.msra.mxu0 %v2278_v46  ;;  %5327 = vmatmul.mubr.msk.f32.vlgmr.msra.gmra.mxu1 %vm602_vm0, %v6999_v14  ;;  %v2355_v46 = vld [vmem:[#allocation2 + $0xb68] sm:$0xff] }
 0x4df   : > { %2693 = vmatprep.subr.mxu1 %v2053_v34  ;;  %2567 = vmatprep.subr.mxu0 %v2275_v8  ;;  %v2004_v34 = vld [vmem:[#allocation2 + $0x70] sm:$0xff]  ;;  %v2354_v8 = vld [vmem:[#allocation2 + $0xb60] sm:$0xff] }
 0x4e0   : > { %2694 = vmatpush1.msra.mxu1 %v2052_v43  ;;  %2757 = vmatprep.mubr.f32.mxu1 %v6984_v25  ;;  %v2259_v25 = vld [vmem:[#allocation2 + $0x868] sm:$0xff]  ;;  %v2001_v43 = vld [vmem:[#allocation2 + $0x58] sm:$0xff] }
 0x4e1   : > { %2568 = vmatpush1.msra.mxu0 %v2274_v31  ;;  %2695 = vmatprep.subr.mxu1 %v2049_v27  ;;  %v2351_v31 = vld [vmem:[#allocation2 + $0xb48] sm:$0xff]  ;;  %v2000_v27 = vld [vmem:[#allocation2 + $0x50] sm:$0xff] }
 0x4e2   : > { %2569 = vmatprep.subr.mxu0 %v2271_v6  ;;  %2696 = vmatpush1.msra.mxu1 %v2048_v54  ;;  %v2350_v6 = vld [vmem:[#allocation2 + $0xb40] sm:$0xff]  ;;  %v1997_v54 = vld [vmem:[#allocation2 + $0x38] sm:$0xff] }
 0x4e3   : > { %2570 = vmatpush1.msra.mxu0 %v2270_v28  ;;  %2697 = vmatprep.subr.mxu1 %v2045_v20  ;;  %v2347_v28 = vld [vmem:[#allocation2 + $0xb28] sm:$0xff]  ;;  %v1996_v20 = vld [vmem:[#allocation2 + $0x30] sm:$0xff] }
 0x4e4   : > { %2571 = vmatprep.subr.mxu0 %v2267_v39  ;;  %2698 = vmatpush1.msra.mxu1 %v2044_v32  ;;  %v2346_v39 = vld [vmem:[#allocation2 + $0xb20] sm:$0xff]  ;;  %v1993_v32 = vld [vmem:[#allocation2 + $0x18] sm:$0xff] }
 0x4e5   : > { %2572 = vmatpush1.msra.mxu0 %v2266_v55  ;;  %2699 = vmatprep.subr.mxu1 %v2041_v41  ;;  %v2343_v55 = vld [vmem:[#allocation2 + $0xb08] sm:$0xff]  ;;  %v1992_v41 = vld [vmem:[#allocation2 + $0x10] sm:$0xff] }
 0x4e6   : > { %2573 = vmatprep.subr.mxu0 %v2263_v36  ;;  %2700 = vmatpush1.msra.mxu1 %v2040_v16  ;;  %v2342_v36 = vld [vmem:[#allocation2 + $0xb00] sm:$0xff]  ;;  %v2117_v16 = vld [vmem:[#allocation2 + $0x3f8] sm:$0xff] }
 0x4e7   : > { %2574 = vmatpush1.msra.mxu0 %v2262_v56  ;;  %2701 = vmatprep.subr.mxu1 %v2037_v44  ;;  %v2339_v56 = vld [vmem:[#allocation2 + $0xae8] sm:$0xff]  ;;  %v2116_v44 = vld [vmem:[#allocation2 + $0x3f0] sm:$0xff] }
 0x4e8   : > { %2575 = vmatprep.subr.mxu0 %v2259_v25  ;;  %2702 = vmatpush1.msra.mxu1 %v2036_v26  ;;  %v2338_v25 = vld [vmem:[#allocation2 + $0xae0] sm:$0xff]  ;;  %v2113_v26 = vld [vmem:[#allocation2 + $0x3d8] sm:$0xff] }
 0x4e9   : > { %2576 = vmatpush1.msra.mxu0 %v2258_v7  ;;  %2703 = vmatprep.subr.mxu1 %v2033_v52  ;;  %v2335_v7 = vld [vmem:[#allocation2 + $0xac8] sm:$0xff]  ;;  %v2112_v52 = vld [vmem:[#allocation2 + $0x3d0] sm:$0xff] }
 0x4ea   : > { %2577 = vmatprep.subr.mxu0 %v2255_v9  ;;  %2704 = vmatpush1.msra.mxu1 %v2032_v38  ;;  %v2334_v9 = vld [vmem:[#allocation2 + $0xac0] sm:$0xff]  ;;  %v2109_v38 = vld [vmem:[#allocation2 + $0x3b8] sm:$0xff] }
 0x4eb   : > { %2578 = vmatpush1.msra.mxu0 %v2254_v22  ;;  %2705 = vmatprep.subr.mxu1 %v2029_v5  ;;  %v2331_v22 = vld [vmem:[#allocation2 + $0xaa8] sm:$0xff]  ;;  %v2108_v5 = vld [vmem:[#allocation2 + $0x3b0] sm:$0xff] }
 0x4ec   : > { %2579 = vmatprep.subr.mxu0 %v2251_v59  ;;  %2706 = vmatpush1.msra.mxu1 %v2028_v62  ;;  %v2330_v59 = vld [vmem:[#allocation2 + $0xaa0] sm:$0xff]  ;;  %v2105_v62 = vld [vmem:[#allocation2 + $0x398] sm:$0xff] }
 0x4ed   : > { %2580 = vmatpush1.msra.mxu0 %v2250_v24  ;;  %2707 = vmatprep.subr.mxu1 %v2025_v13  ;;  %v2327_v24 = vld [vmem:[#allocation2 + $0xa88] sm:$0xff]  ;;  %v2104_v13 = vld [vmem:[#allocation2 + $0x390] sm:$0xff] }
 0x4ee   : > { %2581 = vmatprep.subr.mxu0 %v2247_v37  ;;  %2708 = vmatpush1.msra.mxu1 %v2024_v47  ;;  %v2326_v37 = vld [vmem:[#allocation2 + $0xa80] sm:$0xff]  ;;  %v2101_v47 = vld [vmem:[#allocation2 + $0x378] sm:$0xff] }
 0x4ef   : > { %2582 = vmatpush1.msra.mxu0 %v2246_v40  ;;  %2709 = vmatprep.subr.mxu1 %v2021_v17  ;;  %v2323_v40 = vld [vmem:[#allocation2 + $0xa68] sm:$0xff]  ;;  %v2100_v17 = vld [vmem:[#allocation2 + $0x370] sm:$0xff] }
 0x4f0   : > { %2583 = vmatprep.subr.mxu0 %v2371_v49  ;;  %2710 = vmatpush1.msra.mxu1 %v2020_v23  ;;  %v2322_v49 = vld [vmem:[#allocation2 + $0xa60] sm:$0xff]  ;;  %v2097_v23 = vld [vmem:[#allocation2 + $0x358] sm:$0xff] }
 0x4f1   : > { %2584 = vmatpush2.msra.mxu0 %v2370_v4  ;;  %2711 = vmatprep.subr.mxu1 %v2017_v33  ;;  %v2319_v4 = vld [vmem:[#allocation2 + $0xa48] sm:$0xff]  ;;  %v2096_v33 = vld [vmem:[#allocation2 + $0x350] sm:$0xff] }
 0x4f2   : > { %2585 = vmatprep.subr.mxu0 %v2367_v12  ;;  %2712 = vmatpush1.msra.mxu1 %v2016_v35  ;;  %v2318_v12 = vld [vmem:[#allocation2 + $0xa40] sm:$0xff]  ;;  %v2093_v35 = vld [vmem:[#allocation2 + $0x338] sm:$0xff] }
 0x4f3   : > { %2586 = vmatpush2.msra.mxu0 %v2366_v48  ;;  %2713 = vmatprep.subr.mxu1 %v2013_v11  ;;  %v2315_v48 = vld [vmem:[#allocation2 + $0xa28] sm:$0xff]  ;;  %v2092_v11 = vld [vmem:[#allocation2 + $0x330] sm:$0xff] }
 0x4f4   : > { %2587 = vmatprep.subr.mxu0 %v2363_v57  ;;  %2714 = vmatpush1.msra.mxu1 %v2012_v53  ;;  %v2314_v57 = vld [vmem:[#allocation2 + $0xa20] sm:$0xff]  ;;  %v2089_v53 = vld [vmem:[#allocation2 + $0x318] sm:$0xff] }
 0x4f5   : > { %2588 = vmatpush2.msra.mxu0 %v2362_v61  ;;  %2715 = vmatprep.subr.mxu1 %v2009_v19  ;;  %v1974_v61 = vsel %vm707_vm6, %v5634_v10, %v6989_v58  ;;  %v2311_v19 = vld [vmem:[#allocation2 + $0xa08] sm:$0xff]  ;;  %v2180_v10 = vld [vmem:[#allocation2 + $0x5f0] sm:$0xff] }
 0x4f6   : > { %2589 = vmatprep.subr.mxu0 %v2359_v29  ;;  %2716 = vmatpush1.msra.mxu1 %v2008_v50  ;;  %v2088_v29 = vld [vmem:[#allocation2 + $0x310] sm:$0xff]  ;;  %v2310_v50 = vld [vmem:[#allocation2 + $0xa00] sm:$0xff] }
 0x4f7   : > { %2590 = vmatpush2.msra.mxu0 %v2358_v30  ;;  %2717 = vmatprep.subr.mxu1 %v2005_v60  ;;  %v2085_v30 = vld [vmem:[#allocation2 + $0x2f8] sm:$0xff]  ;;  %v2084_v60 = vld [vmem:[#allocation2 + $0x2f0] sm:$0xff] }
 0x4f8   : > { %2591 = vmatprep.subr.mxu0 %v2355_v46  ;;  %2718 = vmatpush1.msra.mxu1 %v2004_v34  ;;  %v7010_v46 = vmax.f32 %v6946_v51, %v1974_v61  ;;  %v2181_v34 = vld [vmem:[#allocation2 + $0x5f8] sm:$0xff]  ;;  %v2080_v58 = vld [vmem:[#allocation2 + $0x2d0] sm:$0xff] }
 0x4f9   : > { %2592 = vmatpush2.msra.mxu0 %v2354_v8  ;;  %2719 = vmatprep.subr.mxu1 %v2001_v43  ;;  %v2177_v8 = vld [vmem:[#allocation2 + $0x5d8] sm:$0xff]  ;;  %v2076_v51 = vld [vmem:[#allocation2 + $0x2b0] sm:$0xff] }
 0x4fa   : > { %2593 = vmatprep.subr.mxu0 %v2351_v31  ;;  %2720 = vmatpush1.msra.mxu1 %v2000_v27  ;;  %v2077_v43 = vld [vmem:[#allocation2 + $0x2b8] sm:$0xff]  ;;  %v2176_v31 = vld [vmem:[#allocation2 + $0x5d0] sm:$0xff] }
 0x4fb   : > { %2594 = vmatpush2.msra.mxu0 %v2350_v6  ;;  %2721 = vmatprep.subr.mxu1 %v1997_v54  ;;  %v2173_v27 = vld [vmem:[#allocation2 + $0x5b8] sm:$0xff]  ;;  %v2172_v54 = vld [vmem:[#allocation2 + $0x5b0] sm:$0xff] }
 0x4fc   : > { %2595 = vmatprep.subr.mxu0 %v2347_v28  ;;  %2722 = vmatpush1.msra.mxu1 %v1996_v20  ;;  %v2073_v6 = vld [vmem:[#allocation2 + $0x298] sm:$0xff]  ;;  %v2072_v28 = vld [vmem:[#allocation2 + $0x290] sm:$0xff] }
 0x4fd   : > { %2596 = vmatpush2.msra.mxu0 %v2346_v39  ;;  %2723 = vmatprep.subr.mxu1 %v1993_v32  ;;  %v2169_v20 = vld [vmem:[#allocation2 + $0x598] sm:$0xff]  ;;  %v2168_v32 = vld [vmem:[#allocation2 + $0x590] sm:$0xff] }
 0x4fe   : > { %2597 = vmatprep.subr.mxu0 %v2343_v55  ;;  %2724 = vmatpush1.msra.mxu1 %v1992_v41  ;;  %v2069_v39 = vld [vmem:[#allocation2 + $0x278] sm:$0xff]  ;;  %v2068_v55 = vld [vmem:[#allocation2 + $0x270] sm:$0xff] }
 0x4ff   : > { %2598 = vmatpush2.msra.mxu0 %v2342_v36  ;;  %2725 = vmatprep.subr.mxu1 %v2117_v16  ;;  %v2165_v41 = vld [vmem:[#allocation2 + $0x578] sm:$0xff]  ;;  %v2164_v36 = vld [vmem:[#allocation2 + $0x570] sm:$0xff] }
 0x500   : > { %2599 = vmatprep.subr.mxu0 %v2339_v56  ;;  %2726 = vmatpush2.msra.mxu1 %v2116_v44  ;;  %v2064_v16 = vld [vmem:[#allocation2 + $0x250] sm:$0xff]  ;;  %v2161_v56 = vld [vmem:[#allocation2 + $0x558] sm:$0xff] }
 0x501   : > { %2600 = vmatpush2.msra.mxu0 %v2338_v25  ;;  %2727 = vmatprep.subr.mxu1 %v2113_v26  ;;  %v2061_v44 = vld [vmem:[#allocation2 + $0x238] sm:$0xff]  ;;  %v2160_v25 = vld [vmem:[#allocation2 + $0x550] sm:$0xff] }
 0x502   : > { %2601 = vmatprep.subr.mxu0 %v2335_v7  ;;  %2728 = vmatpush2.msra.mxu1 %v2112_v52  ;;  %v2060_v26 = vld [vmem:[#allocation2 + $0x230] sm:$0xff]  ;;  %v2157_v7 = vld [vmem:[#allocation2 + $0x538] sm:$0xff] }
 0x503   : > { %2602 = vmatpush2.msra.mxu0 %v2334_v9  ;;  %2729 = vmatprep.subr.mxu1 %v2109_v38  ;;  %v2057_v52 = vld [vmem:[#allocation2 + $0x218] sm:$0xff]  ;;  %v2156_v9 = vld [vmem:[#allocation2 + $0x530] sm:$0xff] }
 0x504   : > { %2603 = vmatprep.subr.mxu0 %v2331_v22  ;;  %2730 = vmatpush2.msra.mxu1 %v2108_v5  ;;  %v2056_v38 = vld [vmem:[#allocation2 + $0x210] sm:$0xff]  ;;  %v2153_v22 = vld [vmem:[#allocation2 + $0x518] sm:$0xff] }
 0x505   : > { %2604 = vmatpush2.msra.mxu0 %v2330_v59  ;;  %2731 = vmatprep.subr.mxu1 %v2105_v62  ;;  %v2152_v5 = vld [vmem:[#allocation2 + $0x510] sm:$0xff]  ;;  %v2309_v59 = vld [vmem:[#allocation2 + $0x9f8] sm:$0xff] }
 0x506   : > { %2605 = vmatprep.subr.mxu0 %v2327_v24  ;;  %2732 = vmatpush2.msra.mxu1 %v2104_v13  ;;  %v2149_v62 = vld [vmem:[#allocation2 + $0x4f8] sm:$0xff]  ;;  %v2308_v24 = vld [vmem:[#allocation2 + $0x9f0] sm:$0xff] }
 0x507   : > { %2606 = vmatpush2.msra.mxu0 %v2326_v37  ;;  %2733 = vmatprep.subr.mxu1 %v2101_v47  ;;  %v2148_v13 = vld [vmem:[#allocation2 + $0x4f0] sm:$0xff]  ;;  %v2305_v37 = vld [vmem:[#allocation2 + $0x9d8] sm:$0xff] }
 0x508   : > { %2607 = vmatprep.subr.mxu0 %v2323_v40  ;;  %2734 = vmatpush2.msra.mxu1 %v2100_v17  ;;  %v2145_v47 = vld [vmem:[#allocation2 + $0x4d8] sm:$0xff]  ;;  %v2304_v40 = vld [vmem:[#allocation2 + $0x9d0] sm:$0xff] }
 0x509   : > { %2608 = vmatpush2.msra.mxu0 %v2322_v49  ;;  %2735 = vmatprep.subr.mxu1 %v2097_v23  ;;  %v2144_v17 = vld [vmem:[#allocation2 + $0x4d0] sm:$0xff]  ;;  %v2301_v49 = vld [vmem:[#allocation2 + $0x9b8] sm:$0xff] }
 0x50a   : > { %2609 = vmatprep.subr.mxu0 %v2319_v4  ;;  %2736 = vmatpush2.msra.mxu1 %v2096_v33  ;;  %v2141_v23 = vld [vmem:[#allocation2 + $0x4b8] sm:$0xff]  ;;  %v2300_v4 = vld [vmem:[#allocation2 + $0x9b0] sm:$0xff] }
 0x50b   : > { %2610 = vmatpush2.msra.mxu0 %v2318_v12  ;;  %2737 = vmatprep.subr.mxu1 %v2093_v35  ;;  %v2140_v33 = vld [vmem:[#allocation2 + $0x4b0] sm:$0xff]  ;;  %v2137_v12 = vld [vmem:[#allocation2 + $0x498] sm:$0xff] }
 0x50c   : > { %2611 = vmatprep.subr.mxu0 %v2315_v48  ;;  %2738 = vmatpush2.msra.mxu1 %v2092_v11  ;;  %v2296_v35 = vld [vmem:[#allocation2 + $0x990] sm:$0xff]  ;;  %v2293_v11 = vld [vmem:[#allocation2 + $0x978] sm:$0xff] }
 0x50d   : > { %2612 = vmatpush2.msra.mxu0 %v2314_v57  ;;  %2739 = vmatprep.subr.mxu1 %v2089_v53  ;;  %v2136_v48 = vld [vmem:[#allocation2 + $0x490] sm:$0xff]  ;;  %v2289_v61 = vld [vmem:[#allocation2 + $0x958] sm:$0xff] }
 0x50e   : > { %2613 = vmatprep.subr.mxu0 %v2311_v19  ;;  %2740 = vmatpush2.msra.mxu1 %v2088_v29  ;;  %v2292_v57 = vld [vmem:[#allocation2 + $0x970] sm:$0xff]  ;;  %v2129_v19 = vld [vmem:[#allocation2 + $0x458] sm:$0xff] }
 0x50f   : > { %2614 = vmatpush2.msra.mxu0 %v2310_v50  ;;  %2741 = vmatprep.subr.mxu1 %v2085_v30  ;;  %v2132_v53 = vld [vmem:[#allocation2 + $0x470] sm:$0xff]  ;;  %v2285_v30 = vld [vmem:[#allocation2 + $0x938] sm:$0xff] }
 0x510   : > { %2616 = vmatmul.mubr.f32.vlgmr.msra.gmra.mxu0 %v7010_v46  ;;  %2742 = vmatpush2.msra.mxu1 %v2084_v60  ;;  %v2288_v29 = vld [vmem:[#allocation2 + $0x950] sm:$0xff]  ;;  %v2125_v60 = vld [vmem:[#allocation2 + $0x438] sm:$0xff] }
 0x511   : > { %2764 = vmatprep.subr.mxu0 %v2181_v34  ;;  %2743 = vmatprep.subr.mxu1 %v2081_v63  ;;  %v2128_v50 = vld [vmem:[#allocation2 + $0x450] sm:$0xff] }
 0x512   : > { %2765 = vmatpush1.msra.mxu0 %v2180_v10  ;;  %2828 = vmatprep.mubr.f32.mxu0 %v6976_v15  ;;  %v2065_v15 = vld [vmem:[#allocation2 + $0x258] sm:$0xff]  ;;  %v2284_v34 = vld [vmem:[#allocation2 + $0x930] sm:$0xff] }
 0x513   : > { %2744 = vmatpush2.msra.mxu1 %v2080_v58  ;;  %2766 = vmatprep.subr.mxu0 %v2177_v8  ;;  %v2124_v63 = vld [vmem:[#allocation2 + $0x430] sm:$0xff]  ;;  %v2281_v10 = vld [vmem:[#allocation2 + $0x918] sm:$0xff] }
 0x514   : > { %2745 = vmatprep.subr.mxu1 %v2077_v43  ;;  %2767 = vmatpush1.msra.mxu0 %v2176_v31  ;;  %v2121_v58 = vld [vmem:[#allocation2 + $0x418] sm:$0xff]  ;;  %v2280_v8 = vld [vmem:[#allocation2 + $0x910] sm:$0xff] }
 0x515   : > { %2746 = vmatpush2.msra.mxu1 %v2076_v51  ;;  %2768 = vmatprep.subr.mxu0 %v2173_v27  ;;  %v2120_v43 = vld [vmem:[#allocation2 + $0x410] sm:$0xff]  ;;  %v2277_v31 = vld [vmem:[#allocation2 + $0x8f8] sm:$0xff] }
 0x516   : > { %2747 = vmatprep.subr.mxu1 %v2073_v6  ;;  %2769 = vmatpush1.msra.mxu0 %v2172_v54  ;;  %v2245_v51 = vld [vmem:[#allocation2 + $0x7f8] sm:$0xff]  ;;  %v2276_v27 = vld [vmem:[#allocation2 + $0x8f0] sm:$0xff] }
 0x517   : > { %2748 = vmatpush2.msra.mxu1 %v2072_v28  ;;  %2770 = vmatprep.subr.mxu0 %v2169_v20  ;;  %v2244_v6 = vld [vmem:[#allocation2 + $0x7f0] sm:$0xff]  ;;  %v2273_v54 = vld [vmem:[#allocation2 + $0x8d8] sm:$0xff] }
 0x518   : > { %2749 = vmatprep.subr.mxu1 %v2069_v39  ;;  %2771 = vmatpush1.msra.mxu0 %v2168_v32  ;;  %v2241_v28 = vld [vmem:[#allocation2 + $0x7d8] sm:$0xff]  ;;  %v2272_v20 = vld [vmem:[#allocation2 + $0x8d0] sm:$0xff] }
 0x519   : > { %2750 = vmatpush2.msra.mxu1 %v2068_v55  ;;  %2772 = vmatprep.subr.mxu0 %v2165_v41  ;;  %v2240_v39 = vld [vmem:[#allocation2 + $0x7d0] sm:$0xff]  ;;  %v2269_v32 = vld [vmem:[#allocation2 + $0x8b8] sm:$0xff] }
 0x51a   : > { %2751 = vmatprep.subr.mxu1 %v2065_v15  ;;  %2773 = vmatpush1.msra.mxu0 %v2164_v36  ;;  %v2237_v55 = vld [vmem:[#allocation2 + $0x7b8] sm:$0xff]  ;;  %v2268_v41 = vld [vmem:[#allocation2 + $0x8b0] sm:$0xff] }
 0x51b   : > { %2752 = vmatpush2.msra.mxu1 %v2064_v16  ;;  %2774 = vmatprep.subr.mxu0 %v2161_v56  ;;  %v2236_v15 = vld [vmem:[#allocation2 + $0x7b0] sm:$0xff]  ;;  %v2265_v36 = vld [vmem:[#allocation2 + $0x898] sm:$0xff] }
 0x51c   : > { %2753 = vmatprep.subr.mxu1 %v2061_v44  ;;  %2775 = vmatpush1.msra.mxu0 %v2160_v25  ;;  %v2233_v16 = vld [vmem:[#allocation2 + $0x798] sm:$0xff]  ;;  %v2264_v56 = vld [vmem:[#allocation2 + $0x890] sm:$0xff] }
 0x51d   : > { %2754 = vmatpush2.msra.mxu1 %v2060_v26  ;;  %2776 = vmatprep.subr.mxu0 %v2157_v7  ;;  %v2232_v44 = vld [vmem:[#allocation2 + $0x790] sm:$0xff]  ;;  %v2261_v25 = vld [vmem:[#allocation2 + $0x878] sm:$0xff] }
 0x51e   : > { %2755 = vmatprep.subr.mxu1 %v2057_v52  ;;  %2777 = vmatpush1.msra.mxu0 %v2156_v9  ;;  %v2229_v26 = vld [vmem:[#allocation2 + $0x778] sm:$0xff]  ;;  %v2260_v7 = vld [vmem:[#allocation2 + $0x870] sm:$0xff] }
 0x51f   : > { %2756 = vmatpush2.msra.mxu1 %v2056_v38  ;;  %2778 = vmatprep.subr.mxu0 %v2153_v22  ;;  %v2228_v52 = vld [vmem:[#allocation2 + $0x770] sm:$0xff]  ;;  %v2257_v9 = vld [vmem:[#allocation2 + $0x858] sm:$0xff] }
 0x520   : > { %2758 = vmatmul.mubr.f32.vlgmr.msra.gmra.mxu1 %v6981_v18  ;;  %2779 = vmatpush1.msra.mxu0 %v2152_v5  ;;  %v2297_v18 = vld [vmem:[#allocation2 + $0x998] sm:$0xff]  ;;  %v2256_v22 = vld [vmem:[#allocation2 + $0x850] sm:$0xff] }
 0x521   : > { %2835 = vmatprep.subr.mxu1 %v2309_v59  ;;  %2780 = vmatprep.subr.mxu0 %v2149_v62  ;;  %v2225_v38 = vld [vmem:[#allocation2 + $0x758] sm:$0xff]  ;;  %v2224_v5 = vld [vmem:[#allocation2 + $0x750] sm:$0xff] }
 0x522   : > { %2836 = vmatpush1.msra.mxu1 %v2308_v24  ;;  %2899 = vmatprep.mubr.f32.mxu1 %v6995_v21  ;;  %v2133_v21 = vld [vmem:[#allocation2 + $0x478] sm:$0xff]  ;;  %v2252_v24 = vld [vmem:[#allocation2 + $0x830] sm:$0xff] }
 0x523   : > { %2781 = vmatpush1.msra.mxu0 %v2148_v13  ;;  %2837 = vmatprep.subr.mxu1 %v2305_v37  ;;  %v2253_v59 = vld [vmem:[#allocation2 + $0x838] sm:$0xff]  ;;  %v2220_v13 = vld [vmem:[#allocation2 + $0x730] sm:$0xff] }
 0x524   : > { %2782 = vmatprep.subr.mxu0 %v2145_v47  ;;  %2838 = vmatpush1.msra.mxu1 %v2304_v40  ;;  %v2221_v62 = vld [vmem:[#allocation2 + $0x738] sm:$0xff]  ;;  %v2248_v40 = vld [vmem:[#allocation2 + $0x810] sm:$0xff] }
 0x525   : > { %2783 = vmatpush1.msra.mxu0 %v2144_v17  ;;  %2839 = vmatprep.subr.mxu1 %v2301_v49  ;;  %v2249_v37 = vld [vmem:[#allocation2 + $0x818] sm:$0xff]  ;;  %v2216_v17 = vld [vmem:[#allocation2 + $0x710] sm:$0xff] }
 0x526   : > { %2784 = vmatprep.subr.mxu0 %v2141_v23  ;;  %2840 = vmatpush1.msra.mxu1 %v2300_v4  ;;  %v2217_v47 = vld [vmem:[#allocation2 + $0x718] sm:$0xff]  ;;  %v2372_v4 = vld [vmem:[#allocation2 + $0xbf0] sm:$0xff] }
 0x527   : > { %2785 = vmatpush1.msra.mxu0 %v2140_v33  ;;  %2841 = vmatprep.subr.mxu1 %v2297_v18  ;;  %v2373_v49 = vld [vmem:[#allocation2 + $0xbf8] sm:$0xff]  ;;  %v2212_v33 = vld [vmem:[#allocation2 + $0x6f0] sm:$0xff] }
 0x528   : > { %2786 = vmatprep.subr.mxu0 %v2137_v12  ;;  %2842 = vmatpush1.msra.mxu1 %v2296_v35  ;;  %v2213_v23 = vld [vmem:[#allocation2 + $0x6f8] sm:$0xff]  ;;  %v2368_v35 = vld [vmem:[#allocation2 + $0xbd0] sm:$0xff] }
 0x529   : > { %2787 = vmatpush1.msra.mxu0 %v2136_v48  ;;  %2843 = vmatprep.subr.mxu1 %v2293_v11  ;;  %v2369_v18 = vld [vmem:[#allocation2 + $0xbd8] sm:$0xff]  ;;  %v2208_v48 = vld [vmem:[#allocation2 + $0x6d0] sm:$0xff] }
 0x52a   : > { %2788 = vmatprep.subr.mxu0 %v2133_v21  ;;  %2844 = vmatpush1.msra.mxu1 %v2292_v57  ;;  %v2209_v12 = vld [vmem:[#allocation2 + $0x6d8] sm:$0xff]  ;;  %v2364_v57 = vld [vmem:[#allocation2 + $0xbb0] sm:$0xff] }
 0x52b   : > { %2789 = vmatpush1.msra.mxu0 %v2132_v53  ;;  %2845 = vmatprep.subr.mxu1 %v2289_v61  ;;  %v2365_v11 = vld [vmem:[#allocation2 + $0xbb8] sm:$0xff]  ;;  %v2204_v53 = vld [vmem:[#allocation2 + $0x6b0] sm:$0xff] }
 0x52c   : > { %2790 = vmatprep.subr.mxu0 %v2129_v19  ;;  %2846 = vmatpush1.msra.mxu1 %v2288_v29  ;;  %v2205_v21 = vld [vmem:[#allocation2 + $0x6b8] sm:$0xff]  ;;  %v2360_v29 = vld [vmem:[#allocation2 + $0xb90] sm:$0xff] }
 0x52d   : > { %2791 = vmatpush1.msra.mxu0 %v2128_v50  ;;  %2847 = vmatprep.subr.mxu1 %v2285_v30  ;;  %v2361_v61 = vld [vmem:[#allocation2 + $0xb98] sm:$0xff]  ;;  %v2200_v50 = vld [vmem:[#allocation2 + $0x690] sm:$0xff] }
 0x52e   : > { %2792 = vmatprep.subr.mxu0 %v2125_v60  ;;  %2848 = vmatpush1.msra.mxu1 %v2284_v34  ;;  %v2201_v19 = vld [vmem:[#allocation2 + $0x698] sm:$0xff]  ;;  %v2356_v34 = vld [vmem:[#allocation2 + $0xb70] sm:$0xff] }
 0x52f   : > { %2793 = vmatpush1.msra.mxu0 %v2124_v63  ;;  %2849 = vmatprep.subr.mxu1 %v2281_v10  ;;  %v2357_v30 = vld [vmem:[#allocation2 + $0xb78] sm:$0xff]  ;;  %v2196_v63 = vld [vmem:[#allocation2 + $0x670] sm:$0xff] }
 0x530   : > { %2794 = vmatprep.subr.mxu0 %v2121_v58  ;;  %2850 = vmatpush1.msra.mxu1 %v2280_v8  ;;  %v2197_v60 = vld [vmem:[#allocation2 + $0x678] sm:$0xff]  ;;  %v2352_v8 = vld [vmem:[#allocation2 + $0xb50] sm:$0xff] }
 0x531   : > { %2795 = vmatpush1.msra.mxu0 %v2120_v43  ;;  %2851 = vmatprep.subr.mxu1 %v2277_v31  ;;  %v2353_v10 = vld [vmem:[#allocation2 + $0xb58] sm:$0xff]  ;;  %v2192_v43 = vld [vmem:[#allocation2 + $0x650] sm:$0xff] }
 0x532   : > { %2796 = vmatprep.subr.mxu0 %v2245_v51  ;;  %2852 = vmatpush1.msra.mxu1 %v2276_v27  ;;  %v2193_v58 = vld [vmem:[#allocation2 + $0x658] sm:$0xff]  ;;  %v2348_v27 = vld [vmem:[#allocation2 + $0xb30] sm:$0xff] }
 0x533   : > { %2797 = vmatpush2.msra.mxu0 %v2244_v6  ;;  %2853 = vmatprep.subr.mxu1 %v2273_v54  ;;  %v2349_v31 = vld [vmem:[#allocation2 + $0xb38] sm:$0xff]  ;;  %v2188_v6 = vld [vmem:[#allocation2 + $0x630] sm:$0xff] }
 0x534   : > { %2798 = vmatprep.subr.mxu0 %v2241_v28  ;;  %2854 = vmatpush1.msra.mxu1 %v2272_v20  ;;  %v2189_v51 = vld [vmem:[#allocation2 + $0x638] sm:$0xff]  ;;  %v2344_v20 = vld [vmem:[#allocation2 + $0xb10] sm:$0xff] }
 0x535   : > { %2799 = vmatpush2.msra.mxu0 %v2240_v39  ;;  %2855 = vmatprep.subr.mxu1 %v2269_v32  ;;  %v2345_v54 = vld [vmem:[#allocation2 + $0xb18] sm:$0xff]  ;;  %v2184_v39 = vld [vmem:[#allocation2 + $0x610] sm:$0xff] }
 0x536   : > { %2800 = vmatprep.subr.mxu0 %v2237_v55  ;;  %2856 = vmatpush1.msra.mxu1 %v2268_v41  ;;  %v2185_v28 = vld [vmem:[#allocation2 + $0x618] sm:$0xff]  ;;  %v2340_v55 = vld [vmem:[#allocation2 + $0xaf0] sm:$0xff] }
 0x537   : > { %2801 = vmatpush2.msra.mxu0 %v2236_v15  ;;  %2857 = vmatprep.subr.mxu1 %v2265_v36  ;;  %v2341_v32 = vld [vmem:[#allocation2 + $0xaf8] sm:$0xff]  ;;  %v2404_v36 = vld [vmem:[#allocation2 + $0xcf0] sm:$0xff] }
 0x538   : > { %2802 = vmatprep.subr.mxu0 %v2233_v16  ;;  %2858 = vmatpush1.msra.mxu1 %v2264_v56  ;;  %v2405_v41 = vld [vmem:[#allocation2 + $0xcf8] sm:$0xff]  ;;  %v2336_v16 = vld [vmem:[#allocation2 + $0xad0] sm:$0xff] }
 0x539   : > { %2803 = vmatpush2.msra.mxu0 %v2232_v44  ;;  %2859 = vmatprep.subr.mxu1 %v2261_v25  ;;  %v2337_v15 = vld [vmem:[#allocation2 + $0xad8] sm:$0xff]  ;;  %v2400_v25 = vld [vmem:[#allocation2 + $0xcd0] sm:$0xff] }
 0x53a   : > { %2804 = vmatprep.subr.mxu0 %v2229_v26  ;;  %2860 = vmatpush1.msra.mxu1 %v2260_v7  ;;  %v2401_v56 = vld [vmem:[#allocation2 + $0xcd8] sm:$0xff]  ;;  %v2332_v26 = vld [vmem:[#allocation2 + $0xab0] sm:$0xff] }
 0x53b   : > { %2805 = vmatpush2.msra.mxu0 %v2228_v52  ;;  %2861 = vmatprep.subr.mxu1 %v2257_v9  ;;  %v2333_v44 = vld [vmem:[#allocation2 + $0xab8] sm:$0xff]  ;;  %v2396_v9 = vld [vmem:[#allocation2 + $0xcb0] sm:$0xff] }
 0x53c   : > { %2806 = vmatprep.subr.mxu0 %v2225_v38  ;;  %2862 = vmatpush1.msra.mxu1 %v2256_v22  ;;  %v2397_v7 = vld [vmem:[#allocation2 + $0xcb8] sm:$0xff]  ;;  %v2328_v38 = vld [vmem:[#allocation2 + $0xa90] sm:$0xff] }
 0x53d   : > { %2807 = vmatpush2.msra.mxu0 %v2224_v5  ;;  %2863 = vmatprep.subr.mxu1 %v2253_v59  ;;  %v2329_v52 = vld [vmem:[#allocation2 + $0xa98] sm:$0xff]  ;;  %v2324_v59 = vld [vmem:[#allocation2 + $0xa70] sm:$0xff] }
 0x53e   : > { %2808 = vmatprep.subr.mxu0 %v2221_v62  ;;  %2864 = vmatpush1.msra.mxu1 %v2252_v24  ;;  %v2393_v22 = vld [vmem:[#allocation2 + $0xc98] sm:$0xff] }
 0x53f   : > { %2809 = vmatpush2.msra.mxu0 %v2220_v13  ;;  %2865 = vmatprep.subr.mxu1 %v2249_v37  ;;  %v2325_v5 = vld [vmem:[#allocation2 + $0xa78] sm:$0xff]  ;;  %v2388_v13 = vld [vmem:[#allocation2 + $0xc70] sm:$0xff] }
 0x540   : > { %2810 = vmatprep.subr.mxu0 %v2217_v47  ;;  %2866 = vmatpush1.msra.mxu1 %v2248_v40  ;;  %v2389_v62 = vld [vmem:[#allocation2 + $0xc78] sm:$0xff]  ;;  %v2320_v37 = vld [vmem:[#allocation2 + $0xa50] sm:$0xff] }
 0x541   : > { %2811 = vmatpush2.msra.mxu0 %v2216_v17  ;;  %2867 = vmatprep.subr.mxu1 %v2373_v49  ;;  %v2321_v24 = vld [vmem:[#allocation2 + $0xa58] sm:$0xff]  ;;  %v2384_v17 = vld [vmem:[#allocation2 + $0xc50] sm:$0xff] }
 0x542   : > { %2812 = vmatprep.subr.mxu0 %v2213_v23  ;;  %2868 = vmatpush2.msra.mxu1 %v2372_v4  ;;  %v2385_v47 = vld [vmem:[#allocation2 + $0xc58] sm:$0xff]  ;;  %v2316_v49 = vld [vmem:[#allocation2 + $0xa30] sm:$0xff] }
 0x543   : > { %2813 = vmatpush2.msra.mxu0 %v2212_v33  ;;  %2869 = vmatprep.subr.mxu1 %v2369_v18  ;;  %v2317_v40 = vld [vmem:[#allocation2 + $0xa38] sm:$0xff]  ;;  %v2380_v33 = vld [vmem:[#allocation2 + $0xc30] sm:$0xff] }
 0x544   : > { %2814 = vmatprep.subr.mxu0 %v2209_v12  ;;  %2870 = vmatpush2.msra.mxu1 %v2368_v35  ;;  %v2381_v23 = vld [vmem:[#allocation2 + $0xc38] sm:$0xff]  ;;  %v2312_v18 = vld [vmem:[#allocation2 + $0xa10] sm:$0xff] }
 0x545   : > { %2815 = vmatpush2.msra.mxu0 %v2208_v48  ;;  %2871 = vmatprep.subr.mxu1 %v2365_v11  ;;  %v2313_v4 = vld [vmem:[#allocation2 + $0xa18] sm:$0xff]  ;;  %v2376_v35 = vld [vmem:[#allocation2 + $0xc10] sm:$0xff] }
 0x546   : > { %2816 = vmatprep.subr.mxu0 %v2205_v21  ;;  %2872 = vmatpush2.msra.mxu1 %v2364_v57  ;;  %v2377_v12 = vld [vmem:[#allocation2 + $0xc18] sm:$0xff] }
 0x547   : > { %2817 = vmatpush2.msra.mxu0 %v2204_v53  ;;  %2873 = vmatprep.subr.mxu1 %v2361_v61 }
 0x548   : > { %2818 = vmatprep.subr.mxu0 %v2201_v19  ;;  %2874 = vmatpush2.msra.mxu1 %v2360_v29 }
 0x549   : > { %2819 = vmatpush2.msra.mxu0 %v2200_v50  ;;  %2875 = vmatprep.subr.mxu1 %v2357_v30 }
 0x54a   : > { %2820 = vmatprep.subr.mxu0 %v2197_v60  ;;  %2876 = vmatpush2.msra.mxu1 %v2356_v34 }
 0x54b   : > { %2821 = vmatpush2.msra.mxu0 %v2196_v63  ;;  %2877 = vmatprep.subr.mxu1 %v2353_v10 }
 0x54c   : > { %2822 = vmatprep.subr.mxu0 %v2193_v58  ;;  %2878 = vmatpush2.msra.mxu1 %v2352_v8 }
 0x54d   : > { %2823 = vmatpush2.msra.mxu0 %v2192_v43  ;;  %2879 = vmatprep.subr.mxu1 %v2349_v31 }
 0x54e   : > { %2824 = vmatprep.subr.mxu0 %v2189_v51  ;;  %2880 = vmatpush2.msra.mxu1 %v2348_v27 }
 0x54f   : > { %2825 = vmatpush2.msra.mxu0 %v2188_v6  ;;  %2881 = vmatprep.subr.mxu1 %v2345_v54 }
 0x550   : > { %2826 = vmatprep.subr.mxu0 %v2185_v28  ;;  %2882 = vmatpush2.msra.mxu1 %v2344_v20 }
 0x551   : > { %2827 = vmatpush2.msra.mxu0 %v2184_v39  ;;  %2883 = vmatprep.subr.mxu1 %v2341_v32 }
 0x552   : > { %2829 = vmatmul.mubr.f32.vlgmr.msra.gmra.mxu0 %v6986_v42  ;;  %2884 = vmatpush2.msra.mxu1 %v2340_v55  ;;  %v2392_v42 = vld [vmem:[#allocation2 + $0xc90] sm:$0xff] }
 0x553   : > { %2922 = vmatprep.subr.mxu0 %v2405_v41  ;;  %2885 = vmatprep.subr.mxu1 %v2337_v15 }
 0x554   : > { %2923 = vmatpush1.msra.mxu0 %v2404_v36  ;;  %2886 = vmatpush2.msra.mxu1 %v2336_v16 }
 0x555   : > { %2924 = vmatprep.subr.mxu0 %v2401_v56  ;;  %2887 = vmatprep.subr.mxu1 %v2333_v44 }
 0x556   : > { %2925 = vmatpush1.msra.mxu0 %v2400_v25  ;;  %2888 = vmatpush2.msra.mxu1 %v2332_v26 }
 0x557   : > { %2926 = vmatprep.subr.mxu0 %v2397_v7  ;;  %2889 = vmatprep.subr.mxu1 %v2329_v52 }
 0x558   : > { %2927 = vmatpush1.msra.mxu0 %v2396_v9  ;;  %2890 = vmatpush2.msra.mxu1 %v2328_v38 }
 0x559   : > { %2928 = vmatprep.subr.mxu0 %v2393_v22  ;;  %2891 = vmatprep.subr.mxu1 %v2325_v5  ;;  %v2980_v22 = vld [vmem:[%s7917_s7 + $0x8] sm:$0xff]  ;;  %v2979_v5 = vld [vmem:[%s7917_s7] sm:$0xff] }
 0x55a   : > { %2929 = vmatpush1.msra.mxu0 %v2392_v42  ;;  %2892 = vmatpush2.msra.mxu1 %v2324_v59 }
 0x55b   : > { %2930 = vmatprep.subr.mxu0 %v2389_v62  ;;  %2893 = vmatprep.subr.mxu1 %v2321_v24 }
 0x55c   : > { %2931 = vmatpush1.msra.mxu0 %v2388_v13  ;;  %2894 = vmatpush2.msra.mxu1 %v2320_v37 }
 0x55d   : > { %2932 = vmatprep.subr.mxu0 %v2385_v47  ;;  %2895 = vmatprep.subr.mxu1 %v2317_v40 }
 0x55e   : > { %2933 = vmatpush1.msra.mxu0 %v2384_v17  ;;  %2896 = vmatpush2.msra.mxu1 %v2316_v49 }
 0x55f   : > { %2934 = vmatprep.subr.mxu0 %v2381_v23  ;;  %2897 = vmatprep.subr.mxu1 %v2313_v4 }
 0x560   : > { %2935 = vmatpush1.msra.mxu0 %v2380_v33  ;;  %2898 = vmatpush2.msra.mxu1 %v2312_v18 }
 0x561   : > { %2936 = vmatprep.subr.mxu0 %v2377_v12  ;;  %2900 = vmatmul.mubr.f32.vlgmr.msra.gmra.mxu1 %v7010_v46 }
 0x562   : > { %2937 = vmatpush1.msra.mxu0 %v2376_v35  ;;  %2970 = vmatprep.mubr.f32.mxu0 %v5890_v45 }
 0x563   : > { %5328 = vmatmul.mubr.msk.f32.vlgmr.msra.gmra.mxu0 %vm602_vm0, %v6999_v14  ;;  %3304 = vmatprep.mubr.f32.mxu1 %v5890_v45 }
 0x564   : > { %3227 = vmatprep.mubr.f32.mxu0 %v5890_v45 }
 0x58d   : > { %v2546_v48 = vpop.f32.mrf.mxu1 }
 0x58e   : > { %v2475_v11 = vpop.f32.mrf.mxu0 }
 0x58f   : > { %v2548_v21 = vpop.f32.mrf.mxu1  ;;  %v2547_v53 = vadd.f32 %v2546_v48, %v2475_v11 }
 0x590   : > { %v2477_v57 = vpop.f32.mrf.mxu0 }
 0x591   : > { %v2549_v29 = vadd.f32 %v2548_v21, %v2477_v57 }
 0x59e   : > { %v2688_v61 = vpop.f32.mrf.mxu1 }
 0x5a0   : > { %v2690_v34 = vpop.f32.mrf.mxu1 }
 0x5d0   : > { %v2617_v19 = vpop.f32.mrf.mxu0 }
 0x5d1   : > { %v2618_v50 = vadd.f32 %v2617_v19, %v2547_v53 }
 0x5d2   : > { %v2619_v46 = vpop.f32.mrf.mxu0 }
 0x5d3   : > { %v7023_v30 = vadd.f32 %v2688_v61, %v2618_v50  ;;  %v2620_v60 = vadd.f32 %v2619_v46, %v2549_v29 }
 0x5d5   : > { %v7025_v63 = vadd.f32 %v2690_v34, %v2620_v60  ;;  %3103 = vrot.lane.b32.xlu1 %v7023_v30, %s5889_s15  ;;  %v3005_v14 = vrot.slane %v7023_v30, 4  ;;  %v3024_v10 = vrot.slane %v7023_v30, 6  ;;  %v2986_v58 = vrot.slane %v7023_v30, 2 }
 0x5d7   : > { %3105 = vrot.lane.b32.xlu0 %v7025_v63, %s5889_s15  ;;  %v3025_v8 = vrot.slane %v7025_v63, 6  ;;  %v3006_v43 = vrot.slane %v7025_v63, 4  ;;  %v2987_v31 = vrot.slane %v7025_v63, 2 }
 0x5d9   : > { %3043 = vrot.lane.b32.xlu1 %v7023_v30, %s5886_s18 }
 0x5db   : > { %3073 = vrot.lane.b32.xlu0 %v3005_v14, %s5888_s20 }
 0x5dd   : > { %3088 = vrot.lane.b32.xlu1 %v3024_v10, %s5891_s10 }
 0x5df   : > { %3045 = vrot.lane.b32.xlu0 %v7025_v63, %s5886_s18 }
 0x5e0   : > { %v2759_v51 = vpop.f32.mrf.mxu1 }
 0x5e1   : > { %3058 = vrot.lane.b32.xlu1 %v2986_v58, %s5887_s17 }
 0x5e2   : > { %v2761_v6 = vpop.f32.mrf.mxu1 }
 0x5e3   : > { %3009 = vrot.lane.b32.xlu0 %v3005_v14, %s5884_s27 }
 0x5e5   : > { %3028 = vrot.lane.b32.xlu1 %v3024_v10, %s5885_s16 }
 0x5e7   : > { %3090 = vrot.lane.b32.xlu0 %v3025_v8, %s5891_s10 }
 0x5e9   : > { %3075 = vrot.lane.b32.xlu1 %v3006_v43, %s5888_s20 }
 0x5eb   : > { %3060 = vrot.lane.b32.xlu0 %v2987_v31, %s5887_s17 }
 0x5ed   : > { %3030 = vrot.lane.b32.xlu1 %v3025_v8, %s5885_s16 }
 0x5ef   : > { %3011 = vrot.lane.b32.xlu0 %v3006_v43, %s5884_s27 }
 0x5f3   : > { %2992 = vrot.lane.b32.xlu0 %v2987_v31, %s5883_s25 }
 0x612   : > { %v2830_v27 = vpop.f32.mrf.mxu0 }
 0x613   : > { %v2831_v54 = vadd.f32 %v2830_v27, %v2759_v51 }
 0x614   : > { %v2832_v28 = vpop.f32.mrf.mxu0 }
 0x615   : > { %v2833_v15 = vadd.f32 %v2832_v28, %v2761_v6 }
 0x621   : > { %v2901_v20 = vpop.f32.mrf.mxu1 }
 0x622   : > { %v2902_v39 = vadd.f32 %v2901_v20, %v2831_v54 }
 0x623   : > { %v2972_v32 = vpop.f32.mrf.mxu0  ;;  %v2903_v41 = vpop.f32.mrf.mxu1 }
 0x624   : > { %v7052_v55 = vadd.f32 %v2972_v32, %v2902_v39  ;;  %v2904_v16 = vadd.f32 %v2903_v41, %v2833_v15 }
 0x625   : > { %v2974_v56 = vpop.f32.mrf.mxu0 }
 0x626   : > { %3107 = vrot.lane.b32.xlu1 %v7052_v55, %s5889_s15  ;;  %v3007_v36 = vrot.slane %v7052_v55, 4  ;;  %v3026_v44 = vrot.slane %v7052_v55, 6  ;;  %v2975_v25 = vadd.f32 %v2974_v56, %v2904_v16  ;;  %v2988_v7 = vrot.slane %v7052_v55, 2 }
 0x628   : > { %3077 = vrot.lane.b32.xlu0 %v3007_v36, %s5888_s20  ;;  %v7064_v26 = vsel %vm707_vm6, %v2975_v25, 0.0 }
 0x629   : > { %v3027_v52 = vrot.slane %v7064_v26, 6  ;;  %v3008_v9 = vrot.slane %v7064_v26, 4  ;;  %v2989_v38 = vrot.slane %v7064_v26, 2 }
 0x62a   : > { %3047 = vrot.lane.b32.xlu1 %v7052_v55, %s5886_s18 }
 0x62c   : > { %3032 = vrot.lane.b32.xlu0 %v3026_v44, %s5885_s16 }
 0x62e   : > { %3092 = vrot.lane.b32.xlu1 %v3026_v44, %s5891_s10 }
 0x630   : > { %3109 = vrot.lane.b32.xlu0 %v7064_v26, %s5889_s15 }
 0x632   : > { %3062 = vrot.lane.b32.xlu1 %v2988_v7, %s5887_s17 }
 0x634   : > { %3049 = vrot.lane.b32.xlu0 %v7064_v26, %s5886_s18 }
 0x636   : > { %3013 = vrot.lane.b32.xlu1 %v3007_v36, %s5884_s27 }
 0x638   : > { %3094 = vrot.lane.b32.xlu0 %v3027_v52, %s5891_s10 }
 0x63a   : > { %3079 = vrot.lane.b32.xlu1 %v3008_v9, %s5888_s20 }
 0x63c   : > { %3064 = vrot.lane.b32.xlu0 %v2989_v38, %s5887_s17 }
 0x63e   : > { %2994 = vrot.lane.b32.xlu1 %v2988_v7, %s5883_s25 }
 0x640   : > { %3015 = vrot.lane.b32.xlu0 %v3008_v9, %s5884_s27 }
 0x642   : > { %3034 = vrot.lane.b32.xlu1 %v3027_v52, %s5885_s16 }
 0x644   : > { %2996 = vrot.lane.b32.xlu0 %v2989_v38, %s5883_s25 }
 0x646   : > { %2990 = vrot.lane.b32.xlu1 %v2986_v58, %s5883_s25 }
 0x647   : > { %v3104_v59 = vpop.permute.xlu1 %3103 }
 0x648   : > { %3145 = vperm.xlu0 %5609, %v2980_v22  }
 0x649   : > { %v3106_v42 = vpop.permute.xlu0 %3105 }
 0x64a   : > { %3140 = vperm.xlu1 %5635, %v2979_v5   ;;  %v3111_v11 = vsel %vm893_vm2, %v3104_v59, %v3106_v42 }
 0x64b   : > { %v3044_v24 = vpop.permute.xlu1 %3043 }
 0x64d   : > { %v3074_v62 = vpop.permute.xlu0 %3073 }
 0x64f   : > { %v3089_v37 = vpop.permute.xlu1 %3088 }
 0x651   : > { %v3046_v13 = vpop.permute.xlu0 %3045 }
 0x652   : > { %v3051_v54 = vsel %vm746_vm7, %v3044_v24, %v3046_v13 }
 0x653   : > { %v3059_v40 = vpop.permute.xlu1 %3058 }
 0x655   : > { %v3010_v47 = vpop.permute.xlu0 %3009 }
 0x657   : > { %v3029_v49 = vpop.permute.xlu1 %3028 }
 0x659   : > { %v3091_v17 = vpop.permute.xlu0 %3090 }
 0x65a   : > { %v3096_v46 = vsel %vm862_vm12, %v3089_v37, %v3091_v17 }
 0x65b   : > { %v3076_v4 = vpop.permute.xlu1 %3075 }
 0x65c   : > { %v3081_v61 = vsel %vm602_vm0, %v3074_v62, %v3076_v4 }
 0x65d   : > { %v3061_v23 = vpop.permute.xlu0 %3060  ;;  %v3134_v10 = vsel %vm909_vm8, %v3081_v61, %v3096_v46  ;;  %v2978_v46 = vld [vmem:[%s7916_s6 + $0x8] sm:$0xff] }
 0x65e   : > { %v3066_v58 = vsel %vm785_vm9, %v3059_v40, %v3061_v23 }
 0x65f   : > { %v3031_v18 = vpop.permute.xlu1 %3030  ;;  %v3130_v6 = vsel %vm925_vm11, %v3066_v58, %v3081_v61  ;;  %v3126_v15 = vsel %vm941_vm14, %v3051_v54, %v3066_v58 }
 0x660   : > { %v3036_v36 = vsel %vm707_vm6, %v3029_v49, %v3031_v18 }
 0x661   : > { %v3012_v33 = vpop.permute.xlu0 %3011 }
 0x662   : > { %v3017_v28 = vsel %vm7963_vm3, %v3010_v47, %v3012_v33  ;;  %vm3393_vm3 = vcmask 531456  }
 0x663   : > { %v3122_v44 = vsel %vm909_vm8, %v3017_v28, %v3036_v36 }
 0x665   : > { %v7090_v12 = vpop.permute.xlu0 %2992 }
 0x698   : > { %v3108_v35 = vpop.permute.xlu1 %3107 }
 0x699   : > { %v3112_v48 = vsel %vm893_vm2, %v3106_v42, %v3108_v35 }
 0x69a   : > { %v3078_v21 = vpop.permute.xlu0 %3077  ;;  %5329 = vmatprep.subr.msk.mxu0 %vm941_vm14, %v3112_v48 }
 0x69b   : > { %5330 = vmatpush1.msk.msra.mxu0 %vm941_vm14, %v3111_v11  ;;  %v3082_v29 = vsel %vm602_vm0, %v3076_v4, %v3078_v21 }
 0x69c   : > { %v3048_v57 = vpop.permute.xlu1 %3047 }
 0x69d   : > { %v3052_v27 = vsel %vm746_vm7, %v3046_v13, %v3048_v57 }
 0x69e   : > { %v7096_v53 = vpop.permute.xlu0 %3032 }
 0x69f   : > { %v3037_v32 = vsel %vm707_vm6, %v3031_v18, %v7096_v53 }
 0x6a0   : > { %v3093_v19 = vpop.permute.xlu1 %3092 }
 0x6a1   : > { %v3097_v50 = vsel %vm862_vm12, %v3091_v17, %v3093_v19 }
 0x6a2   : > { %v3110_v60 = vpop.permute.xlu0 %3109  ;;  %v3135_v34 = vsel %vm909_vm8, %v3082_v29, %v3097_v50 }
 0x6a3   : > { %v3113_v14 = vsel %vm893_vm2, %v3108_v35, %v3110_v60  ;;  %3183 = vmatprep.subr.mxu0 %v3135_v34  ;;  %5333 = vmatprep.subr.msk.mxu1 %vm941_vm14, %v3110_v60 }
 0x6a4   : > { %3184 = vmatpush1.msra.mxu0 %v3134_v10  ;;  %5334 = vmatpush1.msk.msra.mxu1 %vm941_vm14, %v3113_v14  ;;  %v3063_v8 = vpop.permute.xlu1 %3062 }
 0x6a5   : > { %v3067_v43 = vsel %vm785_vm9, %v3061_v23, %v3063_v8 }
 0x6a6   : > { %v3050_v31 = vpop.permute.xlu0 %3049  ;;  %v3131_v51 = vsel %vm925_vm11, %v3067_v43, %v3082_v29  ;;  %v3127_v39 = vsel %vm941_vm14, %v3052_v27, %v3067_v43 }
 0x6a7   : > { %3185 = vmatprep.subr.mxu0 %v3131_v51  ;;  %v3053_v24 = vsel %vm746_vm7, %v3048_v57, %v3050_v31 }
 0x6a8   : > { %3186 = vmatpush1.msra.mxu0 %v3130_v6  ;;  %v3014_v20 = vpop.permute.xlu1 %3013 }
 0x6a9   : > { %v3018_v41 = vsel %vm7964_vm4, %v3012_v33, %v3014_v20  ;;  %3187 = vmatprep.subr.mxu0 %v3127_v39  ;;  %vm3650_vm4 = vcmask 130048  }
 0x6aa   : > { %v3095_v16 = vpop.permute.xlu0 %3094  ;;  %3188 = vmatpush1.msra.mxu0 %v3126_v15  ;;  %v3123_v56 = vsel %vm909_vm8, %v3018_v41, %v3037_v32 }
 0x6ab   : > { %3189 = vmatprep.subr.mxu0 %v3123_v56  ;;  %v3098_v7 = vsel %vm862_vm12, %v3093_v19, %v3095_v16  ;;  %v2977_v19 = vld [vmem:[%s7916_s6] sm:$0xff] }
 0x6ac   : > { %3190 = vmatpush1.msra.mxu0 %v3122_v44  ;;  %v3080_v25 = vpop.permute.xlu1 %3079 }
 0x6ad   : > { %v3137_v52 = vsel %vm909_vm8, %v3080_v25, %v3095_v16  ;;  %v3083_v9 = vsel %vm602_vm0, %v3078_v21, %v3080_v25 }
 0x6ae   : > { %v3065_v38 = vpop.permute.xlu0 %3064  ;;  %3260 = vmatprep.subr.mxu1 %v3137_v52  ;;  %v3136_v22 = vsel %vm909_vm8, %v3083_v9, %v3098_v7 }
 0x6af   : > { %3261 = vmatpush1.msra.mxu1 %v3136_v22  ;;  %v3133_v5 = vsel %vm925_vm11, %v3065_v38, %v3080_v25  ;;  %v3068_v42 = vsel %vm785_vm9, %v3063_v8, %v3065_v38  ;;  %v3129_v37 = vsel %vm941_vm14, %v3050_v31, %v3065_v38 }
 0x6b0   : > { %3262 = vmatprep.subr.mxu1 %v3133_v5  ;;  %v2995_v59 = vpop.permute.xlu1 %2994  ;;  %v3132_v62 = vsel %vm925_vm11, %v3068_v42, %v3083_v9  ;;  %v3128_v17 = vsel %vm941_vm14, %v3053_v24, %v3068_v42 }
 0x6b1   : > { %v2999_v13 = vsel %vm629_vm5, %v7090_v12, %v2995_v59  ;;  %3263 = vmatpush1.msra.mxu1 %v3132_v62 }
 0x6b2   : > { %v3016_v47 = vpop.permute.xlu0 %3015  ;;  %3264 = vmatprep.subr.mxu1 %v3129_v37  ;;  %v3119_v40 = vsel %vm925_vm11, %v2999_v13, %v3018_v41 }
 0x6b3   : > { %3191 = vmatprep.subr.mxu0 %v3119_v40  ;;  %3265 = vmatpush1.msra.mxu1 %v3128_v17  ;;  %v3019_v33 = vsel %vm7965_vm10, %v3014_v20, %v3016_v47 }
 0x6b4   : > { %v3035_v49 = vpop.permute.xlu1 %3034 }
 0x6b5   : > { %v3038_v23 = vsel %vm707_vm6, %v7096_v53, %v3035_v49  ;;  %v3125_v4 = vsel %vm909_vm8, %v3016_v47, %v3035_v49 }
 0x6b6   : > { %v2997_v18 = vpop.permute.xlu0 %2996  ;;  %3266 = vmatprep.subr.mxu1 %v3125_v4  ;;  %v3124_v35 = vsel %vm909_vm8, %v3019_v33, %v3038_v23  ;;  %vm3148_vm8 = vcmask 441344  }
 0x6b7   : > { %3267 = vmatpush1.msra.mxu1 %v3124_v35  ;;  %v3121_v48 = vsel %vm925_vm11, %v2997_v18, %v3016_v47  ;;  %v3000_v11 = vsel %vm629_vm5, %v2995_v59, %v2997_v18  ;;  %v3117_v61 = vsel %vm941_vm14, %v7064_v26, %v2997_v18 }
 0x6b8   : > { %3268 = vmatprep.subr.mxu1 %v3121_v48  ;;  %v2991_v21 = vpop.permute.xlu1 %2990  ;;  %v3120_v57 = vsel %vm925_vm11, %v3000_v11, %v3019_v33  ;;  %v3116_v50 = vsel %vm941_vm14, %v7052_v55, %v3000_v11 }
 0x6b9   : > { %v2998_v53 = vsel %vm629_vm5, %v2991_v21, %v7090_v12  ;;  %3269 = vmatpush1.msra.mxu1 %v3120_v57  ;;  %v3115_v12 = vsel %vm941_vm14, %v7025_v63, %v2999_v13  ;;  %v3326_v63 = vand.u32 127, %v562_v0 }
 0x6ba   : > { %3270 = vmatprep.subr.mxu1 %v3117_v61  ;;  %v3118_v29 = vsel %vm925_vm11, %v2998_v53, %v3017_v28  ;;  %v3114_v26 = vsel %vm941_vm14, %v7023_v30, %v2998_v53 }
 0x6bb   : > { %3192 = vmatpush1.msra.mxu0 %v3118_v29  ;;  %3271 = vmatpush1.msra.mxu1 %v3116_v50  ;;  %v3327_v55 = vadd.s32 128, %v3326_v63  ;;  %v3328_v34 = vadd.s32 256, %v3326_v63  ;;  %v3330_v14 = vand.u32 31, %v3326_v63  ;;  %v3329_v43 = vadd.s32 384, %v3326_v63 }
 0x6bc   : > { %3193 = vmatprep.subr.mxu0 %v3115_v12  ;;  %5335 = vmatmul.mubr.msk.f32.vlgmr.msra.gmra.mxu1 %vm3148_vm8, %v2977_v19 }
 0x6bd   : > { %3194 = vmatpush1.msra.mxu0 %v3114_v26  ;;  %3310 = vmatprep.mubr.f32.mxu1 %v5890_v45  ;;  %v3331_v8 = vand.u32 31, %v3327_v55  ;;  %v3332_v27 = vand.u32 31, %v3328_v34  ;;  %vm7167_vm11 = vcmp.lt.s32.totalorder %v3330_v14, 13  ;;  %v3333_v15 = vand.u32 31, %v3329_v43  ;;  %v3388_v34 = vld [vmem:[%s7918_s8 + $0x8] sm:$0xff] }
 0x6be   : > { %5331 = vmatmul.mubr.msk.f32.vlgmr.msra.gmra.mxu0 %vm3148_vm8, %v2977_v19 }
 0x6bf   : > { %3233 = vmatprep.mubr.f32.mxu0 %v5890_v45  ;;  %vm7171_vm13 = vcmp.lt.s32.totalorder %v3331_v8, 13  ;;  %vm7179_vm14 = vcmp.lt.s32.totalorder %v3332_v27, 13  ;;  %vm7183_vm15 = vcmp.lt.s32.totalorder %v3333_v15, 13 }
 0x6c0   : > { %5336 = vmatmul.mubr.msk.f32.gmra.mxu1 %vm3148_vm8, %v2978_v46 }
 0x6c1   : > { %5345 = vmatprep.mubr.msk.f32.mxu1 %vm3650_vm4, %v3388_v34 }
 0x6c2   : > { %5332 = vmatmul.mubr.msk.f32.gmra.mxu0 %vm3148_vm8, %v2978_v46 }
 0x6c3   : > { %v3146_v36 = vpop.permute.xlu0 %3145  ;;  %5341 = vmatprep.mubr.msk.f32.mxu0 %vm3650_vm4, %v3388_v34 }
 0x6c5   : > { %v3141_v30 = vpop.permute.xlu1 %3140 }
 0x77c   : > { %v3306_v60 = vpop.f32.mrf.mxu1 }
 0x77d   : > { %v3307_v6 = vadd.f32 %v3306_v60, %v3141_v30 }
 0x77e   : > { %v3229_v10 = vpop.f32.mrf.mxu0  ;;  %v3308_v58 = vpop.f32.mrf.mxu1 }
 0x77f   : > { %v3230_v31 = vadd.f32 %v3229_v10, %v3141_v30  ;;  %v3309_v0 = vadd.f32 %v3308_v58, %v3141_v30  ;;  %v3319_v7 = vmax.f32 %v3307_v6, 0.0 }
 0x780   : > { %v3231_v51 = vpop.f32.mrf.mxu0  ;;  %v3312_v32 = vpop.f32.mrf.mxu1 }
 0x781   : > { %v3232_v54 = vadd.f32 %v3231_v51, %v3141_v30  ;;  %v3317_v20 = vmax.f32 %v3230_v31, 0.0  ;;  %v3320_v38 = vmax.f32 %v3309_v0, 0.0  ;;  %v3313_v59 = vadd.f32 %v3312_v32, %v3146_v36 }
 0x782   : > { %v3235_v41 = vpop.f32.mrf.mxu0  ;;  %v3314_v22 = vpop.f32.mrf.mxu1  ;;  %v3340_v24 = vsel %vm7179_vm14, %v3319_v7, 0.0 }
 0x783   : > { %v3318_v16 = vmax.f32 %v3232_v54, 0.0  ;;  %v3236_v56 = vadd.f32 %v3235_v41, %v3146_v36  ;;  %v3338_v25 = vsel %vm7167_vm11, %v3317_v20, 0.0  ;;  %v3315_v13 = vadd.f32 %v3314_v22, %v3146_v36  ;;  %v3392_v54 = vld [vmem:[%s7919_s9 + $0x8] sm:$0xff]  ;;  %v3391_v20 = vld [vmem:[%s7919_s9] sm:$0xff] }
 0x784   : > { %v3237_v44 = vpop.f32.mrf.mxu0  ;;  %3354 = vrot.lane.b32.xlu0 %v3338_v25, %s5894_s21  ;;  %v3341_v47 = vsel %vm7183_vm15, %v3320_v38, 0.0  ;;  %v3323_v40 = vmax.f32 %v3313_v59, 0.0 }
 0x785   : > { %v3339_v52 = vsel %vm7171_vm13, %v3318_v16, 0.0  ;;  %v3238_v42 = vadd.f32 %v3237_v44, %v3146_v36  ;;  %v3321_v62 = vmax.f32 %v3236_v56, 0.0  ;;  %v3324_v49 = vmax.f32 %v3315_v13, 0.0 }
 0x786   : > { %3356 = vrot.lane.b32.xlu1 %v3339_v52, %s5894_s21  ;;  %v3344_v4 = vsel %vm7179_vm14, %v3323_v40, 0.0  ;;  %vm4185_vm14 = vcmask 588800  }
 0x787   : > { %v3322_v37 = vmax.f32 %v3238_v42, 0.0  ;;  %v3342_v17 = vsel %vm7167_vm11, %v3321_v62, 0.0  ;;  %v3345_v33 = vsel %vm7183_vm15, %v3324_v49, 0.0  ;;  %vm4192_vm15 = vcmask 719872  }
 0x788   : > { %3358 = vrot.lane.b32.xlu0 %v3340_v24, %s5894_s21 }
 0x789   : > { %v3343_v23 = vsel %vm7171_vm13, %v3322_v37, 0.0  ;;  %vm5337_vm13 = vmneg %vm3370_vm1 }
 0x78a   : > { %3360 = vrot.lane.b32.xlu1 %v3341_v47, %s5894_s21 }
 0x78c   : > { %3362 = vrot.lane.b32.xlu0 %v3342_v17, %s5894_s21 }
 0x78e   : > { %3364 = vrot.lane.b32.xlu1 %v3343_v23, %s5894_s21 }
 0x790   : > { %3366 = vrot.lane.b32.xlu0 %v3344_v4, %s5894_s21 }
 0x792   : > { %3368 = vrot.lane.b32.xlu1 %v3345_v33, %s5894_s21  ;;  %s5908_s21 = smov 120  }
 0x7f6   : > { %v7199_v18 = vpop.permute.xlu0 %3354 }
 0x7f7   : > { %v7203_v35 = vsel %vm3370_vm1, 0.0, %v7199_v18 }
 0x7f8   : > { %v3357_v48 = vpop.permute.xlu1 %3356  ;;  %3580 = vrot.lane.b32.xlu1 %v7203_v35, %s5891_s10 }
 0x7f9   : > { %v7207_v11 = vsel %vm3370_vm1, %v7199_v18, %v3357_v48 }
 0x7fa   : > { %3582 = vrot.lane.b32.xlu0 %v7207_v11, %s5891_s10  ;;  %v3359_v57 = vpop.permute.xlu0 %3358 }
 0x7fb   : > { %v7241_v61 = vsel %vm3370_vm1, %v3357_v48, %v3359_v57 }
 0x7fc   : > { %3550 = vrot.lane.b32.xlu1 %v7203_v35, %s5888_s20  ;;  %v3361_v21 = vpop.permute.xlu1 %3360 }
 0x7fd   : > { %v7236_v53 = vsel %vm3370_vm1, %v3359_v57, %v3361_v21 }
 0x7fe   : > { %3552 = vrot.lane.b32.xlu0 %v7207_v11, %s5888_s20  ;;  %v7245_v19 = vsel %vm3393_vm3, %v7236_v53, 0.0  ;;  %v7271_v29 = vpop.permute.xlu0 %3362 }
 0x7ff   : > { %v3386_v12 = vsel %vm3370_vm1, 0.0, %v7271_v29 }
 0x800   : > { %3520 = vrot.lane.b32.xlu1 %v7203_v35, %s5887_s17  ;;  %v3365_v50 = vpop.permute.xlu1 %3364 }
 0x801   : > { %v7281_v26 = vsel %vm3370_vm1, %v7271_v29, %v3365_v50 }
 0x802   : > { %3522 = vrot.lane.b32.xlu0 %v7207_v11, %s5887_s17  ;;  %v3367_v63 = vpop.permute.xlu0 %3366 }
 0x803   : > { %v7311_v60 = vsel %vm3370_vm1, %v3365_v50, %v3367_v63 }
 0x804   : > { %3490 = vrot.lane.b32.xlu1 %v7203_v35, %s5886_s18  ;;  %v3369_v46 = vpop.permute.xlu1 %3368 }
 0x805   : > { %v7306_v55 = vsel %vm3370_vm1, %v3367_v63, %v3369_v46  ;;  %vm4194_vm1 = vcmask 1014784  }
 0x806   : > { %3492 = vrot.lane.b32.xlu0 %v7207_v11, %s5886_s18  ;;  %v3395_v30 = vsel %vm3393_vm3, %v7306_v55, 0.0 }
 0x808   : > { %3460 = vrot.lane.b32.xlu1 %v7203_v35, %s5885_s16 }
 0x80a   : > { %3462 = vrot.lane.b32.xlu0 %v7207_v11, %s5885_s16 }
 0x80c   : > { %3430 = vrot.lane.b32.xlu1 %v7203_v35, %s5884_s27 }
 0x80e   : > { %3432 = vrot.lane.b32.xlu0 %v7207_v11, %s5884_s27 }
 0x810   : > { %3400 = vrot.lane.b32.xlu1 %v7203_v35, %s5883_s25 }
 0x812   : > { %3402 = vrot.lane.b32.xlu0 %v7207_v11, %s5883_s25 }
 0x814   : > { %3584 = vrot.lane.b32.xlu1 %v7241_v61, %s5891_s10 }
 0x816   : > { %3586 = vrot.lane.b32.xlu0 %v7245_v19, %s5891_s10 }
 0x818   : > { %3554 = vrot.lane.b32.xlu1 %v7241_v61, %s5888_s20 }
 0x81a   : > { %3556 = vrot.lane.b32.xlu0 %v7245_v19, %s5888_s20 }
 0x81c   : > { %3524 = vrot.lane.b32.xlu1 %v7241_v61, %s5887_s17 }
 0x81e   : > { %3526 = vrot.lane.b32.xlu0 %v7245_v19, %s5887_s17 }
 0x820   : > { %3494 = vrot.lane.b32.xlu1 %v7241_v61, %s5886_s18 }
 0x822   : > { %3496 = vrot.lane.b32.xlu0 %v7245_v19, %s5886_s18 }
 0x824   : > { %3464 = vrot.lane.b32.xlu1 %v7241_v61, %s5885_s16 }
 0x826   : > { %3466 = vrot.lane.b32.xlu0 %v7245_v19, %s5885_s16 }
 0x828   : > { %3434 = vrot.lane.b32.xlu1 %v7241_v61, %s5884_s27 }
 0x82a   : > { %3436 = vrot.lane.b32.xlu0 %v7245_v19, %s5884_s27 }
 0x82c   : > { %3404 = vrot.lane.b32.xlu1 %v7241_v61, %s5883_s25 }
 0x82e   : > { %3406 = vrot.lane.b32.xlu0 %v7245_v19, %s5883_s25 }
 0x830   : > { %3588 = vrot.lane.b32.xlu1 %v3386_v12, %s5891_s10 }
 0x832   : > { %3590 = vrot.lane.b32.xlu0 %v7281_v26, %s5891_s10 }
 0x834   : > { %3558 = vrot.lane.b32.xlu1 %v3386_v12, %s5888_s20 }
 0x836   : > { %3560 = vrot.lane.b32.xlu0 %v7281_v26, %s5888_s20 }
 0x838   : > { %3528 = vrot.lane.b32.xlu1 %v3386_v12, %s5887_s17 }
 0x83a   : > { %3530 = vrot.lane.b32.xlu0 %v7281_v26, %s5887_s17 }
 0x83c   : > { %3498 = vrot.lane.b32.xlu1 %v3386_v12, %s5886_s18 }
 0x83e   : > { %3500 = vrot.lane.b32.xlu0 %v7281_v26, %s5886_s18 }
 0x840   : > { %3468 = vrot.lane.b32.xlu1 %v3386_v12, %s5885_s16 }
 0x842   : > { %3470 = vrot.lane.b32.xlu0 %v7281_v26, %s5885_s16 }
 0x844   : > { %3438 = vrot.lane.b32.xlu1 %v3386_v12, %s5884_s27 }
 0x846   : > { %3440 = vrot.lane.b32.xlu0 %v7281_v26, %s5884_s27 }
 0x848   : > { %3408 = vrot.lane.b32.xlu1 %v3386_v12, %s5883_s25 }
 0x84a   : > { %3410 = vrot.lane.b32.xlu0 %v7281_v26, %s5883_s25 }
 0x84c   : > { %3618 = vrot.lane.b32.xlu1 %v3386_v12, %s5889_s15 }
 0x84e   : > { %3620 = vrot.lane.b32.xlu0 %v7281_v26, %s5889_s15 }
 0x850   : > { %3592 = vrot.lane.b32.xlu1 %v7311_v60, %s5891_s10 }
 0x852   : > { %3594 = vrot.lane.b32.xlu0 %v3395_v30, %s5891_s10  ;;  %s5898_s10 = smov 36  }
 0x854   : > { %3562 = vrot.lane.b32.xlu1 %v7311_v60, %s5888_s20 }
 0x856   : > { %3564 = vrot.lane.b32.xlu0 %v3395_v30, %s5888_s20  ;;  %s5897_s20 = smov 52  }
 0x858   : > { %3532 = vrot.lane.b32.xlu1 %v7311_v60, %s5887_s17 }
 0x85a   : > { %3534 = vrot.lane.b32.xlu0 %v3395_v30, %s5887_s17  ;;  %s5901_s17 = smov 124  }
 0x85c   : > { %3502 = vrot.lane.b32.xlu1 %v7311_v60, %s5886_s18 }
 0x85e   : > { %3504 = vrot.lane.b32.xlu0 %v3395_v30, %s5886_s18  ;;  %s5900_s18 = smov 72  }
 0x860   : > { %3472 = vrot.lane.b32.xlu1 %v7311_v60, %s5885_s16 }
 0x862   : > { %3474 = vrot.lane.b32.xlu0 %v3395_v30, %s5885_s16 }
 0x864   : > { %3442 = vrot.lane.b32.xlu1 %v7311_v60, %s5884_s27 }
 0x866   : > { %3444 = vrot.lane.b32.xlu0 %v3395_v30, %s5884_s27  ;;  %s5899_s27 = smov 88  }
 0x868   : > { %3412 = vrot.lane.b32.xlu1 %v7311_v60, %s5883_s25 }
 0x86a   : > { %3414 = vrot.lane.b32.xlu0 %v3395_v30, %s5883_s25  ;;  %v3581_v14 = vpop.permute.xlu1 %3580 }
 0x86c   : > { %v7341_v10 = vpop.permute.xlu0 %3582  ;;  %3622 = vrot.lane.b32.xlu1 %v7311_v60, %s5889_s15 }
 0x86d   : > { %v7347_v58 = vsel %vm862_vm12, %v3581_v14, %v7341_v10 }
 0x86e   : > { %3612 = vrot.lane.b32.xlu0 %v7207_v11, %s5889_s15  ;;  %v3551_v8 = vpop.permute.xlu1 %3550 }
 0x870   : > { %v7351_v43 = vpop.permute.xlu0 %3552  ;;  %3614 = vrot.lane.b32.xlu1 %v7241_v61, %s5889_s15 }
 0x871   : > { %v7357_v31 = vsel %vm602_vm0, %v3551_v8, %v7351_v43 }
 0x872   : > { %3624 = vrot.lane.b32.xlu0 %v3395_v30, %s5889_s15  ;;  %v3521_v51 = vpop.permute.xlu1 %3520 }
 0x874   : > { %v7360_v27 = vpop.permute.xlu0 %3522  ;;  %3610 = vrot.lane.b32.xlu1 %v7203_v35, %s5889_s15 }
 0x875   : > { %v7366_v6 = vsel %vm785_vm9, %v3521_v51, %v7360_v27 }
 0x876   : > { %3616 = vrot.lane.b32.xlu0 %v7245_v19, %s5889_s15  ;;  %v3491_v28 = vpop.permute.xlu1 %3490  ;;  %s5903_s15 = smov 32  }
 0x878   : > { %v7376_v0 = vpop.permute.xlu0 %3492  ;;  %3647 = vperm.xlu1 %5635, %v3392_v54  }
 0x879   : > { %v7380_v39 = vsel %vm746_vm7, %v3491_v28, %v7376_v0 }
 0x87a   : > { %3642 = vperm.xlu0 %5609, %v3391_v20   ;;  %v3461_v32 = vpop.permute.xlu1 %3460 }
 0x87c   : > { %v7382_v41 = vpop.permute.xlu0 %3462 }
 0x87d   : > { %v7386_v15 = vsel %vm707_vm6, %v3461_v32, %v7382_v41 }
 0x87e   : > { %v3431_v36 = vpop.permute.xlu1 %3430 }
 0x880   : > { %v7388_v16 = vpop.permute.xlu0 %3432 }
 0x881   : > { %v7392_v56 = vsel %vm7965_vm10, %v3431_v36, %v7388_v16 }
 0x882   : > { %v3401_v44 = vpop.permute.xlu1 %3400 }
 0x884   : > { %v7394_v25 = vpop.permute.xlu0 %3402 }
 0x885   : > { %v7398_v7 = vsel %vm629_vm5, %v3401_v44, %v7394_v25 }
 0x886   : > { %v3585_v52 = vpop.permute.xlu1 %3584 }
 0x887   : > { %v3597_v32 = vsel %vm862_vm12, %v7341_v10, %v3585_v52 }
 0x888   : > { %v3587_v9 = vpop.permute.xlu0 %3586 }
 0x889   : > { %v3598_v36 = vsel %vm862_vm12, %v3585_v52, %v3587_v9 }
 0x88a   : > { %v3555_v38 = vpop.permute.xlu1 %3554 }
 0x88b   : > { %v3567_v10 = vsel %vm602_vm0, %v7351_v43, %v3555_v38 }
 0x88c   : > { %v3557_v22 = vpop.permute.xlu0 %3556 }
 0x88d   : > { %v3568_v52 = vsel %vm602_vm0, %v3555_v38, %v3557_v22 }
 0x88e   : > { %v7400_v5 = vpop.permute.xlu1 %3524 }
 0x88f   : > { %v3537_v43 = vsel %vm785_vm9, %v7360_v27, %v7400_v5 }
 0x890   : > { %v7402_v42 = vpop.permute.xlu0 %3526 }
 0x892   : > { %v7404_v59 = vpop.permute.xlu1 %3494 }
 0x894   : > { %v7406_v62 = vpop.permute.xlu0 %3496 }
 0x896   : > { %v7408_v24 = vpop.permute.xlu1 %3464 }
 0x898   : > { %v7410_v13 = vpop.permute.xlu0 %3466 }
 0x89a   : > { %v7412_v37 = vpop.permute.xlu1 %3434 }
 0x89c   : > { %v7414_v47 = vpop.permute.xlu0 %3436 }
 0x89e   : > { %v7416_v40 = vpop.permute.xlu1 %3404 }
 0x8a0   : > { %v7418_v17 = vpop.permute.xlu0 %3406 }
 0x8a2   : > { %v3589_v49 = vpop.permute.xlu1 %3588 }
 0x8a4   : > { %v3591_v23 = vpop.permute.xlu0 %3590 }
 0x8a5   : > { %v3599_v28 = vsel %vm862_vm12, %v3589_v49, %v3591_v23 }
 0x8a6   : > { %v3559_v4 = vpop.permute.xlu1 %3558 }
 0x8a8   : > { %v3561_v33 = vpop.permute.xlu0 %3560 }
 0x8aa   : > { %v3529_v35 = vpop.permute.xlu1 %3528 }
 0x8ac   : > { %v3531_v48 = vpop.permute.xlu0 %3530 }
 0x8ae   : > { %v3499_v21 = vpop.permute.xlu1 %3498 }
 0x8b0   : > { %v3501_v57 = vpop.permute.xlu0 %3500 }
 0x8b2   : > { %v7420_v19 = vpop.permute.xlu1 %3468 }
 0x8b4   : > { %v7422_v50 = vpop.permute.xlu0 %3470 }
 0x8b6   : > { %v7424_v12 = vpop.permute.xlu1 %3438 }
 0x8b8   : > { %v7426_v46 = vpop.permute.xlu0 %3440 }
 0x8ba   : > { %v7428_v63 = vpop.permute.xlu1 %3408 }
 0x8bc   : > { %v7430_v30 = vpop.permute.xlu0 %3410 }
 0x8be   : > { %v7432_v34 = vpop.permute.xlu1 %3618 }
 0x8c0   : > { %v7434_v14 = vpop.permute.xlu0 %3620 }
 0x8c2   : > { %v3593_v8 = vpop.permute.xlu1 %3592 }
 0x8c3   : > { %v3600_v51 = vsel %vm862_vm12, %v3591_v23, %v3593_v8  ;;  %v3569_v23 = vsel %vm602_vm0, %v3559_v4, %v3561_v33 }
 0x8c4   : > { %v3595_v54 = vpop.permute.xlu0 %3594  ;;  %3657 = vmatprep.subr.mxu0 %v3600_v51 }
 0x8c5   : > { %v3601_v20 = vsel %vm862_vm12, %v3593_v8, %v3595_v54  ;;  %3734 = vmatprep.subr.mxu1 %v3595_v54  ;;  %3658 = vmatpush1.msra.mxu0 %v3599_v28 }
 0x8c6   : > { %3735 = vmatpush1.msra.mxu1 %v3601_v20  ;;  %v3563_v44 = vpop.permute.xlu1 %3562  ;;  %3659 = vmatprep.subr.mxu0 %v3597_v32 }
 0x8c7   : > { %3736 = vmatprep.subr.mxu1 %v3587_v9  ;;  %3660 = vmatpush1.msra.mxu0 %v7347_v58  ;;  %v3570_v2 = vsel %vm602_vm0, %v3561_v33, %v3563_v44 }
 0x8c8   : > { %3737 = vmatpush1.msra.mxu1 %v3598_v36  ;;  %v3565_v49 = vpop.permute.xlu0 %3564  ;;  %3661 = vmatprep.subr.mxu0 %v3570_v2  ;;  %v3539_v2 = vsel %vm785_vm9, %v3529_v35, %v3531_v48 }
 0x8c9   : > { %v3571_v8 = vsel %vm602_vm0, %v3563_v44, %v3565_v49  ;;  %3738 = vmatprep.subr.mxu1 %v3565_v49  ;;  %3662 = vmatpush1.msra.mxu0 %v3569_v23 }
 0x8ca   : > { %3739 = vmatpush1.msra.mxu1 %v3571_v8  ;;  %v3533_v9 = vpop.permute.xlu1 %3532  ;;  %3663 = vmatprep.subr.mxu0 %v3567_v10 }
 0x8cb   : > { %3740 = vmatprep.subr.mxu1 %v3557_v22  ;;  %3664 = vmatpush1.msra.mxu0 %v7357_v31  ;;  %v3540_v58 = vsel %vm785_vm9, %v3531_v48, %v3533_v9  ;;  %v3538_v31 = vsel %vm785_vm9, %v7400_v5, %v7402_v42  ;;  %v3509_v48 = vsel %vm746_vm7, %v3499_v21, %v3501_v57 }
 0x8cc   : > { %3741 = vmatpush1.msra.mxu1 %v3568_v52  ;;  %v3535_v4 = vpop.permute.xlu0 %3534  ;;  %3665 = vmatprep.subr.mxu0 %v3540_v58  ;;  %v3507_v5 = vsel %vm746_vm7, %v7376_v0, %v7404_v59  ;;  %v3479_v0 = vsel %vm707_vm6, %v7420_v19, %v7422_v50 }
 0x8cd   : > { %v3541_v33 = vsel %vm785_vm9, %v3533_v9, %v3535_v4  ;;  %3742 = vmatprep.subr.mxu1 %v3535_v4  ;;  %3666 = vmatpush1.msra.mxu0 %v3539_v2 }
 0x8ce   : > { %3743 = vmatpush1.msra.mxu1 %v3541_v33  ;;  %v3503_v38 = vpop.permute.xlu1 %3502  ;;  %3667 = vmatprep.subr.mxu0 %v3537_v43 }
 0x8cf   : > { %3744 = vmatprep.subr.mxu1 %v7402_v42  ;;  %3668 = vmatpush1.msra.mxu0 %v7366_v6  ;;  %v3510_v22 = vsel %vm746_vm7, %v3501_v57, %v3503_v38  ;;  %v3508_v6 = vsel %vm746_vm7, %v7404_v59, %v7406_v62  ;;  %v3477_v59 = vsel %vm707_vm6, %v7382_v41, %v7408_v24 }
 0x8d0   : > { %3745 = vmatpush1.msra.mxu1 %v3538_v31  ;;  %v3505_v35 = vpop.permute.xlu0 %3504  ;;  %3669 = vmatprep.subr.mxu0 %v3510_v22 }
 0x8d1   : > { %v3511_v27 = vsel %vm746_vm7, %v3503_v38, %v3505_v35  ;;  %3746 = vmatprep.subr.mxu1 %v3505_v35  ;;  %3670 = vmatpush1.msra.mxu0 %v3509_v48  ;;  %vm7974_vm7 = vmmov %vm7965_vm10  ;;  %vm4203_vm10 = vcmask 392192  }
 0x8d2   : > { %3747 = vmatpush1.msra.mxu1 %v3511_v27  ;;  %v3473_v42 = vpop.permute.xlu1 %3472  ;;  %3671 = vmatprep.subr.mxu0 %v3507_v5  ;;  %vm7975_vm9 = vmmov %vm7974_vm7 }
 0x8d3   : > { %3748 = vmatprep.subr.mxu1 %v7406_v62  ;;  %3672 = vmatpush1.msra.mxu0 %v7380_v39  ;;  %v3480_v21 = vsel %vm707_vm6, %v7422_v50, %v3473_v42  ;;  %v3478_v39 = vsel %vm707_vm6, %v7408_v24, %v7410_v13  ;;  %v3449_v41 = vsel %vm7975_vm9, %v7424_v12, %v7426_v46  ;;  %vm7976_vm12 = vmmov %vm7974_vm7  ;;  %vm4197_vm9 = vcmask 556032  }
 0x8d4   : > { %3749 = vmatpush1.msra.mxu1 %v3508_v6  ;;  %v3475_v57 = vpop.permute.xlu0 %3474  ;;  %3673 = vmatprep.subr.mxu0 %v3480_v21  ;;  %vm7977_vm8 = vmmov %vm7974_vm7 }
 0x8d5   : > { %v3481_v51 = vsel %vm707_vm6, %v3473_v42, %v3475_v57  ;;  %3750 = vmatprep.subr.mxu1 %v3475_v57  ;;  %3674 = vmatpush1.msra.mxu0 %v3479_v0  ;;  %v3447_v24 = vsel %vm7977_vm8, %v7388_v16, %v7412_v37  ;;  %vm7978_vm11 = vmmov %vm7974_vm7  ;;  %v3419_v16 = vsel %vm629_vm5, %v7428_v63, %v7430_v30  ;;  %vm4199_vm8 = vcmask 850944  }
 0x8d6   : > { %3751 = vmatpush1.msra.mxu1 %v3481_v51  ;;  %v3443_v62 = vpop.permute.xlu1 %3442  ;;  %3675 = vmatprep.subr.mxu0 %v3477_v59  ;;  %v3961_v59 = vld [vmem:[#allocation5 + $0x178] sm:$0xff] }
 0x8d7   : > { %3752 = vmatprep.subr.mxu1 %v7410_v13  ;;  %3676 = vmatpush1.msra.mxu0 %v7386_v15  ;;  %v3450_v19 = vsel %vm7974_vm7, %v7426_v46, %v3443_v62  ;;  %v3448_v15 = vsel %vm7978_vm11, %v7412_v37, %v7414_v47  ;;  %v3417_v37 = vsel %vm629_vm5, %v7394_v25, %v7416_v40  ;;  %vm4205_vm7 = vcmask 687104  }
 0x8d8   : > { %3753 = vmatpush1.msra.mxu1 %v3478_v39  ;;  %v3445_v50 = vpop.permute.xlu0 %3444  ;;  %3677 = vmatprep.subr.mxu0 %v3450_v19  ;;  %v3960_v39 = vld [vmem:[#allocation5 + $0x170] sm:$0xff]  ;;  %v3929_v19 = vld [vmem:[#allocation5 + $0x78] sm:$0xff]  ;;  %vm4209_vm11 = vcmask 228352  }
 0x8d9   : > { %v3451_v54 = vsel %vm7976_vm12, %v3443_v62, %v3445_v50  ;;  %3754 = vmatprep.subr.mxu1 %v3445_v50  ;;  %3678 = vmatpush1.msra.mxu0 %v3449_v41  ;;  %v3945_v62 = vld [vmem:[#allocation5 + $0xf8] sm:$0xff]  ;;  %v3959_v50 = vld [vmem:[#allocation5 + $0x168] sm:$0xff]  ;;  %v3944_v41 = vld [vmem:[#allocation5 + $0xf0] sm:$0xff]  ;;  %vm4207_vm12 = vcmask 982016  }
 0x8da   : > { %3755 = vmatpush1.msra.mxu1 %v3451_v54  ;;  %v3413_v13 = vpop.permute.xlu1 %3412  ;;  %3679 = vmatprep.subr.mxu0 %v3447_v24  ;;  %v3928_v24 = vld [vmem:[#allocation5 + $0x70] sm:$0xff] }
 0x8db   : > { %3756 = vmatprep.subr.mxu1 %v7414_v47  ;;  %3680 = vmatpush1.msra.mxu0 %v7392_v56  ;;  %v3420_v12 = vsel %vm629_vm5, %v7430_v30, %v3413_v13  ;;  %v3418_v56 = vsel %vm629_vm5, %v7416_v40, %v7418_v17  ;;  %v3390_v40 = vld [vmem:[%s7918_s8 + $0x18] sm:$0xff]  ;;  %v3389_v30 = vld [vmem:[%s7918_s8 + $0x10] sm:$0xff] }
 0x8dc   : > { %3757 = vmatpush1.msra.mxu1 %v3448_v15  ;;  %v3415_v46 = vpop.permute.xlu0 %3414  ;;  %3681 = vmatprep.subr.mxu0 %v3420_v12  ;;  %v3958_v15 = vld [vmem:[#allocation5 + $0x160] sm:$0xff]  ;;  %v3927_v12 = vld [vmem:[#allocation5 + $0x68] sm:$0xff] }
 0x8dd   : > { %v3421_v28 = vsel %vm629_vm5, %v3413_v13, %v3415_v46  ;;  %3758 = vmatprep.subr.mxu1 %v3415_v46  ;;  %3682 = vmatpush1.msra.mxu0 %v3419_v16  ;;  %v3943_v13 = vld [vmem:[#allocation5 + $0xe8] sm:$0xff]  ;;  %v3957_v46 = vld [vmem:[#allocation5 + $0x158] sm:$0xff]  ;;  %v3942_v16 = vld [vmem:[#allocation5 + $0xe0] sm:$0xff] }
 0x8de   : > { %3759 = vmatpush1.msra.mxu1 %v3421_v28  ;;  %v3623_v47 = vpop.permute.xlu1 %3622  ;;  %3683 = vmatprep.subr.mxu0 %v3417_v37  ;;  %v3926_v28 = vld [vmem:[#allocation5 + $0x60] sm:$0xff]  ;;  %v3956_v37 = vld [vmem:[#allocation5 + $0x150] sm:$0xff] }
 0x8df   : > { %3760 = vmatprep.subr.mxu1 %v7418_v17  ;;  %3684 = vmatpush1.msra.mxu0 %v7398_v7  ;;  %v3630_v7 = vsel %vm893_vm2, %v7434_v14, %v3623_v47 }
 0x8e0   : > { %3761 = vmatpush1.msra.mxu1 %v3418_v56  ;;  %v3613_v63 = vpop.permute.xlu0 %3612  ;;  %3685 = vmatprep.subr.mxu0 %v7281_v26  ;;  %v3941_v56 = vld [vmem:[#allocation5 + $0xd8] sm:$0xff] }
 0x8e1   : > { %5343 = vmatprep.subr.msk.mxu1 %vm3393_vm3, %v7306_v55  ;;  %5338 = vmatpush1.msk.msra.mxu0 %vm5337_vm13, %v7271_v29  ;;  %v3629_v29 = vsel %vm893_vm2, %v7432_v34, %v7434_v14 }
 0x8e2   : > { %3763 = vmatpush1.msra.mxu1 %v7311_v60  ;;  %v3615_v25 = vpop.permute.xlu1 %3614  ;;  %3687 = vmatprep.subr.mxu0 %v7207_v11 }
 0x8e3   : > { %5344 = vmatprep.subr.msk.mxu1 %vm3393_vm3, %v7236_v53  ;;  %5340 = vmatpush1.msk.msra.mxu0 %vm5337_vm13, %v7199_v18  ;;  %v3627_v11 = vsel %vm893_vm2, %v3613_v63, %v3615_v25  ;;  %v3387_v18 = vld [vmem:[%s7918_s8] sm:$0xff]  ;;  %vm4187_vm3 = vcmask 883712  }
 0x8e4   : > { %3765 = vmatpush1.msra.mxu1 %v7241_v61  ;;  %v3625_v26 = vpop.permute.xlu0 %3624  ;;  %3717 = vmatprep.subr.mxu0 %v3630_v7  ;;  %v3924_v7 = vld [vmem:[#allocation5 + $0x50] sm:$0xff] }
 0x8e5   : > { %v3631_v55 = vsel %vm893_vm2, %v3623_v47, %v3625_v26  ;;  %3794 = vmatprep.subr.mxu1 %v3625_v26  ;;  %3718 = vmatpush2.msra.mxu0 %v3629_v29  ;;  %v3925_v47 = vld [vmem:[#allocation5 + $0x58] sm:$0xff]  ;;  %v3954_v26 = vld [vmem:[#allocation5 + $0x140] sm:$0xff]  ;;  %v3939_v29 = vld [vmem:[#allocation5 + $0xc8] sm:$0xff] }
 0x8e6   : > { %3795 = vmatpush2.msra.mxu1 %v3631_v55  ;;  %v3611_v53 = vpop.permute.xlu1 %3610  ;;  %3719 = vmatprep.subr.mxu0 %v3627_v11  ;;  %v3923_v55 = vld [vmem:[#allocation5 + $0x48] sm:$0xff]  ;;  %v3953_v11 = vld [vmem:[#allocation5 + $0x138] sm:$0xff] }
 0x8e7   : > { %v3626_v61 = vsel %vm893_vm2, %v3611_v53, %v3613_v63  ;;  %v3955_v63 = vld [vmem:[#allocation5 + $0x148] sm:$0xff]  ;;  %v3938_v53 = vld [vmem:[#allocation5 + $0xc0] sm:$0xff] }
 0x8e8   : > { %v3617_v60 = vpop.permute.xlu0 %3616  ;;  %3720 = vmatpush2.msra.mxu0 %v3626_v61  ;;  %v3952_v61 = vld [vmem:[#allocation5 + $0x130] sm:$0xff] }
 0x8e9   : > { %v3628_v17 = vsel %vm893_vm2, %v3615_v25, %v3617_v60  ;;  %3796 = vmatprep.subr.mxu1 %v3617_v60  ;;  %3722 = vmatmul.mubr.f32.vlgmr.msra.gmra.mxu0 %v3387_v18  ;;  %vm3819_vm2 = vcmask 261120   ;;  %v3940_v25 = vld [vmem:[#allocation5 + $0xd0] sm:$0xff]  ;;  %v3937_v60 = vld [vmem:[#allocation5 + $0xb8] sm:$0xff] }
 0x8ea   : > { %3797 = vmatpush2.msra.mxu1 %v3628_v17  ;;  %5342 = vmatprep.mubr.msk.f32.mxu0 %vm3650_vm4, %v3390_v40  ;;  %v3951_v17 = vld [vmem:[#allocation5 + $0x128] sm:$0xff] }
 0x8eb   : > { %3799 = vmatmul.mubr.f32.vlgmr.msra.gmra.mxu1 %v3387_v18  ;;  %4047 = vmatprep.subr.mxu1 %v5890_v45  ;;  %v3922_v18 = vld [vmem:[#allocation5 + $0x40] sm:$0xff] }
 0x8ec   : > { %5346 = vmatprep.mubr.msk.f32.mxu1 %vm3650_vm4, %v3390_v40  ;;  %4048 = vmatpush1.msra.mxu1 %v3961_v59  ;;  %v3921_v40 = vld [vmem:[#allocation5 + $0x38] sm:$0xff]  ;;  %v3931_v59 = vld [vmem:[#allocation5 + $0x88] sm:$0xff] }
 0x8ed   : > { %3728 = vmatmul.mubr.f32.gmra.mxu0 %v3389_v30  ;;  %4049 = vmatprep.subr.mxu1 %v5890_v45 }
 0x8ee   : > { %5362 = vmatprep.subr.mxu0 %v3945_v62  ;;  %4050 = vmatpush1.msra.mxu1 %v3960_v39 }
 0x8ef   : > { %3805 = vmatmul.mubr.f32.gmra.mxu1 %v3389_v30  ;;  %5363 = vmatpush3.msra.mxu0 %v3929_v19  ;;  %v3936_v30 = vld [vmem:[#allocation5 + $0xb0] sm:$0xff]  ;;  %v3915_v19 = vld [vmem:[#allocation5 + $0x8] sm:$0xff] }
 0x8f0   : > { %4051 = vmatprep.subr.mxu1 %v5890_v45  ;;  %5364 = vmatprep.subr.mxu0 %v3944_v41  ;;  %v3930_v41 = vld [vmem:[#allocation5 + $0x80] sm:$0xff] }
 0x8f1   : > { %4052 = vmatpush1.msra.mxu1 %v3959_v50  ;;  %5365 = vmatpush3.msra.mxu0 %v3928_v24  ;;  %v3964_v50 = vld [vmem:[#allocation5 + $0x190] sm:$0xff] }
 0x8f2   : > { %4053 = vmatprep.subr.mxu1 %v5890_v45  ;;  %5366 = vmatprep.subr.mxu0 %v3943_v13  ;;  %v3914_v13 = vld [vmem:[#allocation5] sm:$0xff] }
 0x8f3   : > { %v3648_v23 = vpop.permute.xlu1 %3647  ;;  %4054 = vmatpush1.msra.mxu1 %v3958_v15  ;;  %5367 = vmatpush3.msra.mxu0 %v3927_v12  ;;  %v3963_v12 = vld [vmem:[#allocation5 + $0x188] sm:$0xff] }
 0x8f4   : > { %4055 = vmatprep.subr.mxu1 %v5890_v45  ;;  %5368 = vmatprep.subr.mxu0 %v3942_v16 }
 0x8f5   : > { %v3643_v14 = vpop.permute.xlu0 %3642  ;;  %4056 = vmatpush1.msra.mxu1 %v3957_v46  ;;  %5369 = vmatpush3.msra.mxu0 %v3926_v28 }
 0x8f6   : > { %4057 = vmatprep.subr.mxu1 %v5890_v45  ;;  %5370 = vmatprep.subr.mxu0 %v3941_v56 }
 0x8f7   : > { %4058 = vmatpush1.msra.mxu1 %v3956_v37  ;;  %5371 = vmatpush3.msra.mxu0 %v3925_v47 }
 0x8f8   : > { %4059 = vmatprep.subr.mxu1 %v5890_v45  ;;  %5372 = vmatprep.subr.mxu0 %v3940_v25 }
 0x8f9   : > { %4060 = vmatpush1.msra.mxu1 %v3955_v63  ;;  %5373 = vmatpush3.msra.mxu0 %v3924_v7  ;;  %v3962_v7 = vld [vmem:[#allocation5 + $0x180] sm:$0xff] }
 0x8fa   : > { %4061 = vmatprep.subr.mxu1 %v5890_v45  ;;  %5374 = vmatprep.subr.mxu0 %v3939_v29 }
 0x8fb   : > { %4062 = vmatpush1.msra.mxu1 %v3954_v26  ;;  %5375 = vmatpush3.msra.mxu0 %v3923_v55 }
 0x8fc   : > { %4063 = vmatprep.subr.mxu1 %v5890_v45  ;;  %5376 = vmatprep.subr.mxu0 %v3938_v53 }
 0x8fd   : > { %4064 = vmatpush1.msra.mxu1 %v3953_v11  ;;  %5377 = vmatpush3.msra.mxu0 %v3922_v18 }
 0x8fe   : > { %4065 = vmatprep.subr.mxu1 %v5890_v45  ;;  %5378 = vmatprep.subr.mxu0 %v3937_v60 }
 0x8ff   : > { %4066 = vmatpush1.msra.mxu1 %v3952_v61  ;;  %5379 = vmatpush3.msra.mxu0 %v3921_v40 }
 0x900   : > { %4067 = vmatprep.subr.mxu1 %v5890_v45  ;;  %5380 = vmatprep.subr.mxu0 %v3936_v30 }
 0x901   : > { %4068 = vmatpush1.msra.mxu1 %v3951_v17 }
 0x902   : > { %4069 = vmatprep.subr.mxu1 %v5890_v45 }
 0x9a9   : > { %v3723_v34 = vpop.f32.mrf.mxu0 }
 0x9aa   : > { %v7551_v9 = vadd.f32 %v3723_v34, %v3643_v14  ;;  %v3920_v34 = vld [vmem:[#allocation5 + $0x30] sm:$0xff] }
 0x9ab   : > { %v3800_v20 = vpop.f32.mrf.mxu1  ;;  %v3725_v32 = vpop.f32.mrf.mxu0  ;;  %5381 = vmatpush3.msra.mxu0 %v3920_v34 }
 0x9ac   : > { %v7546_v36 = vadd.f32 %v3800_v20, %v3643_v14  ;;  %v7548_v44 = vadd.f32 %v3725_v32, %v3643_v14  ;;  %v3811_v42 = vmax.f32 %v7551_v9, 0.0  ;;  %v3935_v20 = vld [vmem:[#allocation5 + $0xa8] sm:$0xff] }
 0x9ad   : > { %v3802_v49 = vpop.f32.mrf.mxu1  ;;  %v3729_v10 = vpop.f32.mrf.mxu0  ;;  %v3919_v32 = vld [vmem:[#allocation5 + $0x28] sm:$0xff]  ;;  %5382 = vmatprep.subr.mxu0 %v3935_v20 }
 0x9ae   : > { %v3813_v8 = vmax.f32 %v7546_v36, 0.0  ;;  %v3803_v52 = vadd.f32 %v3802_v49, %v3643_v14  ;;  %v3812_v58 = vmax.f32 %v7548_v44, 0.0  ;;  %v7554_v4 = vadd.f32 %v3729_v10, %v3648_v23  ;;  %v3950_v14 = vld [vmem:[#allocation5 + $0x120] sm:$0xff]  ;;  %v3949_v49 = vld [vmem:[#allocation5 + $0x118] sm:$0xff]  ;;  %5383 = vmatpush3.msra.mxu0 %v3919_v32 }
 0x9af   : > { %v3806_v2 = vpop.f32.mrf.mxu1  ;;  %v3731_v43 = vpop.f32.mrf.mxu0  ;;  %4070 = vmatpush1.msra.mxu1 %v3950_v14  ;;  %v3934_v10 = vld [vmem:[#allocation5 + $0xa0] sm:$0xff] }
 0x9b0   : > { %v3814_v33 = vmax.f32 %v3803_v52, 0.0  ;;  %v7556_v31 = vadd.f32 %v3806_v2, %v3648_v23  ;;  %v5636_v38 = vpack.i.bf16 %v3813_v8, %v3812_v58  ;;  %v7562_v22 = vadd.f32 %v3731_v43, %v3648_v23  ;;  %4071 = vmatprep.subr.mxu1 %v5890_v45  ;;  %5384 = vmatprep.subr.mxu0 %v3934_v10  ;;  %v3918_v52 = vld [vmem:[#allocation5 + $0x20] sm:$0xff]  ;;  %v3947_v2 = vld [vmem:[#allocation5 + $0x108] sm:$0xff]  ;;  %v3917_v43 = vld [vmem:[#allocation5 + $0x18] sm:$0xff] }
 0x9b1   : > { %v3808_v35 = vpop.f32.mrf.mxu1  ;;  %v3815_v48 = vmax.f32 %v7554_v4, 0.0  ;;  %4072 = vmatpush1.msra.mxu1 %v3949_v49  ;;  %5385 = vmatpush3.msra.mxu0 %v3918_v52 }
 0x9b2   : > { %v7566_v27 = vsel %vm3819_vm2, %v3814_v33, 0.0  ;;  %v3817_v5 = vmax.f32 %v7556_v31, 0.0  ;;  %v3809_v6 = vadd.f32 %v3808_v35, %v3648_v23  ;;  %v3816_v21 = vmax.f32 %v7562_v22, 0.0  ;;  %5637 = vrot.lane.b32.xlu0 %v5636_v38, %s5883_s25  ;;  %v3948_v23 = vld [vmem:[#allocation5 + $0x110] sm:$0xff]  ;;  %4073 = vmatprep.subr.mxu1 %v5890_v45  ;;  %v3933_v33 = vld [vmem:[#allocation5 + $0x98] sm:$0xff]  ;;  %v3946_v38 = vld [vmem:[#allocation5 + $0x100] sm:$0xff] }
 0x9b3   : > { %3836 = vrot.lane.b32.xlu1 %v7566_v27, %s5883_s25  ;;  %4074 = vmatpush1.msra.mxu1 %v3948_v23  ;;  %v3932_v35 = vld [vmem:[#allocation5 + $0x90] sm:$0xff] }
 0x9b4   : > { %v5646_v57 = vpack.i.bf16 %v3815_v48, %v3817_v5  ;;  %v5641_v0 = vpack.i.bf16 %v3816_v21, %v3811_v42  ;;  %v3818_v51 = vmax.f32 %v3809_v6, 0.0  ;;  %4075 = vmatprep.subr.mxu1 %v5890_v45  ;;  %5386 = vmatprep.subr.mxu0 %v3933_v33  ;;  %v3916_v6 = vld [vmem:[#allocation5 + $0x10] sm:$0xff] }
 0x9b5   : > { %4076 = vmatpush1.msra.mxu1 %v3947_v2  ;;  %5387 = vmatpush3.msra.mxu0 %v3917_v43 }
 0x9b6   : > { %5642 = vrot.lane.b32.xlu0 %v5641_v0, %s5883_s25  ;;  %v7586_v54 = vsel %vm3819_vm2, %v3818_v51, 0.0  ;;  %4077 = vmatprep.subr.mxu1 %v5890_v45 }
 0x9b7   : > { %5647 = vrot.lane.b32.xlu1 %v5646_v57, %s5883_s25  ;;  %4078 = vmatpush1.msra.mxu1 %v3946_v38  ;;  %v3965_v57 = vld [vmem:[#allocation5 + $0x198] sm:$0xff] }
 0x9b8   : > { %5388 = vmatprep.subr.mxu0 %v3932_v35  ;;  %4103 = vmatprep.subr.mxu1 %v5890_v45 }
 0x9b9   : > { %5389 = vmatpush3.msra.mxu0 %v3916_v6  ;;  %4104 = vmatpush2.msra.mxu1 %v3965_v57  ;;  %v4272_v57 = vld [vmem:[#allocation7 + $0x1e8] sm:$0xff] }
 0x9ba   : > { %3844 = vrot.lane.b32.xlu0 %v7586_v54, %s5883_s25  ;;  %5390 = vmatprep.subr.mxu0 %v3931_v59  ;;  %v4267_v59 = vld [vmem:[#allocation7 + $0x1c0] sm:$0xff]  ;;  %s5895_s25 = smov 16  }
 0x9bb   : > { %4105 = vmatprep.subr.mxu1 %v5890_v45  ;;  %5391 = vmatpush3.msra.mxu0 %v3915_v19  ;;  %v4260_v19 = vld [vmem:[#allocation7 + $0x188] sm:$0xff] }
 0x9bc   : > { %4106 = vmatpush2.msra.mxu1 %v3964_v50  ;;  %5392 = vmatprep.subr.mxu0 %v3930_v41  ;;  %v4400_v50 = vld [vmem:[#allocation7 + $0x5e8] sm:$0xff]  ;;  %v4259_v41 = vld [vmem:[#allocation7 + $0x180] sm:$0xff] }
 0x9bd   : > { %4107 = vmatprep.subr.mxu1 %v5890_v45  ;;  %5393 = vmatpush3.msra.mxu0 %v3914_v13  ;;  %v4256_v13 = vld [vmem:[#allocation7 + $0x168] sm:$0xff] }
 0x9be   : > { %4108 = vmatpush2.msra.mxu1 %v3963_v12  ;;  %4524 = vmatprep.subr.mxu0 %v4272_v57  ;;  %v4395_v12 = vld [vmem:[#allocation7 + $0x5c0] sm:$0xff]  ;;  %v4344_v57 = vld [vmem:[#allocation7 + $0x428] sm:$0xff] }
 0x9bf   : > { %4109 = vmatprep.subr.mxu1 %v5890_v45 }
 0x9c0   : > { %4110 = vmatpush2.msra.mxu1 %v3962_v7  ;;  %v4384_v7 = vld [vmem:[#allocation7 + $0x568] sm:$0xff] }
 0x9c1   : > { %4595 = vmatprep.subr.mxu1 %v4400_v50  ;;  %v4328_v50 = vld [vmem:[#allocation7 + $0x3a8] sm:$0xff] }
 0xa24   : > { %v5638_v0 = vpop.permute.xlu0 %5637 }
 0xa25   : > { %v3837_v51 = vpop.permute.xlu1 %3836  ;;  %v5640_v39 = vunpack.i.h.bf16 %v5638_v0  ;;  %v5639_v62 = vunpack.i.l.bf16 %v5638_v0  ;;  %v4271_v0 = vld [vmem:[#allocation7 + $0x1e0] sm:$0xff] }
 0xa26   : > { %v3863_v9 = vmax.f32 %v7566_v27, %v3837_v51 }
 0xa27   : > { %v3847_v24 = vsel %vm629_vm5, %v5639_v62, %v5640_v39  ;;  %v3848_v15 = vsel %vm629_vm5, %v5640_v39, %v3837_v51  ;;  %v4268_v51 = vld [vmem:[#allocation7 + $0x1c8] sm:$0xff] }
 0xa28   : > { %v3861_v46 = vmax.f32 %v3812_v58, %v3847_v24  ;;  %v3862_v16 = vmax.f32 %v3813_v8, %v3848_v15  ;;  %v5643_v28 = vpop.permute.xlu0 %5642  ;;  %v4264_v39 = vld [vmem:[#allocation7 + $0x1a8] sm:$0xff]  ;;  %v4399_v24 = vld [vmem:[#allocation7 + $0x5e0] sm:$0xff] }
 0xa29   : > { %v5648_v37 = vpop.permute.xlu1 %5647  ;;  %v5645_v56 = vunpack.i.h.bf16 %v5643_v28  ;;  %v5644_v47 = vunpack.i.l.bf16 %v5643_v28  ;;  %v4396_v15 = vld [vmem:[#allocation7 + $0x5c8] sm:$0xff]  ;;  %v4391_v28 = vld [vmem:[#allocation7 + $0x5a0] sm:$0xff] }
 0xa2a   : > { %v5650_v63 = vunpack.i.h.bf16 %v5648_v37  ;;  %v5649_v25 = vunpack.i.l.bf16 %v5648_v37  ;;  %v5651_v26 = vpack.i.bf16 %v3862_v16, %v3861_v46  ;;  %v4252_v37 = vld [vmem:[#allocation7 + $0x148] sm:$0xff] }
 0xa2b   : > { %v3846_v29 = vsel %vm629_vm5, %v5644_v47, %v5639_v62  ;;  %v4263_v62 = vld [vmem:[#allocation7 + $0x1a0] sm:$0xff] }
 0xa2c   : > { %v3849_v44 = vsel %vm629_vm5, %v5650_v63, %v5645_v56  ;;  %v3850_v36 = vsel %vm629_vm5, %v5645_v56, %v5649_v25  ;;  %v3860_v8 = vmax.f32 %v3811_v42, %v3846_v29  ;;  %5652 = vrot.lane.b32.xlu1 %v5651_v26, %s5885_s16  ;;  %v3845_v55 = vpop.permute.xlu0 %3844  ;;  %v4388_v56 = vld [vmem:[#allocation7 + $0x588] sm:$0xff]  ;;  %v4251_v47 = vld [vmem:[#allocation7 + $0x140] sm:$0xff] }
 0xa2d   : > { %v3865_v58 = vmax.f32 %v3816_v21, %v3850_v36  ;;  %v3864_v11 = vmax.f32 %v3815_v48, %v3849_v44  ;;  %v3851_v53 = vsel %vm629_vm5, %v5649_v25, %v3845_v55  ;;  %v3867_v22 = vmax.f32 %v7586_v54, %v3845_v55  ;;  %v4387_v63 = vld [vmem:[#allocation7 + $0x580] sm:$0xff]  ;;  %v4248_v25 = vld [vmem:[#allocation7 + $0x128] sm:$0xff] }
 0xa2e   : > { %v3866_v18 = vmax.f32 %v3817_v5, %v3851_v53  ;;  %v4247_v26 = vld [vmem:[#allocation7 + $0x120] sm:$0xff]  ;;  %v4244_v44 = vld [vmem:[#allocation7 + $0x108] sm:$0xff]  ;;  %vm4183_vm5 = vcmask 293888  }
 0xa2f   : > { %v5656_v61 = vpack.i.bf16 %v3865_v58, %v3860_v8  ;;  %v4383_v29 = vld [vmem:[#allocation7 + $0x560] sm:$0xff]  ;;  %v4380_v36 = vld [vmem:[#allocation7 + $0x548] sm:$0xff] }
 0xa30   : > { %v5661_v60 = vpack.i.bf16 %v3864_v11, %v3866_v18  ;;  %v4240_v55 = vld [vmem:[#allocation7 + $0xe8] sm:$0xff]  ;;  %v4239_v53 = vld [vmem:[#allocation7 + $0xe0] sm:$0xff] }
 0xa31   : > { %5657 = vrot.lane.b32.xlu0 %v5656_v61, %s5885_s16  ;;  %v4236_v61 = vld [vmem:[#allocation7 + $0xc8] sm:$0xff] }
 0xa32   : > { %5662 = vrot.lane.b32.xlu1 %v5661_v60, %s5885_s16  ;;  %v4372_v60 = vld [vmem:[#allocation7 + $0x508] sm:$0xff] }
 0xa35   : > { %3882 = vrot.lane.b32.xlu0 %v3863_v9, %s5885_s16 }
 0xa36   : > { %3890 = vrot.lane.b32.xlu1 %v3867_v22, %s5885_s16  ;;  %s5896_s16 = smov 108  }
 0xa9e   : > { %v5653_v4 = vpop.permute.xlu1 %5652 }
 0xa9f   : > { %v5655_v48 = vunpack.i.h.bf16 %v5653_v4  ;;  %v5654_v42 = vunpack.i.l.bf16 %v5653_v4  ;;  %v4232_v4 = vld [vmem:[#allocation7 + $0xa8] sm:$0xff] }
 0xaa1   : > { %v3893_v31 = vsel %vm707_vm6, %v5654_v42, %v5655_v48 }
 0xaa2   : > { %v3907_v21 = vmax.f32 %v3861_v46, %v3893_v31  ;;  %v4255_v46 = vld [vmem:[#allocation7 + $0x160] sm:$0xff] }
 0xaa3   : > { %v5658_v5 = vpop.permute.xlu0 %5657  ;;  %v4367_v31 = vld [vmem:[#allocation7 + $0x4e0] sm:$0xff] }
 0xaa4   : > { %v5660_v40 = vunpack.i.h.bf16 %v5658_v5  ;;  %v5659_v17 = vunpack.i.l.bf16 %v5658_v5  ;;  %4036 = vmatprep.mubr.f32.mxu0 %v3907_v21  ;;  %v5663_v30 = vpop.permute.xlu1 %5662  ;;  %v4228_v5 = vld [vmem:[#allocation7 + $0x88] sm:$0xff] }
 0xaa5   : > { %v5665_v34 = vunpack.i.h.bf16 %v5663_v30  ;;  %v5664_v14 = vunpack.i.l.bf16 %v5663_v30  ;;  %v4364_v21 = vld [vmem:[#allocation7 + $0x4c8] sm:$0xff] }
 0xaa6   : > { %v3892_v27 = vsel %vm707_vm6, %v5659_v17, %v5654_v42  ;;  %v4231_v42 = vld [vmem:[#allocation7 + $0xa0] sm:$0xff]  ;;  %v4224_v30 = vld [vmem:[#allocation7 + $0x68] sm:$0xff] }
 0xaa7   : > { %v3906_v54 = vmax.f32 %v3860_v8, %v3892_v27  ;;  %v3883_v20 = vpop.permute.xlu0 %3882  ;;  %v3896_v23 = vsel %vm707_vm6, %v5660_v40, %v5664_v14  ;;  %v3895_v10 = vsel %vm707_vm6, %v5665_v34, %v5660_v40  ;;  %v4243_v8 = vld [vmem:[#allocation7 + $0x100] sm:$0xff]  ;;  %v4360_v27 = vld [vmem:[#allocation7 + $0x4a8] sm:$0xff] }
 0xaa8   : > { %v3894_v32 = vsel %vm707_vm6, %v5655_v48, %v3883_v20  ;;  %v3909_v49 = vmax.f32 %v3863_v9, %v3883_v20  ;;  %v3891_v2 = vpop.permute.xlu1 %3890  ;;  %v3911_v33 = vmax.f32 %v3865_v58, %v3896_v23  ;;  %v3910_v35 = vmax.f32 %v3864_v11, %v3895_v10  ;;  %v4379_v58 = vld [vmem:[#allocation7 + $0x540] sm:$0xff]  ;;  %v4376_v11 = vld [vmem:[#allocation7 + $0x528] sm:$0xff] }
 0xaa9   : > { %v3908_v52 = vmax.f32 %v3862_v16, %v3894_v32  ;;  %4037 = vmatmul.mubr.f32.vlgmr.msra.gmra.mxu0 %v3906_v54  ;;  %v3897_v43 = vsel %vm707_vm6, %v5664_v14, %v3891_v2  ;;  %v3913_v38 = vmax.f32 %v3867_v22, %v3891_v2  ;;  %v4392_v16 = vld [vmem:[#allocation7 + $0x5a8] sm:$0xff]  ;;  %v4235_v9 = vld [vmem:[#allocation7 + $0xc0] sm:$0xff]  ;;  %vm4190_vm6 = vcmask 424960  }
 0xaaa   : > { %5347 = vmatprep.mubr.msk.f32.mxu1 %vm3819_vm2, %v3909_v49  ;;  %4041 = vmatprep.mubr.f32.mxu0 %v3911_v33  ;;  %v3912_v6 = vmax.f32 %v3866_v18, %v3897_v43  ;;  %v4375_v18 = vld [vmem:[#allocation7 + $0x520] sm:$0xff]  ;;  %v4368_v48 = vld [vmem:[#allocation7 + $0x4e8] sm:$0xff] }
 0xaab   : > { %4112 = vmatmul.mubr.f32.vlgmr.msra.gmra.mxu1 %v3908_v52  ;;  %4525 = vmatpush1.msra.mxu0 %v4271_v0  ;;  %v4371_v22 = vld [vmem:[#allocation7 + $0x500] sm:$0xff]  ;;  %v4220_v54 = vld [vmem:[#allocation7 + $0x48] sm:$0xff] }
 0xaac   : > { %5348 = vmatprep.mubr.msk.f32.mxu1 %vm3819_vm2, %v3913_v38  ;;  %4526 = vmatprep.subr.mxu0 %v4268_v51  ;;  %v4227_v40 = vld [vmem:[#allocation7 + $0x80] sm:$0xff]  ;;  %v4356_v20 = vld [vmem:[#allocation7 + $0x488] sm:$0xff] }
 0xaad   : > { %4042 = vmatmul.mubr.f32.gmra.mxu0 %v3910_v35  ;;  %4596 = vmatpush1.msra.mxu1 %v4399_v24  ;;  %v4363_v17 = vld [vmem:[#allocation7 + $0x4c0] sm:$0xff]  ;;  %v4216_v23 = vld [vmem:[#allocation7 + $0x28] sm:$0xff] }
 0xaae   : > { %4527 = vmatpush1.msra.mxu0 %v4267_v59  ;;  %4597 = vmatprep.subr.mxu1 %v4396_v15  ;;  %v4223_v34 = vld [vmem:[#allocation7 + $0x60] sm:$0xff]  ;;  %v4352_v10 = vld [vmem:[#allocation7 + $0x468] sm:$0xff] }
 0xaaf   : > { %4117 = vmatmul.mubr.f32.gmra.mxu1 %v3912_v6  ;;  %4528 = vmatprep.subr.mxu0 %v4264_v39  ;;  %v4359_v14 = vld [vmem:[#allocation7 + $0x4a0] sm:$0xff]  ;;  %v4212_v33 = vld [vmem:[#allocation7 + $0x8] sm:$0xff] }
 0xab0   : > { %4529 = vmatpush1.msra.mxu0 %v4263_v62  ;;  %4598 = vmatpush1.msra.mxu1 %v4395_v12  ;;  %v4219_v32 = vld [vmem:[#allocation7 + $0x40] sm:$0xff]  ;;  %v4348_v43 = vld [vmem:[#allocation7 + $0x448] sm:$0xff] }
 0xab1   : > { %4530 = vmatprep.subr.mxu0 %v4260_v19  ;;  %4599 = vmatprep.subr.mxu1 %v4392_v16  ;;  %v4355_v49 = vld [vmem:[#allocation7 + $0x480] sm:$0xff]  ;;  %v4336_v6 = vld [vmem:[#allocation7 + $0x3e8] sm:$0xff] }
 0xab2   : > { %4531 = vmatpush1.msra.mxu0 %v4259_v41  ;;  %4600 = vmatpush1.msra.mxu1 %v4391_v28  ;;  %v4215_v52 = vld [vmem:[#allocation7 + $0x20] sm:$0xff]  ;;  %v4332_v59 = vld [vmem:[#allocation7 + $0x3c8] sm:$0xff] }
 0xab3   : > { %4532 = vmatprep.subr.mxu0 %v4256_v13  ;;  %4601 = vmatprep.subr.mxu1 %v4388_v56  ;;  %v4351_v2 = vld [vmem:[#allocation7 + $0x460] sm:$0xff]  ;;  %v4340_v39 = vld [vmem:[#allocation7 + $0x408] sm:$0xff] }
 0xab4   : > { %4533 = vmatpush1.msra.mxu0 %v4255_v46  ;;  %4602 = vmatpush1.msra.mxu1 %v4387_v63  ;;  %v4211_v38 = vld [vmem:[#allocation7] sm:$0xff]  ;;  %v4464_v41 = vld [vmem:[#allocation7 + $0x7e8] sm:$0xff] }
 0xab5   : > { %4534 = vmatprep.subr.mxu0 %v4252_v37  ;;  %4603 = vmatprep.subr.mxu1 %v4384_v7  ;;  %v4347_v35 = vld [vmem:[#allocation7 + $0x440] sm:$0xff]  ;;  %v4324_v13 = vld [vmem:[#allocation7 + $0x388] sm:$0xff] }
 0xab6   : > { %4535 = vmatpush1.msra.mxu0 %v4251_v47  ;;  %4604 = vmatpush1.msra.mxu1 %v4383_v29  ;;  %v4335_v0 = vld [vmem:[#allocation7 + $0x3e0] sm:$0xff]  ;;  %v4460_v12 = vld [vmem:[#allocation7 + $0x7c8] sm:$0xff] }
 0xab7   : > { %4536 = vmatprep.subr.mxu0 %v4248_v25  ;;  %4605 = vmatprep.subr.mxu1 %v4380_v36  ;;  %v4343_v51 = vld [vmem:[#allocation7 + $0x420] sm:$0xff]  ;;  %v4320_v28 = vld [vmem:[#allocation7 + $0x368] sm:$0xff] }
 0xab8   : > { %4537 = vmatpush1.msra.mxu0 %v4247_v26  ;;  %4606 = vmatpush1.msra.mxu1 %v4379_v58  ;;  %v4331_v62 = vld [vmem:[#allocation7 + $0x3c0] sm:$0xff]  ;;  %v4456_v37 = vld [vmem:[#allocation7 + $0x7a8] sm:$0xff] }
 0xab9   : > { %4538 = vmatprep.subr.mxu0 %v4244_v44  ;;  %4607 = vmatprep.subr.mxu1 %v4376_v11  ;;  %v4339_v19 = vld [vmem:[#allocation7 + $0x400] sm:$0xff]  ;;  %v4316_v63 = vld [vmem:[#allocation7 + $0x348] sm:$0xff] }
 0xaba   : > { %4539 = vmatpush1.msra.mxu0 %v4243_v8  ;;  %4608 = vmatpush1.msra.mxu1 %v4375_v18  ;;  %v4327_v24 = vld [vmem:[#allocation7 + $0x3a0] sm:$0xff]  ;;  %v4452_v25 = vld [vmem:[#allocation7 + $0x788] sm:$0xff] }
 0xabb   : > { %4540 = vmatprep.subr.mxu0 %v4240_v55  ;;  %4609 = vmatprep.subr.mxu1 %v4372_v60  ;;  %v4463_v15 = vld [vmem:[#allocation7 + $0x7e0] sm:$0xff]  ;;  %v4312_v26 = vld [vmem:[#allocation7 + $0x328] sm:$0xff] }
 0xabc   : > { %4541 = vmatpush1.msra.mxu0 %v4239_v53  ;;  %4610 = vmatpush1.msra.mxu1 %v4371_v22  ;;  %v4323_v46 = vld [vmem:[#allocation7 + $0x380] sm:$0xff]  ;;  %v4308_v44 = vld [vmem:[#allocation7 + $0x308] sm:$0xff] }
 0xabd   : > { %4542 = vmatprep.subr.mxu0 %v4236_v61  ;;  %4611 = vmatprep.subr.mxu1 %v4368_v48  ;;  %v4459_v16 = vld [vmem:[#allocation7 + $0x7c0] sm:$0xff]  ;;  %v4304_v8 = vld [vmem:[#allocation7 + $0x2e8] sm:$0xff] }
 0xabe   : > { %4543 = vmatpush1.msra.mxu0 %v4235_v9  ;;  %4612 = vmatpush1.msra.mxu1 %v4367_v31  ;;  %v4319_v56 = vld [vmem:[#allocation7 + $0x360] sm:$0xff]  ;;  %v4300_v55 = vld [vmem:[#allocation7 + $0x2c8] sm:$0xff] }
 0xabf   : > { %4544 = vmatprep.subr.mxu0 %v4232_v4  ;;  %4613 = vmatprep.subr.mxu1 %v4364_v21  ;;  %v4455_v47 = vld [vmem:[#allocation7 + $0x7a0] sm:$0xff]  ;;  %v4296_v18 = vld [vmem:[#allocation7 + $0x2a8] sm:$0xff] }
 0xac0   : > { %4545 = vmatpush1.msra.mxu0 %v4231_v42  ;;  %4614 = vmatpush1.msra.mxu1 %v4363_v17  ;;  %v4315_v7 = vld [vmem:[#allocation7 + $0x340] sm:$0xff]  ;;  %v4448_v61 = vld [vmem:[#allocation7 + $0x768] sm:$0xff] }
 0xac1   : > { %4546 = vmatprep.subr.mxu0 %v4228_v5  ;;  %4615 = vmatprep.subr.mxu1 %v4360_v27  ;;  %v4311_v29 = vld [vmem:[#allocation7 + $0x320] sm:$0xff]  ;;  %v4292_v22 = vld [vmem:[#allocation7 + $0x288] sm:$0xff] }
 0xac2   : > { %4547 = vmatpush1.msra.mxu0 %v4227_v40  ;;  %4616 = vmatpush1.msra.mxu1 %v4359_v14  ;;  %v4307_v36 = vld [vmem:[#allocation7 + $0x300] sm:$0xff]  ;;  %v4444_v4 = vld [vmem:[#allocation7 + $0x748] sm:$0xff] }
 0xac3   : > { %4548 = vmatprep.subr.mxu0 %v4224_v30  ;;  %4617 = vmatprep.subr.mxu1 %v4356_v20  ;;  %v4303_v58 = vld [vmem:[#allocation7 + $0x2e0] sm:$0xff]  ;;  %v4288_v5 = vld [vmem:[#allocation7 + $0x268] sm:$0xff] }
 0xac4   : > { %4549 = vmatpush1.msra.mxu0 %v4223_v34  ;;  %4618 = vmatpush1.msra.mxu1 %v4355_v49  ;;  %v4299_v11 = vld [vmem:[#allocation7 + $0x2c0] sm:$0xff]  ;;  %v4440_v21 = vld [vmem:[#allocation7 + $0x728] sm:$0xff] }
 0xac5   : > { %4550 = vmatprep.subr.mxu0 %v4220_v54  ;;  %4619 = vmatprep.subr.mxu1 %v4352_v10  ;;  %v4451_v53 = vld [vmem:[#allocation7 + $0x780] sm:$0xff]  ;;  %v4284_v34 = vld [vmem:[#allocation7 + $0x248] sm:$0xff] }
 0xac6   : > { %4551 = vmatpush1.msra.mxu0 %v4219_v32  ;;  %4620 = vmatpush1.msra.mxu1 %v4351_v2  ;;  %v4295_v60 = vld [vmem:[#allocation7 + $0x2a0] sm:$0xff]  ;;  %v4436_v14 = vld [vmem:[#allocation7 + $0x708] sm:$0xff] }
 0xac7   : > { %4552 = vmatprep.subr.mxu0 %v4216_v23  ;;  %4621 = vmatprep.subr.mxu1 %v4348_v43  ;;  %v4447_v9 = vld [vmem:[#allocation7 + $0x760] sm:$0xff]  ;;  %v4432_v2 = vld [vmem:[#allocation7 + $0x6e8] sm:$0xff] }
 0xac8   : > { %4553 = vmatpush1.msra.mxu0 %v4215_v52  ;;  %4622 = vmatpush1.msra.mxu1 %v4347_v35  ;;  %v4291_v42 = vld [vmem:[#allocation7 + $0x280] sm:$0xff]  ;;  %v4280_v52 = vld [vmem:[#allocation7 + $0x228] sm:$0xff] }
 0xac9   : > { %4554 = vmatprep.subr.mxu0 %v4212_v33  ;;  %4623 = vmatprep.subr.mxu1 %v4344_v57  ;;  %v4443_v31 = vld [vmem:[#allocation7 + $0x740] sm:$0xff]  ;;  %v4276_v35 = vld [vmem:[#allocation7 + $0x208] sm:$0xff] }
 0xaca   : > { %4555 = vmatpush1.msra.mxu0 %v4211_v38  ;;  %4624 = vmatpush1.msra.mxu1 %v4343_v51  ;;  %v4287_v40 = vld [vmem:[#allocation7 + $0x260] sm:$0xff] }
 0xacb   : > { %4556 = vmatprep.subr.mxu0 %v4336_v6  ;;  %4625 = vmatprep.subr.mxu1 %v4340_v39  ;;  %v4439_v17 = vld [vmem:[#allocation7 + $0x720] sm:$0xff]  ;;  %v4428_v6 = vld [vmem:[#allocation7 + $0x6c8] sm:$0xff] }
 0xacc   : > { %4557 = vmatpush2.msra.mxu0 %v4335_v0  ;;  %4626 = vmatpush1.msra.mxu1 %v4339_v19  ;;  %v4283_v49 = vld [vmem:[#allocation7 + $0x240] sm:$0xff]  ;;  %v4424_v19 = vld [vmem:[#allocation7 + $0x6a8] sm:$0xff] }
 0xacd   : > { %4558 = vmatprep.subr.mxu0 %v4332_v59  ;;  %4627 = vmatprep.subr.mxu1 %v4464_v41  ;;  %v4435_v23 = vld [vmem:[#allocation7 + $0x700] sm:$0xff] }
 0xace   : > { %4559 = vmatpush2.msra.mxu0 %v4331_v62  ;;  %4628 = vmatpush2.msra.mxu1 %v4463_v15  ;;  %v4279_v33 = vld [vmem:[#allocation7 + $0x220] sm:$0xff] }
 0xacf   : > { %4560 = vmatprep.subr.mxu0 %v4328_v50  ;;  %4629 = vmatprep.subr.mxu1 %v4460_v12  ;;  %v4431_v38 = vld [vmem:[#allocation7 + $0x6e0] sm:$0xff]  ;;  %v4496_v50 = vld [vmem:[#allocation7 + $0x8e8] sm:$0xff] }
 0xad0   : > { %4561 = vmatpush2.msra.mxu0 %v4327_v24  ;;  %4630 = vmatpush2.msra.mxu1 %v4459_v16  ;;  %v4275_v51 = vld [vmem:[#allocation7 + $0x200] sm:$0xff]  ;;  %v4420_v12 = vld [vmem:[#allocation7 + $0x688] sm:$0xff] }
 0xad1   : > { %4562 = vmatprep.subr.mxu0 %v4324_v13  ;;  %4631 = vmatprep.subr.mxu1 %v4456_v37  ;;  %v4427_v59 = vld [vmem:[#allocation7 + $0x6c0] sm:$0xff]  ;;  %v4416_v16 = vld [vmem:[#allocation7 + $0x668] sm:$0xff] }
 0xad2   : > { %4563 = vmatpush2.msra.mxu0 %v4323_v46  ;;  %4632 = vmatpush2.msra.mxu1 %v4455_v47  ;;  %v4423_v41 = vld [vmem:[#allocation7 + $0x6a0] sm:$0xff] }
 0xad3   : > { %4564 = vmatprep.subr.mxu0 %v4320_v28  ;;  %4633 = vmatprep.subr.mxu1 %v4452_v25  ;;  %v4419_v46 = vld [vmem:[#allocation7 + $0x680] sm:$0xff] }
 0xad4   : > { %4565 = vmatpush2.msra.mxu0 %v4319_v56  ;;  %4634 = vmatpush2.msra.mxu1 %v4451_v53  ;;  %v4415_v47 = vld [vmem:[#allocation7 + $0x660] sm:$0xff] }
 0xad5   : > { %4566 = vmatprep.subr.mxu0 %v4316_v63  ;;  %4635 = vmatprep.subr.mxu1 %v4448_v61  ;;  %v4412_v63 = vld [vmem:[#allocation7 + $0x648] sm:$0xff]  ;;  %v4411_v25 = vld [vmem:[#allocation7 + $0x640] sm:$0xff] }
 0xad6   : > { %4567 = vmatpush2.msra.mxu0 %v4315_v7  ;;  %4636 = vmatpush2.msra.mxu1 %v4447_v9 }
 0xad7   : > { %4568 = vmatprep.subr.mxu0 %v4312_v26  ;;  %4637 = vmatprep.subr.mxu1 %v4444_v4 }
 0xad8   : > { %4569 = vmatpush2.msra.mxu0 %v4311_v29  ;;  %4638 = vmatpush2.msra.mxu1 %v4443_v31  ;;  %v4408_v29 = vld [vmem:[#allocation7 + $0x628] sm:$0xff] }
 0xad9   : > { %4570 = vmatprep.subr.mxu0 %v4308_v44  ;;  %4639 = vmatprep.subr.mxu1 %v4440_v21  ;;  %v4407_v44 = vld [vmem:[#allocation7 + $0x620] sm:$0xff] }
 0xada   : > { %4571 = vmatpush2.msra.mxu0 %v4307_v36  ;;  %4640 = vmatpush2.msra.mxu1 %v4439_v17  ;;  %v4404_v36 = vld [vmem:[#allocation7 + $0x608] sm:$0xff] }
 0xadb   : > { %4572 = vmatprep.subr.mxu0 %v4304_v8  ;;  %4641 = vmatprep.subr.mxu1 %v4436_v14 }
 0xadc   : > { %4573 = vmatpush2.msra.mxu0 %v4303_v58  ;;  %4642 = vmatpush2.msra.mxu1 %v4435_v23  ;;  %v4403_v58 = vld [vmem:[#allocation7 + $0x600] sm:$0xff] }
 0xadd   : > { %4574 = vmatprep.subr.mxu0 %v4300_v55  ;;  %4643 = vmatprep.subr.mxu1 %v4432_v2  ;;  %v4274_v55 = vld [vmem:[#allocation7 + $0x1f8] sm:$0xff]  ;;  %v4487_v2 = vld [vmem:[#allocation7 + $0x8a0] sm:$0xff] }
 0xade   : > { %4575 = vmatpush2.msra.mxu0 %v4299_v11  ;;  %4644 = vmatpush2.msra.mxu1 %v4431_v38 }
 0xadf   : > { %4576 = vmatprep.subr.mxu0 %v4296_v18  ;;  %4645 = vmatprep.subr.mxu1 %v4428_v6  ;;  %v4480_v6 = vld [vmem:[#allocation7 + $0x868] sm:$0xff] }
 0xae0   : > { %4577 = vmatpush2.msra.mxu0 %v4295_v60  ;;  %4646 = vmatpush2.msra.mxu1 %v4427_v59  ;;  %v4476_v59 = vld [vmem:[#allocation7 + $0x848] sm:$0xff] }
 0xae1   : > { %4578 = vmatprep.subr.mxu0 %v4292_v22  ;;  %4647 = vmatprep.subr.mxu1 %v4424_v19 }
 0xae2   : > { %4579 = vmatpush2.msra.mxu0 %v4291_v42  ;;  %4648 = vmatpush2.msra.mxu1 %v4423_v41 }
 0xae3   : > { %4580 = vmatprep.subr.mxu0 %v4288_v5  ;;  %4649 = vmatprep.subr.mxu1 %v4420_v12  ;;  %v4471_v12 = vld [vmem:[#allocation7 + $0x820] sm:$0xff] }
 0xae4   : > { %4581 = vmatpush2.msra.mxu0 %v4287_v40  ;;  %4650 = vmatpush2.msra.mxu1 %v4419_v46  ;;  %v4273_v46 = vld [vmem:[#allocation7 + $0x1f0] sm:$0xff] }
 0xae5   : > { %4582 = vmatprep.subr.mxu0 %v4284_v34  ;;  %4651 = vmatprep.subr.mxu1 %v4416_v16 }
 0xae6   : > { %4583 = vmatpush2.msra.mxu0 %v4283_v49  ;;  %4652 = vmatpush2.msra.mxu1 %v4415_v47  ;;  %v4491_v49 = vld [vmem:[#allocation7 + $0x8c0] sm:$0xff] }
 0xae7   : > { %4584 = vmatprep.subr.mxu0 %v4280_v52  ;;  %4653 = vmatprep.subr.mxu1 %v4412_v63  ;;  %v4488_v52 = vld [vmem:[#allocation7 + $0x8a8] sm:$0xff]  ;;  %v4269_v63 = vld [vmem:[#allocation7 + $0x1d0] sm:$0xff] }
 0xae8   : > { %4585 = vmatpush2.msra.mxu0 %v4279_v33  ;;  %4654 = vmatpush2.msra.mxu1 %v4411_v25  ;;  %v4484_v33 = vld [vmem:[#allocation7 + $0x888] sm:$0xff] }
 0xae9   : > { %4586 = vmatprep.subr.mxu0 %v4276_v35  ;;  %4655 = vmatprep.subr.mxu1 %v4408_v29  ;;  %v4265_v29 = vld [vmem:[#allocation7 + $0x1b0] sm:$0xff] }
 0xaea   : > { %4587 = vmatpush2.msra.mxu0 %v4275_v51  ;;  %4656 = vmatpush2.msra.mxu1 %v4407_v44  ;;  %v4401_v44 = vld [vmem:[#allocation7 + $0x5f0] sm:$0xff] }
 0xaeb   : > { %4682 = vmatprep.subr.mxu0 %v4496_v50  ;;  %4657 = vmatprep.subr.mxu1 %v4404_v36  ;;  %v4262_v36 = vld [vmem:[#allocation7 + $0x198] sm:$0xff] }
 0xaec   : > { %4658 = vmatpush2.msra.mxu1 %v4403_v58  ;;  %v4261_v58 = vld [vmem:[#allocation7 + $0x190] sm:$0xff] }
 0xaed   : > { %4737 = vmatprep.subr.mxu1 %v4274_v55  ;;  %v4397_v55 = vld [vmem:[#allocation7 + $0x5d0] sm:$0xff] }
 0xb69   : > { %v5394_v48 = vpop.f32.mrf.mxu0 }
 0xb6b   : > { %v5395_v30 = vpop.f32.mrf.mxu0  ;;  %v4113_v27 = vpop.f32.mrf.mxu1 }
 0xb6c   : > { %v5396_v54 = vadd.f32 %v5395_v30, %v5394_v48 }
 0xb6d   : > { %v5397_v20 = vpop.f32.mrf.mxu0  ;;  %v4115_v32 = vpop.f32.mrf.mxu1 }
 0xb6e   : > { %v7641_v10 = vadd.f32 %v5396_v54, %v4113_v27  ;;  %v4495_v54 = vld [vmem:[#allocation7 + $0x8e0] sm:$0xff]  ;;  %v4492_v32 = vld [vmem:[#allocation7 + $0x8c8] sm:$0xff] }
 0xb6f   : > { %v4118_v43 = vpop.f32.mrf.mxu1  ;;  %v5398_v39 = vpop.f32.mrf.mxu0 }
 0xb70   : > { %v4135_v57 = vrot.slane %v7641_v10, 4  ;;  %v4131_v0 = vrot.slane %v7641_v10, 3  ;;  %v5399_v24 = vadd.f32 %v5398_v39, %v5397_v20  ;;  %v4139_v15 = vrot.slane %v7641_v10, 5 }
 0xb71   : > { %v4120_v62 = vpop.f32.mrf.mxu1  ;;  %v4123_v13 = vrot.slane %v7641_v10, 1  ;;  %v4143_v37 = vrot.slane %v7641_v10, 6  ;;  %v4127_v56 = vrot.slane %v7641_v10, 2  ;;  %v4147_v7 = vrot.slane %v7641_v10, 7 }
 0xb72   : > { %4136 = vrot.lane.b32.xlu1 %v4135_v57, %s5895_s25  ;;  %4132 = vrot.lane.b32.xlu0 %v4131_v0, %s5896_s16  ;;  %v4119_v28 = vadd.f32 %v5399_v24, %v4118_v43  ;;  %s5909_s25 = smov 28   ;;  %v4483_v43 = vld [vmem:[#allocation7 + $0x880] sm:$0xff]  ;;  %v4472_v24 = vld [vmem:[#allocation7 + $0x828] sm:$0xff] }
 0xb73   : > { %v4479_v0 = vld [vmem:[#allocation7 + $0x860] sm:$0xff] }
 0xb74   : > { %v4159_v26 = vrot.slane %v4119_v28, 2  ;;  %v4167_v8 = vrot.slane %v4119_v28, 4  ;;  %v4163_v11 = vrot.slane %v4119_v28, 3  ;;  %v4171_v53 = vrot.slane %v4119_v28, 5  ;;  %v4475_v62 = vld [vmem:[#allocation7 + $0x840] sm:$0xff] }
 0xb75   : > { %v4155_v18 = vrot.slane %v4119_v28, 1  ;;  %v4175_v61 = vrot.slane %v4119_v28, 6  ;;  %v4179_v60 = vrot.slane %v4119_v28, 7 }
 0xb76   : > { %4140 = vrot.lane.b32.xlu0 %v4139_v15, %s5897_s20  ;;  %4124 = vrot.lane.b32.xlu1 %v4123_v13, %s5898_s10  ;;  %s552_s10 = sand.u32 1, %s5864_s19  }
 0xb7a   : > { %4144 = vrot.lane.b32.xlu0 %v4143_v37, %s5899_s27  ;;  %4128 = vrot.lane.b32.xlu1 %v4127_v56, %s5900_s18  ;;  %v4270_v37 = vld [vmem:[#allocation7 + $0x1d8] sm:$0xff]  ;;  %v4467_v56 = vld [vmem:[#allocation7 + $0x800] sm:$0xff]  ;;  %s5351_s27 = sshll.u32 %s6012_s22, 4  ;;  %s553_s18 = scalar_lea.vmem [#allocation11], %s552_s10 }
 0xb7e   : > { %4148 = vrot.lane.b32.xlu0 %v4147_v7, %s5901_s17  ;;  %4160 = vrot.lane.b32.xlu1 %v4159_v26, %s5902_s29  ;;  %v4266_v7 = vld [vmem:[#allocation7 + $0x1b8] sm:$0xff]  ;;  %s5185_s17 = sshll.u32 %s553_s18, 4  ;;  %s5186_s17 = int_to_ptr.vmem [resolvable:$true] %s5185_s17 }
 0xb7f   : > { %v4402_v26 = vld [vmem:[#allocation7 + $0x5f8] sm:$0xff] }
 0xb82   : > { %4152 = vrot.lane.b32.xlu0 %v4119_v28, %s5903_s15  ;;  %4168 = vrot.lane.b32.xlu1 %v4167_v8, %s5904_s26  ;;  %v4468_v28 = vld [vmem:[#allocation7 + $0x808] sm:$0xff]  ;;  %v4398_v8 = vld [vmem:[#allocation7 + $0x5d8] sm:$0xff]  ;;  %s7982_s26 = sld [smem:[#allocation23_spill]] }
 0xb86   : > { %4164 = vrot.lane.b32.xlu0 %v4163_v11, %s5905_s24  ;;  %4172 = vrot.lane.b32.xlu1 %v4171_v53, %s5906_s30  ;;  %v4258_v11 = vld [vmem:[#allocation7 + $0x178] sm:$0xff]  ;;  %s5173_s30 = scalar_lea.sflag [#allocation4], %s552_s10 }
 0xb87   : > { %v4394_v53 = vld [vmem:[#allocation7 + $0x5b8] sm:$0xff] }
 0xb88   : > { %s5183_s24 = scalar_lea.hbm %s7982_s26, %s5351_s27 }
 0xb8a   : > { %4156 = vrot.lane.b32.xlu0 %v4155_v18, %s5907_s23  ;;  %4176 = vrot.lane.b32.xlu1 %v4175_v61, %s5908_s21  ;;  %v4257_v18 = vld [vmem:[#allocation7 + $0x170] sm:$0xff]  ;;  %s5800_s23 = scalar_lea.vmem %s5186_s17, 16  ;;  %s5910_s21 = smov [#allocation11]  }
 0xb8b   : > { %v4393_v61 = vld [vmem:[#allocation7 + $0x5b0] sm:$0xff]  ;;  %p5801_p7 = scmp.ne.s32.totalorder %s5186_s17, %s5800_s23 }
 0xb8d   : > { %p5802_p9 = pnand %p5801_p7, %p7983_p8 }
 0xb8e   : > { %4180 = vrot.lane.b32.xlu0 %v4179_v60, %s5909_s25  ;;  %v4254_v60 = vld [vmem:[#allocation7 + $0x158] sm:$0xff]  ;;  %s5804_s25 = sshll.u32 %s5910_s21, 4  ;;  %s5805_s25 = int_to_ptr.vmem [resolvable:$false] %s5804_s25 }
 0xb8f   : > { %p5803_p11 = pneg %p5802_p9  ;;  %s5806_s22 = scalar_lea.vmem %s5805_s25, 32 }
 0xb90   : > { %p5807_p5 = scmp.lt.s32.totalorder %s5186_s17, %s5805_s25  ;;  %p5808_p6 = scmp.lt.s32.totalorder %s5806_s22, %s5800_s23 }
 0xb92   : > { %p5809_p0 = por %p5808_p6, %p5807_p5 }
 0xb94   : > { %p5810_p10 = pnand %p5809_p0, %p5803_p11 }
 0xbe4   : > { %v4137_v9 = vpop.permute.xlu1 %4136  ;;  %v4133_v22 = vpop.permute.xlu0 %4132 }
 0xbe5   : > { %v4189_v5 = vsel %vm3650_vm4, %v4133_v22, %v4137_v9  ;;  %vm4201_vm4 = vcmask 97280   ;;  %v4390_v9 = vld [vmem:[#allocation7 + $0x598] sm:$0xff] }
 0xbe8   : > { %v4141_v4 = vpop.permute.xlu0 %4140  ;;  %v4125_v48 = vpop.permute.xlu1 %4124 }
 0xbe9   : > { %v4184_v21 = vsel %vm4183_vm5, %v7641_v10, %v4125_v48  ;;  %v4191_v40 = vsel %vm4190_vm6, %v4189_v5, %v4141_v4  ;;  %v4389_v4 = vld [vmem:[#allocation7 + $0x590] sm:$0xff]  ;;  %v4250_v48 = vld [vmem:[#allocation7 + $0x138] sm:$0xff] }
 0xbea   : > { %v4385_v5 = vld [vmem:[#allocation7 + $0x570] sm:$0xff] }
 0xbec   : > { %v4145_v42 = vpop.permute.xlu0 %4144  ;;  %v4129_v31 = vpop.permute.xlu1 %4128 }
 0xbed   : > { %v4186_v17 = vsel %vm4185_vm14, %v4184_v21, %v4129_v31  ;;  %v4193_v30 = vsel %vm4192_vm15, %v4191_v40, %v4145_v42  ;;  %v4386_v42 = vld [vmem:[#allocation7 + $0x578] sm:$0xff]  ;;  %v4249_v31 = vld [vmem:[#allocation7 + $0x130] sm:$0xff] }
 0xbee   : > { %v7654_v20 = vsel %vm4187_vm3, %v4186_v17, %v4133_v22  ;;  %v4253_v22 = vld [vmem:[#allocation7 + $0x150] sm:$0xff]  ;;  %v4246_v21 = vld [vmem:[#allocation7 + $0x118] sm:$0xff] }
 0xbef   : > { %v4382_v40 = vld [vmem:[#allocation7 + $0x558] sm:$0xff]  ;;  %v4245_v17 = vld [vmem:[#allocation7 + $0x110] sm:$0xff] }
 0xbf0   : > { %v4149_v27 = vpop.permute.xlu0 %4148  ;;  %v4161_v34 = vpop.permute.xlu1 %4160 }
 0xbf1   : > { %v7652_v14 = vsel %vm4194_vm1, %v4193_v30, %v4149_v27  ;;  %v4381_v30 = vld [vmem:[#allocation7 + $0x550] sm:$0xff] }
 0xbf2   : > { %4588 = vmatprep.mubr.f32.mxu0 %v7652_v14 }
 0xbf3   : > { %4589 = vmatmul.mubr.f32.vlgmr.msra.gmra.mxu0 %v7654_v20 }
 0xbf4   : > { %4683 = vmatpush1.msra.mxu0 %v4495_v54  ;;  %v4153_v23 = vpop.permute.xlu0 %4152  ;;  %v4169_v10 = vpop.permute.xlu1 %4168  ;;  %4730 = vmatprep.mubr.f32.mxu0 %v5890_v45  ;;  %v4377_v54 = vld [vmem:[#allocation7 + $0x530] sm:$0xff] }
 0xbf5   : > { %4684 = vmatprep.subr.mxu0 %v4492_v32  ;;  %v4196_v19 = vsel %vm3819_vm2, %v4149_v27, %v4153_v23  ;;  %v4242_v27 = vld [vmem:[#allocation7 + $0xf8] sm:$0xff]  ;;  %v4237_v23 = vld [vmem:[#allocation7 + $0xd0] sm:$0xff] }
 0xbf6   : > { %4685 = vmatpush1.msra.mxu0 %v4491_v49  ;;  %v4238_v32 = vld [vmem:[#allocation7 + $0xd8] sm:$0xff] }
 0xbf7   : > { %4686 = vmatprep.subr.mxu0 %v4488_v52  ;;  %v4374_v49 = vld [vmem:[#allocation7 + $0x518] sm:$0xff] }
 0xbf8   : > { %4687 = vmatpush1.msra.mxu0 %v4487_v2  ;;  %v4165_v38 = vpop.permute.xlu0 %4164  ;;  %v4173_v35 = vpop.permute.xlu1 %4172  ;;  %v4234_v52 = vld [vmem:[#allocation7 + $0xb8] sm:$0xff] }
 0xbf9   : > { %v4202_v57 = vsel %vm4201_vm4, %v4161_v34, %v4165_v38  ;;  %4688 = vmatprep.subr.mxu0 %v4484_v33  ;;  %v4370_v2 = vld [vmem:[#allocation7 + $0x4f8] sm:$0xff]  ;;  %v4233_v33 = vld [vmem:[#allocation7 + $0xb0] sm:$0xff] }
 0xbfa   : > { %v4204_v51 = vsel %vm4203_vm10, %v4202_v57, %v4169_v10  ;;  %4689 = vmatpush1.msra.mxu0 %v4483_v43  ;;  %v4373_v10 = vld [vmem:[#allocation7 + $0x510] sm:$0xff]  ;;  %v4230_v38 = vld [vmem:[#allocation7 + $0x98] sm:$0xff] }
 0xbfb   : > { %v4206_v39 = vsel %vm4205_vm7, %v4204_v51, %v4173_v35  ;;  %4690 = vmatprep.subr.mxu0 %v4480_v6  ;;  %v4369_v43 = vld [vmem:[#allocation7 + $0x4f0] sm:$0xff]  ;;  %v4366_v35 = vld [vmem:[#allocation7 + $0x4d8] sm:$0xff] }
 0xbfc   : > { %4691 = vmatpush1.msra.mxu0 %v4479_v0  ;;  %v4157_v50 = vpop.permute.xlu0 %4156  ;;  %v4177_v41 = vpop.permute.xlu1 %4176  ;;  %v4229_v6 = vld [vmem:[#allocation7 + $0x90] sm:$0xff]  ;;  %v4226_v0 = vld [vmem:[#allocation7 + $0x78] sm:$0xff] }
 0xbfd   : > { %v4198_v15 = vsel %vm4197_vm9, %v4196_v19, %v4157_v50  ;;  %4692 = vmatprep.subr.mxu0 %v4476_v59  ;;  %v4208_v13 = vsel %vm4207_vm12, %v4206_v39, %v4177_v41  ;;  %v4365_v57 = vld [vmem:[#allocation7 + $0x4d0] sm:$0xff]  ;;  %v4362_v51 = vld [vmem:[#allocation7 + $0x4b8] sm:$0xff] }
 0xbfe   : > { %v7660_v16 = vsel %vm4199_vm8, %v4198_v15, %v4161_v34  ;;  %4693 = vmatpush1.msra.mxu0 %v4475_v62  ;;  %4659 = vmatprep.mubr.f32.mxu1 %v4208_v13  ;;  %v4378_v34 = vld [vmem:[#allocation7 + $0x538] sm:$0xff]  ;;  %v4225_v59 = vld [vmem:[#allocation7 + $0x70] sm:$0xff] }
 0xbff   : > { %4694 = vmatprep.subr.mxu0 %v4472_v24  ;;  %4660 = vmatmul.mubr.f32.vlgmr.msra.gmra.mxu1 %v7660_v16  ;;  %v4361_v39 = vld [vmem:[#allocation7 + $0x4b0] sm:$0xff]  ;;  %v4222_v62 = vld [vmem:[#allocation7 + $0x58] sm:$0xff] }
 0xc00   : > { %4695 = vmatpush1.msra.mxu0 %v4471_v12  ;;  %4738 = vmatpush1.msra.mxu1 %v4273_v46  ;;  %v4181_v47 = vpop.permute.xlu0 %4180  ;;  %v4358_v19 = vld [vmem:[#allocation7 + $0x498] sm:$0xff]  ;;  %v4221_v50 = vld [vmem:[#allocation7 + $0x50] sm:$0xff] }
 0xc01   : > { %v7663_v25 = vsel %vm4209_vm11, %v4177_v41, %v4181_v47  ;;  %4696 = vmatprep.subr.mxu0 %v4468_v28  ;;  %4739 = vmatprep.subr.mxu1 %v4270_v37  ;;  %v4357_v41 = vld [vmem:[#allocation7 + $0x490] sm:$0xff]  ;;  %v4218_v24 = vld [vmem:[#allocation7 + $0x38] sm:$0xff] }
 0xc02   : > { %4801 = vmatprep.mubr.f32.mxu1 %v7652_v14  ;;  %4697 = vmatpush1.msra.mxu0 %v4467_v56  ;;  %v4241_v14 = vld [vmem:[#allocation7 + $0xf0] sm:$0xff]  ;;  %v4354_v15 = vld [vmem:[#allocation7 + $0x478] sm:$0xff] }
 0xc03   : > { %4740 = vmatpush1.msra.mxu1 %v4269_v63  ;;  %5349 = vmatmul.mubr.msk.f32.vlgmr.msra.gmra.mxu0 %vm602_vm0, %v7663_v25  ;;  %v4353_v12 = vld [vmem:[#allocation7 + $0x470] sm:$0xff]  ;;  %v4214_v46 = vld [vmem:[#allocation7 + $0x18] sm:$0xff] }
 0xc04   : > { %4741 = vmatprep.subr.mxu1 %v4266_v7  ;;  %4808 = vmatprep.subr.mxu0 %v4402_v26  ;;  %v4350_v28 = vld [vmem:[#allocation7 + $0x458] sm:$0xff]  ;;  %v4213_v37 = vld [vmem:[#allocation7 + $0x10] sm:$0xff] }
 0xc05   : > { %4742 = vmatpush1.msra.mxu1 %v4265_v29  ;;  %4809 = vmatpush1.msra.mxu0 %v4401_v44  ;;  %v4349_v56 = vld [vmem:[#allocation7 + $0x450] sm:$0xff]  ;;  %v4338_v47 = vld [vmem:[#allocation7 + $0x3f8] sm:$0xff] }
 0xc06   : > { %4872 = vmatprep.mubr.f32.mxu0 %v4208_v13  ;;  %4743 = vmatprep.subr.mxu1 %v4262_v36  ;;  %v4217_v13 = vld [vmem:[#allocation7 + $0x30] sm:$0xff]  ;;  %v4346_v63 = vld [vmem:[#allocation7 + $0x438] sm:$0xff] }
 0xc07   : > { %4810 = vmatprep.subr.mxu0 %v4398_v8  ;;  %4744 = vmatpush1.msra.mxu1 %v4261_v58  ;;  %v4337_v7 = vld [vmem:[#allocation7 + $0x3f0] sm:$0xff]  ;;  %v4334_v29 = vld [vmem:[#allocation7 + $0x3d8] sm:$0xff] }
 0xc08   : > { %4811 = vmatpush1.msra.mxu0 %v4397_v55  ;;  %4745 = vmatprep.subr.mxu1 %v4258_v11  ;;  %v4345_v26 = vld [vmem:[#allocation7 + $0x430] sm:$0xff]  ;;  %v4342_v44 = vld [vmem:[#allocation7 + $0x418] sm:$0xff] }
 0xc09   : > { %4812 = vmatprep.subr.mxu0 %v4394_v53  ;;  %4746 = vmatpush1.msra.mxu1 %v4257_v18  ;;  %v4333_v36 = vld [vmem:[#allocation7 + $0x3d0] sm:$0xff]  ;;  %v4330_v58 = vld [vmem:[#allocation7 + $0x3b8] sm:$0xff] }
 0xc0a   : > { %4813 = vmatpush1.msra.mxu0 %v4393_v61  ;;  %4747 = vmatprep.subr.mxu1 %v4254_v60  ;;  %v4341_v8 = vld [vmem:[#allocation7 + $0x410] sm:$0xff]  ;;  %v4466_v55 = vld [vmem:[#allocation7 + $0x7f8] sm:$0xff] }
 0xc0b   : > { %4814 = vmatprep.subr.mxu0 %v4390_v9  ;;  %4748 = vmatpush1.msra.mxu1 %v4253_v22  ;;  %v4329_v11 = vld [vmem:[#allocation7 + $0x3b0] sm:$0xff]  ;;  %v4326_v18 = vld [vmem:[#allocation7 + $0x398] sm:$0xff] }
 0xc0c   : > { %4815 = vmatpush1.msra.mxu0 %v4389_v4  ;;  %4749 = vmatprep.subr.mxu1 %v4250_v48  ;;  %v4465_v53 = vld [vmem:[#allocation7 + $0x7f0] sm:$0xff]  ;;  %v4462_v61 = vld [vmem:[#allocation7 + $0x7d8] sm:$0xff] }
 0xc0d   : > { %4816 = vmatprep.subr.mxu0 %v4386_v42  ;;  %4750 = vmatpush1.msra.mxu1 %v4249_v31  ;;  %v4325_v60 = vld [vmem:[#allocation7 + $0x390] sm:$0xff]  ;;  %v4322_v22 = vld [vmem:[#allocation7 + $0x378] sm:$0xff] }
 0xc0e   : > { %4817 = vmatpush1.msra.mxu0 %v4385_v5  ;;  %4751 = vmatprep.subr.mxu1 %v4246_v21  ;;  %v4461_v9 = vld [vmem:[#allocation7 + $0x7d0] sm:$0xff]  ;;  %v4458_v4 = vld [vmem:[#allocation7 + $0x7b8] sm:$0xff] }
 0xc0f   : > { %4818 = vmatprep.subr.mxu0 %v4382_v40  ;;  %4752 = vmatpush1.msra.mxu1 %v4245_v17  ;;  %v4321_v48 = vld [vmem:[#allocation7 + $0x370] sm:$0xff]  ;;  %v4318_v31 = vld [vmem:[#allocation7 + $0x358] sm:$0xff] }
 0xc10   : > { %4819 = vmatpush1.msra.mxu0 %v4381_v30  ;;  %4753 = vmatprep.subr.mxu1 %v4242_v27  ;;  %v4457_v42 = vld [vmem:[#allocation7 + $0x7b0] sm:$0xff]  ;;  %v4454_v5 = vld [vmem:[#allocation7 + $0x798] sm:$0xff] }
 0xc11   : > { %4820 = vmatprep.subr.mxu0 %v4378_v34  ;;  %4754 = vmatpush1.msra.mxu1 %v4241_v14  ;;  %v4317_v21 = vld [vmem:[#allocation7 + $0x350] sm:$0xff]  ;;  %v4314_v17 = vld [vmem:[#allocation7 + $0x338] sm:$0xff] }
 0xc12   : > { %4821 = vmatpush1.msra.mxu0 %v4377_v54  ;;  %4755 = vmatprep.subr.mxu1 %v4238_v32  ;;  %v4453_v40 = vld [vmem:[#allocation7 + $0x790] sm:$0xff]  ;;  %v4450_v30 = vld [vmem:[#allocation7 + $0x778] sm:$0xff] }
 0xc13   : > { %4822 = vmatprep.subr.mxu0 %v4374_v49  ;;  %4756 = vmatpush1.msra.mxu1 %v4237_v23  ;;  %v4313_v27 = vld [vmem:[#allocation7 + $0x330] sm:$0xff]  ;;  %v4310_v14 = vld [vmem:[#allocation7 + $0x318] sm:$0xff] }
 0xc14   : > { %4823 = vmatpush1.msra.mxu0 %v4373_v10  ;;  %4757 = vmatprep.subr.mxu1 %v4234_v52  ;;  %v4449_v34 = vld [vmem:[#allocation7 + $0x770] sm:$0xff]  ;;  %v4446_v54 = vld [vmem:[#allocation7 + $0x758] sm:$0xff] }
 0xc15   : > { %4824 = vmatprep.subr.mxu0 %v4370_v2  ;;  %4758 = vmatpush1.msra.mxu1 %v4233_v33  ;;  %v4309_v32 = vld [vmem:[#allocation7 + $0x310] sm:$0xff]  ;;  %v4306_v23 = vld [vmem:[#allocation7 + $0x2f8] sm:$0xff] }
 0xc16   : > { %4825 = vmatpush1.msra.mxu0 %v4369_v43  ;;  %4759 = vmatprep.subr.mxu1 %v4230_v38  ;;  %v4445_v49 = vld [vmem:[#allocation7 + $0x750] sm:$0xff]  ;;  %v4442_v10 = vld [vmem:[#allocation7 + $0x738] sm:$0xff] }
 0xc17   : > { %4826 = vmatprep.subr.mxu0 %v4366_v35  ;;  %4760 = vmatpush1.msra.mxu1 %v4229_v6  ;;  %v4305_v52 = vld [vmem:[#allocation7 + $0x2f0] sm:$0xff]  ;;  %v4302_v33 = vld [vmem:[#allocation7 + $0x2d8] sm:$0xff] }
 0xc18   : > { %4827 = vmatpush1.msra.mxu0 %v4365_v57  ;;  %4761 = vmatprep.subr.mxu1 %v4226_v0  ;;  %v4441_v2 = vld [vmem:[#allocation7 + $0x730] sm:$0xff]  ;;  %v4438_v43 = vld [vmem:[#allocation7 + $0x718] sm:$0xff] }
 0xc19   : > { %4828 = vmatprep.subr.mxu0 %v4362_v51  ;;  %4762 = vmatpush1.msra.mxu1 %v4225_v59  ;;  %v4301_v38 = vld [vmem:[#allocation7 + $0x2d0] sm:$0xff]  ;;  %v4298_v6 = vld [vmem:[#allocation7 + $0x2b8] sm:$0xff] }
 0xc1a   : > { %4829 = vmatpush1.msra.mxu0 %v4361_v39  ;;  %4763 = vmatprep.subr.mxu1 %v4222_v62  ;;  %v4437_v35 = vld [vmem:[#allocation7 + $0x710] sm:$0xff]  ;;  %v4434_v57 = vld [vmem:[#allocation7 + $0x6f8] sm:$0xff] }
 0xc1b   : > { %4830 = vmatprep.subr.mxu0 %v4358_v19  ;;  %4764 = vmatpush1.msra.mxu1 %v4221_v50  ;;  %v4297_v0 = vld [vmem:[#allocation7 + $0x2b0] sm:$0xff]  ;;  %v4294_v59 = vld [vmem:[#allocation7 + $0x298] sm:$0xff] }
 0xc1c   : > { %4831 = vmatpush1.msra.mxu0 %v4357_v41  ;;  %4765 = vmatprep.subr.mxu1 %v4218_v24  ;;  %v4433_v51 = vld [vmem:[#allocation7 + $0x6f0] sm:$0xff]  ;;  %v4430_v39 = vld [vmem:[#allocation7 + $0x6d8] sm:$0xff] }
 0xc1d   : > { %4832 = vmatprep.subr.mxu0 %v4354_v15  ;;  %4766 = vmatpush1.msra.mxu1 %v4217_v13  ;;  %v4293_v62 = vld [vmem:[#allocation7 + $0x290] sm:$0xff]  ;;  %v4290_v50 = vld [vmem:[#allocation7 + $0x278] sm:$0xff] }
 0xc1e   : > { %4833 = vmatpush1.msra.mxu0 %v4353_v12  ;;  %4767 = vmatprep.subr.mxu1 %v4214_v46  ;;  %v4429_v19 = vld [vmem:[#allocation7 + $0x6d0] sm:$0xff]  ;;  %v4426_v41 = vld [vmem:[#allocation7 + $0x6b8] sm:$0xff] }
 0xc1f   : > { %4834 = vmatprep.subr.mxu0 %v4350_v28  ;;  %4768 = vmatpush1.msra.mxu1 %v4213_v37  ;;  %v4289_v24 = vld [vmem:[#allocation7 + $0x270] sm:$0xff]  ;;  %v4286_v13 = vld [vmem:[#allocation7 + $0x258] sm:$0xff] }
 0xc20   : > { %4835 = vmatpush1.msra.mxu0 %v4349_v56  ;;  %4769 = vmatprep.subr.mxu1 %v4338_v47  ;;  %v4425_v15 = vld [vmem:[#allocation7 + $0x6b0] sm:$0xff]  ;;  %v4422_v12 = vld [vmem:[#allocation7 + $0x698] sm:$0xff] }
 0xc21   : > { %4836 = vmatprep.subr.mxu0 %v4346_v63  ;;  %4770 = vmatpush2.msra.mxu1 %v4337_v7  ;;  %v4285_v46 = vld [vmem:[#allocation7 + $0x250] sm:$0xff]  ;;  %v4282_v37 = vld [vmem:[#allocation7 + $0x238] sm:$0xff] }
 0xc22   : > { %4837 = vmatpush1.msra.mxu0 %v4345_v26  ;;  %4771 = vmatprep.subr.mxu1 %v4334_v29  ;;  %v4421_v28 = vld [vmem:[#allocation7 + $0x690] sm:$0xff]  ;;  %v4418_v56 = vld [vmem:[#allocation7 + $0x678] sm:$0xff] }
 0xc23   : > { %4838 = vmatprep.subr.mxu0 %v4342_v44  ;;  %4772 = vmatpush2.msra.mxu1 %v4333_v36  ;;  %v4281_v47 = vld [vmem:[#allocation7 + $0x230] sm:$0xff]  ;;  %v4278_v7 = vld [vmem:[#allocation7 + $0x218] sm:$0xff] }
 0xc24   : > { %4839 = vmatpush1.msra.mxu0 %v4341_v8  ;;  %4773 = vmatprep.subr.mxu1 %v4330_v58  ;;  %v4417_v63 = vld [vmem:[#allocation7 + $0x670] sm:$0xff]  ;;  %v4414_v26 = vld [vmem:[#allocation7 + $0x658] sm:$0xff] }
 0xc25   : > { %4840 = vmatprep.subr.mxu0 %v4466_v55  ;;  %4774 = vmatpush2.msra.mxu1 %v4329_v11  ;;  %v4277_v29 = vld [vmem:[#allocation7 + $0x210] sm:$0xff]  ;;  %v4410_v36 = vld [vmem:[#allocation7 + $0x638] sm:$0xff] }
 0xc26   : > { %4841 = vmatpush2.msra.mxu0 %v4465_v53  ;;  %4775 = vmatprep.subr.mxu1 %v4326_v18  ;;  %v4413_v44 = vld [vmem:[#allocation7 + $0x650] sm:$0xff]  ;;  %v4498_v8 = vld [vmem:[#allocation7 + $0x8f8] sm:$0xff] }
 0xc27   : > { %4842 = vmatprep.subr.mxu0 %v4462_v61  ;;  %4776 = vmatpush2.msra.mxu1 %v4325_v60  ;;  %v4409_v58 = vld [vmem:[#allocation7 + $0x630] sm:$0xff]  ;;  %v4406_v11 = vld [vmem:[#allocation7 + $0x618] sm:$0xff] }
 0xc28   : > { %4843 = vmatpush2.msra.mxu0 %v4461_v9  ;;  %4777 = vmatprep.subr.mxu1 %v4322_v22  ;;  %v4497_v55 = vld [vmem:[#allocation7 + $0x8f0] sm:$0xff]  ;;  %v4494_v53 = vld [vmem:[#allocation7 + $0x8d8] sm:$0xff] }
 0xc29   : > { %4844 = vmatprep.subr.mxu0 %v4458_v4  ;;  %4778 = vmatpush2.msra.mxu1 %v4321_v48  ;;  %v4405_v18 = vld [vmem:[#allocation7 + $0x610] sm:$0xff]  ;;  %v4490_v60 = vld [vmem:[#allocation7 + $0x8b8] sm:$0xff] }
 0xc2a   : > { %4845 = vmatpush2.msra.mxu0 %v4457_v42  ;;  %4779 = vmatprep.subr.mxu1 %v4318_v31  ;;  %v4493_v61 = vld [vmem:[#allocation7 + $0x8d0] sm:$0xff]  ;;  %v4486_v22 = vld [vmem:[#allocation7 + $0x898] sm:$0xff] }
 0xc2b   : > { %4846 = vmatprep.subr.mxu0 %v4454_v5  ;;  %4780 = vmatpush2.msra.mxu1 %v4317_v21  ;;  %v4489_v9 = vld [vmem:[#allocation7 + $0x8b0] sm:$0xff]  ;;  %v4985_v4 = vld [vmem:[%s7923_s13 + $0xf8] sm:$0xff] }
 0xc2c   : > { %4847 = vmatpush2.msra.mxu0 %v4453_v40  ;;  %4781 = vmatprep.subr.mxu1 %v4314_v17  ;;  %v4969_v48 = vld [vmem:[%s7923_s13 + $0x78] sm:$0xff]  ;;  %v4984_v31 = vld [vmem:[%s7923_s13 + $0xf0] sm:$0xff]  ;;  %v4983_v40 = vld [vmem:[%s7923_s13 + $0xe8] sm:$0xff] }
 0xc2d   : > { %4848 = vmatprep.subr.mxu0 %v4450_v30  ;;  %4782 = vmatpush2.msra.mxu1 %v4313_v27  ;;  %v4482_v42 = vld [vmem:[#allocation7 + $0x878] sm:$0xff]  ;;  %v4481_v5 = vld [vmem:[#allocation7 + $0x870] sm:$0xff]  ;;  %v4967_v17 = vld [vmem:[%s7923_s13 + $0x68] sm:$0xff] }
 0xc2e   : > { %4849 = vmatpush2.msra.mxu0 %v4449_v34  ;;  %4783 = vmatprep.subr.mxu1 %v4310_v14  ;;  %v4478_v21 = vld [vmem:[#allocation7 + $0x858] sm:$0xff]  ;;  %v4982_v27 = vld [vmem:[%s7923_s13 + $0xe0] sm:$0xff]  ;;  %v4473_v34 = vld [vmem:[#allocation7 + $0x830] sm:$0xff] }
 0xc2f   : > { %4850 = vmatprep.subr.mxu0 %v4446_v54  ;;  %4784 = vmatpush2.msra.mxu1 %v4309_v32  ;;  %v4474_v30 = vld [vmem:[#allocation7 + $0x838] sm:$0xff]  ;;  %v4966_v14 = vld [vmem:[%s7923_s13 + $0x60] sm:$0xff] }
 0xc30   : > { %4851 = vmatpush2.msra.mxu0 %v4445_v49  ;;  %4785 = vmatprep.subr.mxu1 %v4306_v23  ;;  %v4470_v54 = vld [vmem:[#allocation7 + $0x818] sm:$0xff]  ;;  %v4469_v49 = vld [vmem:[#allocation7 + $0x810] sm:$0xff] }
 0xc31   : > { %4852 = vmatprep.subr.mxu0 %v4442_v10  ;;  %4786 = vmatpush2.msra.mxu1 %v4305_v52  ;;  %v4981_v32 = vld [vmem:[%s7923_s13 + $0xd8] sm:$0xff]  ;;  %v4980_v10 = vld [vmem:[%s7923_s13 + $0xd0] sm:$0xff] }
 0xc32   : > { %4853 = vmatpush2.msra.mxu0 %v4441_v2  ;;  %4787 = vmatprep.subr.mxu1 %v4302_v33  ;;  %v4965_v23 = vld [vmem:[%s7923_s13 + $0x58] sm:$0xff]  ;;  %v4964_v52 = vld [vmem:[%s7923_s13 + $0x50] sm:$0xff]  ;;  %v4979_v33 = vld [vmem:[%s7923_s13 + $0xc8] sm:$0xff] }
 0xc33   : > { %4854 = vmatprep.subr.mxu0 %v4438_v43  ;;  %4788 = vmatpush2.msra.mxu1 %v4301_v38  ;;  %v5017_v2 = vld [vmem:[%s7923_s13 + $0x1f8] sm:$0xff]  ;;  %v4963_v38 = vld [vmem:[%s7923_s13 + $0x48] sm:$0xff] }
 0xc34   : > { %4855 = vmatpush2.msra.mxu0 %v4437_v35  ;;  %4789 = vmatprep.subr.mxu1 %v4298_v6  ;;  %v5001_v43 = vld [vmem:[%s7923_s13 + $0x178] sm:$0xff]  ;;  %v5016_v35 = vld [vmem:[%s7923_s13 + $0x1f0] sm:$0xff]  ;;  %v4978_v6 = vld [vmem:[%s7923_s13 + $0xc0] sm:$0xff] }
 0xc35   : > { %4856 = vmatprep.subr.mxu0 %v4434_v57  ;;  %4790 = vmatpush2.msra.mxu1 %v4297_v0  ;;  %v5000_v57 = vld [vmem:[%s7923_s13 + $0x170] sm:$0xff]  ;;  %v5015_v0 = vld [vmem:[%s7923_s13 + $0x1e8] sm:$0xff] }
 0xc36   : > { %4857 = vmatpush2.msra.mxu0 %v4433_v51  ;;  %4791 = vmatprep.subr.mxu1 %v4294_v59  ;;  %v4977_v51 = vld [vmem:[%s7923_s13 + $0xb8] sm:$0xff]  ;;  %v4999_v59 = vld [vmem:[%s7923_s13 + $0x168] sm:$0xff] }
 0xc37   : > { %4858 = vmatprep.subr.mxu0 %v4430_v39  ;;  %4792 = vmatpush2.msra.mxu1 %v4293_v62  ;;  %v4961_v39 = vld [vmem:[%s7923_s13 + $0x38] sm:$0xff]  ;;  %v5014_v62 = vld [vmem:[%s7923_s13 + $0x1e0] sm:$0xff] }
 0xc38   : > { %4859 = vmatpush2.msra.mxu0 %v4429_v19  ;;  %4793 = vmatprep.subr.mxu1 %v4290_v50  ;;  %v4976_v19 = vld [vmem:[%s7923_s13 + $0xb0] sm:$0xff]  ;;  %v4998_v50 = vld [vmem:[%s7923_s13 + $0x160] sm:$0xff] }
 0xc39   : > { %4860 = vmatprep.subr.mxu0 %v4426_v41  ;;  %4794 = vmatpush2.msra.mxu1 %v4289_v24  ;;  %v4960_v41 = vld [vmem:[%s7923_s13 + $0x30] sm:$0xff]  ;;  %v4975_v24 = vld [vmem:[%s7923_s13 + $0xa8] sm:$0xff] }
 0xc3a   : > { %4861 = vmatpush2.msra.mxu0 %v4425_v15  ;;  %4795 = vmatprep.subr.mxu1 %v4286_v13  ;;  %v4959_v15 = vld [vmem:[%s7923_s13 + $0x28] sm:$0xff]  ;;  %v4974_v13 = vld [vmem:[%s7923_s13 + $0xa0] sm:$0xff] }
 0xc3b   : > { %4862 = vmatprep.subr.mxu0 %v4422_v12  ;;  %4796 = vmatpush2.msra.mxu1 %v4285_v46  ;;  %v4958_v12 = vld [vmem:[%s7923_s13 + $0x20] sm:$0xff]  ;;  %v4973_v46 = vld [vmem:[%s7923_s13 + $0x98] sm:$0xff] }
 0xc3c   : > { %4863 = vmatpush2.msra.mxu0 %v4421_v28  ;;  %4797 = vmatprep.subr.mxu1 %v4282_v37  ;;  %v4957_v28 = vld [vmem:[%s7923_s13 + $0x18] sm:$0xff]  ;;  %v4972_v37 = vld [vmem:[%s7923_s13 + $0x90] sm:$0xff] }
 0xc3d   : > { %4864 = vmatprep.subr.mxu0 %v4418_v56  ;;  %4798 = vmatpush2.msra.mxu1 %v4281_v47  ;;  %v4956_v56 = vld [vmem:[%s7923_s13 + $0x10] sm:$0xff]  ;;  %v4971_v47 = vld [vmem:[%s7923_s13 + $0x88] sm:$0xff] }
 0xc3e   : > { %4865 = vmatpush2.msra.mxu0 %v4417_v63  ;;  %4799 = vmatprep.subr.mxu1 %v4278_v7  ;;  %v4955_v63 = vld [vmem:[%s7923_s13 + $0x8] sm:$0xff]  ;;  %v4970_v7 = vld [vmem:[%s7923_s13 + $0x80] sm:$0xff] }
 0xc3f   : > { %4866 = vmatprep.subr.mxu0 %v4414_v26  ;;  %4800 = vmatpush2.msra.mxu1 %v4277_v29  ;;  %v4954_v26 = vld [vmem:[%s7923_s13] sm:$0xff]  ;;  %v5013_v29 = vld [vmem:[%s7923_s13 + $0x1d8] sm:$0xff] }
 0xc40   : > { %4867 = vmatpush2.msra.mxu0 %v4413_v44  ;;  %4802 = vmatmul.mubr.f32.vlgmr.msra.gmra.mxu1 %v7654_v20  ;;  %v4485_v20 = vld [vmem:[#allocation7 + $0x890] sm:$0xff]  ;;  %v4997_v44 = vld [vmem:[%s7923_s13 + $0x158] sm:$0xff] }
 0xc41   : > { %4868 = vmatprep.subr.mxu0 %v4410_v36  ;;  %4895 = vmatprep.subr.mxu1 %v4498_v8  ;;  %v5012_v36 = vld [vmem:[%s7923_s13 + $0x1d0] sm:$0xff] }
 0xc42   : > { %4869 = vmatpush2.msra.mxu0 %v4409_v58  ;;  %4896 = vmatpush1.msra.mxu1 %v4497_v55  ;;  %v4996_v8 = vld [vmem:[%s7923_s13 + $0x150] sm:$0xff]  ;;  %v5011_v58 = vld [vmem:[%s7923_s13 + $0x1c8] sm:$0xff] }
 0xc43   : > { %4870 = vmatprep.subr.mxu0 %v4406_v11  ;;  %4897 = vmatprep.subr.mxu1 %v4494_v53  ;;  %v4995_v55 = vld [vmem:[%s7923_s13 + $0x148] sm:$0xff]  ;;  %v5010_v11 = vld [vmem:[%s7923_s13 + $0x1c0] sm:$0xff] }
 0xc44   : > { %4871 = vmatpush2.msra.mxu0 %v4405_v18  ;;  %4898 = vmatpush1.msra.mxu1 %v4493_v61  ;;  %v4994_v53 = vld [vmem:[%s7923_s13 + $0x140] sm:$0xff]  ;;  %v5009_v18 = vld [vmem:[%s7923_s13 + $0x1b8] sm:$0xff] }
 0xc45   : > { %4873 = vmatmul.mubr.f32.vlgmr.msra.gmra.mxu0 %v7660_v16  ;;  %4899 = vmatprep.subr.mxu1 %v4490_v60  ;;  %v4968_v16 = vld [vmem:[%s7923_s13 + $0x70] sm:$0xff]  ;;  %v4993_v61 = vld [vmem:[%s7923_s13 + $0x138] sm:$0xff] }
 0xc46   : > { %4900 = vmatpush1.msra.mxu1 %v4489_v9  ;;  %4943 = vmatprep.mubr.f32.mxu1 %v5890_v45  ;;  %v4477_v45 = vld [vmem:[#allocation7 + $0x850] sm:$0xff] }
 0xc47   : > { %4901 = vmatprep.subr.mxu1 %v4486_v22  ;;  %5400 = vmatprep.subr.mxu0 %v4985_v4  ;;  %v5008_v60 = vld [vmem:[%s7923_s13 + $0x1b0] sm:$0xff]  ;;  %v5007_v22 = vld [vmem:[%s7923_s13 + $0x1a8] sm:$0xff] }
 0xc48   : > { %4902 = vmatpush1.msra.mxu1 %v4485_v20  ;;  %5401 = vmatpush3.msra.mxu0 %v4969_v48  ;;  %v4992_v9 = vld [vmem:[%s7923_s13 + $0x130] sm:$0xff]  ;;  %v4991_v4 = vld [vmem:[%s7923_s13 + $0x128] sm:$0xff]  ;;  %v5006_v20 = vld [vmem:[%s7923_s13 + $0x1a0] sm:$0xff] }
 0xc49   : > { %4903 = vmatprep.subr.mxu1 %v4482_v42  ;;  %5402 = vmatprep.subr.mxu0 %v4984_v31  ;;  %v4990_v48 = vld [vmem:[%s7923_s13 + $0x120] sm:$0xff]  ;;  %v5005_v42 = vld [vmem:[%s7923_s13 + $0x198] sm:$0xff] }
 0xc4a   : > { %4904 = vmatpush1.msra.mxu1 %v4481_v5  ;;  %5403 = vmatpush3.msra.mxu0 %v4968_v16  ;;  %v4989_v31 = vld [vmem:[%s7923_s13 + $0x118] sm:$0xff]  ;;  %v5004_v5 = vld [vmem:[%s7923_s13 + $0x190] sm:$0xff] }
 0xc4b   : > { %4905 = vmatprep.subr.mxu1 %v4478_v21  ;;  %5404 = vmatprep.subr.mxu0 %v4983_v40  ;;  %v4988_v16 = vld [vmem:[%s7923_s13 + $0x110] sm:$0xff]  ;;  %v5003_v21 = vld [vmem:[%s7923_s13 + $0x188] sm:$0xff] }
 0xc4c   : > { %4906 = vmatpush1.msra.mxu1 %v4477_v45  ;;  %5405 = vmatpush3.msra.mxu0 %v4967_v17  ;;  %v4987_v40 = vld [vmem:[%s7923_s13 + $0x108] sm:$0xff]  ;;  %v5002_v45 = vld [vmem:[%s7923_s13 + $0x180] sm:$0xff] }
 0xc4d   : > { %4907 = vmatprep.subr.mxu1 %v4474_v30  ;;  %5406 = vmatprep.subr.mxu0 %v4982_v27  ;;  %v4986_v17 = vld [vmem:[%s7923_s13 + $0x100] sm:$0xff] }
 0xc4e   : > { %4908 = vmatpush1.msra.mxu1 %v4473_v34  ;;  %5407 = vmatpush3.msra.mxu0 %v4966_v14  ;;  %v4499_v30 = vld [vmem:[#allocation8] sm:$0xf]  ;;  %v7979_v14 = vsub.s32 1, %v6110_v1 }
 0xc4f   : > { %4909 = vmatprep.subr.mxu1 %v4470_v54  ;;  %5408 = vmatprep.subr.mxu0 %v4981_v32  ;;  %v4504_v34 = vrot.slane %v4499_v30, %v564_v3  ;;  %v7980_v3 = vsub.s32 2, %v6110_v1 }
 0xc50   : > { %4910 = vmatpush1.msra.mxu1 %v4469_v49  ;;  %5409 = vmatpush3.msra.mxu0 %v4965_v23  ;;  %v4508_v54 = vrot.slane %v4499_v30, %v7979_v14 }
 0xc51   : > { %5350 = vmatmul.mubr.msk.f32.vlgmr.msra.gmra.mxu1 %vm602_vm0, %v7663_v25  ;;  %5410 = vmatprep.subr.mxu0 %v4980_v10  ;;  %v4962_v25 = vld [vmem:[%s7923_s13 + $0x40] sm:$0xff]  ;;  %vm5159_vm0 = vcmask 73728  }
 0xc52   : > { %5411 = vmatpush3.msra.mxu0 %v4964_v52  ;;  %5435 = vmatprep.subr.mxu1 %v5017_v2 }
 0xc53   : > { %5412 = vmatprep.subr.mxu0 %v4979_v33  ;;  %5436 = vmatpush3.msra.mxu1 %v5001_v43 }
 0xc54   : > { %5413 = vmatpush3.msra.mxu0 %v4963_v38  ;;  %5437 = vmatprep.subr.mxu1 %v5016_v35 }
 0xc55   : > { %5414 = vmatprep.subr.mxu0 %v4978_v6  ;;  %5438 = vmatpush3.msra.mxu1 %v5000_v57 }
 0xc56   : > { %5415 = vmatpush3.msra.mxu0 %v4962_v25  ;;  %5439 = vmatprep.subr.mxu1 %v5015_v0 }
 0xc57   : > { %5416 = vmatprep.subr.mxu0 %v4977_v51  ;;  %5440 = vmatpush3.msra.mxu1 %v4999_v59  ;;  %v4512_v51 = vrot.slane %v4499_v30, %v7980_v3 }
 0xc58   : > { %5417 = vmatpush3.msra.mxu0 %v4961_v39  ;;  %5441 = vmatprep.subr.mxu1 %v5014_v62  ;;  %v7981_v39 = vsub.s32 3, %v6110_v1 }
 0xc59   : > { %5418 = vmatprep.subr.mxu0 %v4976_v19  ;;  %5442 = vmatpush3.msra.mxu1 %v4998_v50 }
 0xc5a   : > { %5419 = vmatpush3.msra.mxu0 %v4960_v41  ;;  %5443 = vmatprep.subr.mxu1 %v5013_v29  ;;  %v4516_v62 = vrot.slane %v4499_v30, %v7981_v39  ;;  %v5018_v29 = vld [vmem:[#allocation10] sm:$0x1] }
 0xc5b   : > { %5420 = vmatprep.subr.mxu0 %v4975_v24  ;;  %5444 = vmatpush3.msra.mxu1 %v4997_v44 }
 0xc5c   : > { %5421 = vmatpush3.msra.mxu0 %v4959_v15  ;;  %5445 = vmatprep.subr.mxu1 %v5012_v36 }
 0xc5d   : > { %5422 = vmatprep.subr.mxu0 %v4974_v13  ;;  %5446 = vmatpush3.msra.mxu1 %v4996_v8 }
 0xc5e   : > { %5423 = vmatpush3.msra.mxu0 %v4958_v12  ;;  %5447 = vmatprep.subr.mxu1 %v5011_v58 }
 0xc5f   : > { %5424 = vmatprep.subr.mxu0 %v4973_v46  ;;  %5448 = vmatpush3.msra.mxu1 %v4995_v55 }
 0xc60   : > { %5425 = vmatpush3.msra.mxu0 %v4957_v28  ;;  %5449 = vmatprep.subr.mxu1 %v5010_v11 }
 0xc61   : > { %5426 = vmatprep.subr.mxu0 %v4972_v37  ;;  %5450 = vmatpush3.msra.mxu1 %v4994_v53 }
 0xc62   : > { %5427 = vmatpush3.msra.mxu0 %v4956_v56  ;;  %5451 = vmatprep.subr.mxu1 %v5009_v18 }
 0xc63   : > { %5428 = vmatprep.subr.mxu0 %v4971_v47  ;;  %5452 = vmatpush3.msra.mxu1 %v4993_v61 }
 0xc64   : > { %5429 = vmatpush3.msra.mxu0 %v4955_v63  ;;  %5453 = vmatprep.subr.mxu1 %v5008_v60 }
 0xc65   : > { %5430 = vmatprep.subr.mxu0 %v4970_v7  ;;  %5454 = vmatpush3.msra.mxu1 %v4992_v9 }
 0xc66   : > { %5431 = vmatpush3.msra.mxu0 %v4954_v26  ;;  %5455 = vmatprep.subr.mxu1 %v5007_v22 }
 0xc67   : > { %5456 = vmatpush3.msra.mxu1 %v4991_v4 }
 0xc68   : > { %5457 = vmatprep.subr.mxu1 %v5006_v20 }
 0xc69   : > { %5458 = vmatpush3.msra.mxu1 %v4990_v48 }
 0xc6a   : > { %5459 = vmatprep.subr.mxu1 %v5005_v42 }
 0xc6b   : > { %5460 = vmatpush3.msra.mxu1 %v4989_v31 }
 0xc6c   : > { %5461 = vmatprep.subr.mxu1 %v5004_v5 }
 0xc6d   : > { %5462 = vmatpush3.msra.mxu1 %v4988_v16 }
 0xc6e   : > { %5463 = vmatprep.subr.mxu1 %v5003_v21 }
 0xc6f   : > { %5464 = vmatpush3.msra.mxu1 %v4987_v40 }
 0xc70   : > { %5465 = vmatprep.subr.mxu1 %v5002_v45 }
 0xc71   : > { %5466 = vmatpush3.msra.mxu1 %v4986_v17 }
 0xcb3   : > { %v4590_v27 = vpop.f32.mrf.mxu0 }
 0xcb4   : > { %v4591_v49 = vadd.f32 %v4590_v27, %v4504_v34 }
 0xcb5   : > { %v4592_v32 = vpop.f32.mrf.mxu0 }
 0xcb6   : > { %v4593_v10 = vadd.f32 %v4592_v32, %v4508_v54 }
 0xcbf   : > { %v4661_v23 = vpop.f32.mrf.mxu1 }
 0xcc0   : > { %v4662_v52 = vadd.f32 %v4661_v23, %v4591_v49 }
 0xcc1   : > { %v4663_v2 = vpop.f32.mrf.mxu1 }
 0xcc2   : > { %v4664_v33 = vadd.f32 %v4663_v2, %v4593_v10 }
 0xcc3   : > { %v4732_v43 = vpop.f32.mrf.mxu0 }
 0xcc4   : > { %v4733_v38 = vadd.f32 %v4732_v43, %v4662_v52 }
 0xcc5   : > { %v4734_v35 = vpop.f32.mrf.mxu0 }
 0xcc6   : > { %v4735_v6 = vadd.f32 %v4734_v35, %v4664_v33  ;;  %v4950_v25 = vmax.f32 %v4733_v38, 0.0 }
 0xcc8   : > { %v4951_v57 = vmax.f32 %v4735_v6, 0.0 }
 0xcca   : > { %5083 = vmatprep.mubr.f32.mxu0 %v4951_v57 }
 0xccb   : > { %5084 = vmatmul.mubr.f32.vlgmr.msra.gmra.mxu0 %v4950_v25 }
 0xd00   : > { %v4803_v0 = vpop.f32.mrf.mxu1 }
 0xd01   : > { %v4804_v50 = vadd.f32 %v4803_v0, %v4512_v51 }
 0xd02   : > { %v4805_v19 = vpop.f32.mrf.mxu1 }
 0xd03   : > { %v4806_v24 = vadd.f32 %v4805_v19, %v4516_v62 }
 0xd05   : > { %v4874_v59 = vpop.f32.mrf.mxu0 }
 0xd06   : > { %v4875_v15 = vadd.f32 %v4874_v59, %v4804_v50 }
 0xd07   : > { %v4876_v41 = vpop.f32.mrf.mxu0 }
 0xd08   : > { %v4877_v12 = vadd.f32 %v4876_v41, %v4806_v24 }
 0xd11   : > { %v4945_v13 = vpop.f32.mrf.mxu1 }
 0xd12   : > { %v4946_v46 = vadd.f32 %v4945_v13, %v4875_v15 }
 0xd13   : > { %v4947_v28 = vpop.f32.mrf.mxu1 }
 0xd14   : > { %v4948_v37 = vadd.f32 %v4947_v28, %v4877_v12  ;;  %v4952_v47 = vmax.f32 %v4946_v46, 0.0 }
 0xd16   : > { %v4953_v56 = vmax.f32 %v4948_v37, 0.0 }
 0xd18   : > { %5153 = vmatprep.mubr.f32.mxu1 %v4953_v56 }
 0xd19   : > { %5154 = vmatmul.mubr.f32.vlgmr.msra.gmra.mxu1 %v4952_v47 }
 0xd8b   : > { %v5432_v63 = vpop.f32.mrf.mxu0 }
 0xd8d   : > { %v5433_v7 = vpop.f32.mrf.mxu0 }
 0xd8e   : > { %v5434_v26 = vadd.f32 %v5433_v7, %v5432_v63 }
 0xd90   : > { %v5086_v36 = vadd.f32 %v5434_v26, %v5018_v29 }
 0xdd9   : > { %v5467_v1 = vpop.f32.mrf.mxu1 }
 0xddb   : > { %v5468_v44 = vpop.f32.mrf.mxu1 }
 0xddc   : > { %v5469_v8 = vadd.f32 %v5468_v44, %v5467_v1 }
 0xdde   : > { %v5156_v58 = vadd.f32 %v5469_v8, %v5086_v36 }
 0xde0   : > { %v5160_v55 = vsel %vm5159_vm0, %v5156_v58, -inf }
 0xde1   : > { %5161 = vmax.xlane.f32.xlu1 %v5160_v55 }
 0xe6a   : > { %v5162_v11 = vpop.xlane.xlu1 %5161 }
 0xe6b   : > { %v5163_v53 = vsub.f32 %v5156_v58, %v5162_v11 }
 0xe6d   : > { %v5164_v18 = vmul.f32 1.442695, %v5163_v53 }
 0xe6f   : > { %5666 = vpow2.f32 %v5164_v18 }
 0xe7c   : > { %v5667_v61 = vpop.eup %5666 }
 0xe7d   : > { %v5166_v60 = vsel %vm5159_vm0, %v5667_v61, 0.0 }
 0xe7e   : > { %5167 = vadd.xlane.f32.xlu0 %v5166_v60 }
 0xf07   : > { %v5168_v9 = vpop.xlane.xlu0 %5167 }
 0xf08   : > { %5668 = vrcp.f32 %v5168_v9 }
 0xf15   : > { %v5669_v22 = vpop.eup %5668 }
 0xf16   : > { %v5170_v4 = vmul.f32 %v5669_v22, %v5667_v61 }
 0xf18   : > { %5171 = vst.msk [vmem:[%s553_s18] sm:$0x1] %vm5159_vm0, %v5170_v4 }
 0xf19   : > { %5813 = shalt.err (!%p5810_p10)
}
 0xf1a   : > { %s5814_s16 = scalar_lea.hbm %s5183_s24, 16  ;;  %s5818_s27 = scalar_lea.hbm %s7982_s26, 32 }
 0xf1b   : > { %p5815_p13 = scmp.ne.s32.totalorder %s5183_s24, %s5814_s16  ;;  %p5819_p2 = scmp.lt.s32.totalorder %s5183_s24, %s7982_s26 }
 0xf1c   : > { %p5820_p12 = scmp.lt.s32.totalorder %s5818_s27, %s5814_s16 }
 0xf1d   : > { %p5816_p1 = pnand %p5815_p13, %p7983_p8 }
 0xf1e   : > { %p5821_p4 = por %p5820_p12, %p5819_p2 }
 0xf1f   : > { %p5817_p3 = pneg %p5816_p1 }
 0xf21   : > { %p5822_p7 = pnand %p5821_p4, %p5817_p3 }
 0xf23   : > { %5825 = shalt.err (!%p5822_p7)
}
 0xf24   : > { %5508 = dma.vmem_to_hbm [thread:$0]  (%p7983_p8), %s5186_s17, 16, %s5183_s24, %s5173_s30  }
 0xf25 PF: > { %s7984_s15 = sld [smem:[#allocation18_spill]] }
 0xf26   : > { %s7985_s23 = sld [smem:[#allocation16_spill]] }
 0xf27   : > { %s7986_s21 = sld [smem:[#allocation21_spill]] }
 0xf2b   : > { %p5540_p9 = scmp.ge.s32.totalorder %s7984_s15, 2 }
 0xf2c   : > { %s5197_s25 = sand.u32 1, %s7985_s23  }
 0xf2d   : > { %p7987_p11 = scmp.ne.s32.totalorder %s7986_s21, 0  ;;  %s5198_s22 = scalar_lea.sflag [#allocation4], %s5197_s25 }
 0xf2f   : > { %p5527_p5 = pnand %p5540_p9, %p7987_p11 }
 0xf31   : > { %p5528_p6 = pneg %p5527_p5 }
 0xf33   : > { %5855 = dma.done.wait (%p5528_p6), %s5198_s22, 16  }
 0xf34   : > { %5857 = vsyncadd (%p5528_p6), %s5198_s22, 4294967280  ;;  %s7988_s21 = sld [smem:[#allocation19_spill]]  ;;  %s7991_s18 = smov %s5864_s19 }
 0xf35   : > { %s7989_s16 = sld [smem:[#allocation17_spill]] }
 0xf36   : > { %s7990_s20 = sld [smem:[#allocation20_spill]] }
 0xf3a   : > { %p28_p0 = scmp.ge.s32.totalorder %s7988_s21, 4  }
 0xf3b   : > { %s7992_s19 = smov %s7989_s16 }
 0xf3c   :  { %30 = sbr.rel (!%p28_p0) target bundleno = 9 (0x9), region = 136 }
 0xf41   :  { %5202 = vsyncpa [#allocation3], 1 }
 0xf42   :  { %5204 = vsyncpa [#allocation3 + $0x1], 1 }
 0xf43   :  { %5205 = vsyncpa [#allocation6], 1 }
 0xf44   :  { %5206 = vsyncpa [#allocation9], 1 }
 0xf45   :  { %5207 = vsyncpa [#allocation4], 1 }
 0xf46   :  { %5209 = vsyncpa [#allocation4 + $0x1], 1 }

</bundles_post_ra>
